<compile_context>
chip_gen: v5e
topology: v5e:2x2
jax: 0.10.0
libtpu: 0.0.40
codegen_flags: <defaults>
</compile_context>

<pallas_src>
import functools

import jax
import jax.numpy as jnp
from jax.experimental import pallas as pl
from jax.experimental.pallas import tpu as pltpu


# ----------------------------------------------------------------------------
# Fused Pallas kernel: conv1+pool -> conv2+pool -> fc1 -> fc2 -> fc3 -> log_softmax
# ----------------------------------------------------------------------------
def _cnn_kernel(xr_ref, a1_ref, a2_ref, bc1_ref, bc2_ref,
                w1s_ref, bf1_ref, w2t_ref, bf2_ref, w3t_ref, bf3_ref, o_ref):
    """One image per grid step, entirely in VMEM.

    xr_ref : (1, 4, 8, 128) image rows grouped by (row mod 4); lane = w*3+c, 0-padded to 128
    a1_ref : (5, 2, 128, 84) conv1 banded weights  [row-tap i, W-pool parity p]
    a2_ref : (5, 2, 84, 80)  conv2 banded weights
    bc1_ref: (1, 84)  conv1 bias tiled over the 14 pooled W positions
    bc2_ref: (1, 80)  conv2 bias tiled over the 5 pooled W positions
    w1s_ref: (5, 80, 120) fc1 weight with the NCHW flatten permutation folded in
    bf1/2/3: (1,120) / (1,84) / (1,C) fc biases ; w2t: (120,84) ; w3t: (84,C)
    o_ref  : (1, 1, C) log-probabilities for this image
    """
    f32 = jnp.float32

    # ---------------- conv1 + bias + ReLU + 2x2 max-pool ----------------
    # Residue-r slab row b corresponds to conv1 output row (4b + r), b = 0..6.
    def conv1_residue(r):
        acc_e = None
        acc_o = None
        for i in range(5):                      # kernel row tap
            q = r + i
            s, off = q % 4, q // 4              # input row-slab / offset inside it
            xs = xr_ref[0, s, off:off + 7, :]   # (7, 128) = image rows 4b + r + i
            d_e = jnp.dot(xs, a1_ref[i, 0], preferred_element_type=f32)
            d_o = jnp.dot(xs, a1_ref[i, 1], preferred_element_type=f32)
            acc_e = d_e if acc_e is None else acc_e + d_e
            acc_o = d_o if acc_o is None else acc_o + d_o
        # max over the two W-pool parities, then bias (identical for both parities)
        return jnp.maximum(acc_e, acc_o) + bc1_ref[...]        # (7, 84)

    u0 = conv1_residue(0)
    u1 = conv1_residue(1)
    u2 = conv1_residue(2)
    u3 = conv1_residue(3)
    # H-pool: conv rows (4a, 4a+1) -> pooled row 2a ; (4a+2, 4a+3) -> pooled row 2a+1
    p1_even = jnp.maximum(jnp.maximum(u0, u1), 0.0)   # pooled1 rows 0,2,...,12   (7, 84)
    p1_odd = jnp.maximum(jnp.maximum(u2, u3), 0.0)    # pooled1 rows 1,3,...,13   (7, 84)

    # ---------------- conv2 + bias + ReLU + 2x2 max-pool ----------------
    def conv2_half(parity):
        acc_e = None
        acc_o = None
        for i in range(5):
            if parity == 0:      # conv2 output rows 2t
                src, start = (p1_even, i // 2) if i % 2 == 0 else (p1_odd, (i - 1) // 2)
            else:                # conv2 output rows 2t + 1
                src, start = (p1_odd, i // 2) if i % 2 == 0 else (p1_even, (i + 1) // 2)
            xs = src[start:start + 5, :]                       # (5, 84)
            d_e = jnp.dot(xs, a2_ref[i, 0], preferred_element_type=f32)
            d_o = jnp.dot(xs, a2_ref[i, 1], preferred_element_type=f32)
            acc_e = d_e if acc_e is None else acc_e + d_e
            acc_o = d_o if acc_o is None else acc_o + d_o
        return jnp.maximum(acc_e, acc_o) + bc2_ref[...]        # (5, 80)

    v_even = conv2_half(0)
    v_odd = conv2_half(1)
    p2 = jnp.maximum(jnp.maximum(v_even, v_odd), 0.0)          # (5, 80), lane = w*16 + c

    # ---------------- fc1 + ReLU (flatten permutation folded into w1s) --------
    h = bf1_ref[...]                                           # (1, 120)
    for hr in range(5):
        h = h + jnp.dot(p2[hr:hr + 1, :], w1s_ref[hr], preferred_element_type=f32)
    h = jnp.maximum(h, 0.0)

    # ---------------- fc2 + ReLU ----------------
    h = jnp.dot(h, w2t_ref[...], preferred_element_type=f32) + bf2_ref[...]
    h = jnp.maximum(h, 0.0)                                    # (1, 84)

    # ---------------- fc3 + log_softmax ----------------
    logits = jnp.dot(h, w3t_ref[...], preferred_element_type=f32) + bf3_ref[...]
    m = jnp.max(logits, axis=-1, keepdims=True)
    lse = m + jnp.log(jnp.sum(jnp.exp(logits - m), axis=-1, keepdims=True))
    o_ref[0] = (logits - lse).astype(o_ref.dtype)


# ----------------------------------------------------------------------------
# One-time parameter preparation (banded conv weights, tiled biases, permuted fc1)
# ----------------------------------------------------------------------------
def _conv_band_weights(w, cin, in_width, wp_count, k_pad):
    """w: (cout, cin, 5, 5) PyTorch conv weight ->
       A: (5, 2, k_pad, wp_count*cout) with
       A[i, p, win*cin + ci, wp*cout + co] = w[co, ci, i, win - (2*wp + p)]   (0 <= j <= 4)
    so that  sum_i  rowslab(ho + i) @ A[i, p]  equals conv output row ho at the
    W positions (2*wp + p): patch formation and W-pool-parity compaction are baked
    into the weights and every row tap is one lane-dense MXU matmul."""
    cout = w.shape[0]
    k = jnp.arange(k_pad)
    win = k // cin
    ci = k % cin
    lane = jnp.arange(wp_count * cout)
    wp = lane // cout
    co = lane % cout
    mats = []
    for i in range(5):
        for p in range(2):
            j = win[:, None] - (2 * wp[None, :] + p)                 # (k_pad, L)
            valid = (j >= 0) & (j <= 4) & (k[:, None] < in_width * cin)
            vals = w[co[None, :], ci[:, None], i, jnp.clip(j, 0, 4)]
            mats.append(jnp.where(valid, vals, 0.0).astype(jnp.float32))
    return jnp.stack(mats).reshape(5, 2, k_pad, wp_count * cout)


def prepare_params(params):
    """Done ONCE, outside the forward: fold im2col, pooling parity, the PyTorch
    NCHW flatten order and all weight transposes into kernel-ready operands."""
    a1 = _conv_band_weights(params["conv1_w"], cin=3, in_width=32, wp_count=14, k_pad=128)
    a2 = _conv_band_weights(params["conv2_w"], cin=6, in_width=14, wp_count=5, k_pad=84)
    bc1 = jnp.tile(params["conv1_b"], 14)[None, :]            # (1, 84)  lane = w*6 + c
    bc2 = jnp.tile(params["conv2_b"], 5)[None, :]             # (1, 80)  lane = w*16 + c
    lane = jnp.arange(80)
    wv, cv = lane // 16, lane % 16
    # fc1 consumes pooled2[h, w*16+c]; PyTorch flattens NCHW as c*25 + h*5 + w.
    w1s = jnp.stack([params["fc1_w"][:, cv * 25 + h * 5 + wv].T for h in range(5)])
    return {
        "a1": a1, "a2": a2, "bc1": bc1, "bc2": bc2,
        "w1s": w1s, "b1": params["fc1_b"][None, :],
        "w2t": params["fc2_w"].T, "b2": params["fc2_b"][None, :],
        "w3t": params["fc3_w"].T, "b3": params["fc3_b"][None, :],
    }


def _split_rows(x_nchw):
    """(N,3,32,32) NCHW -> (N, 4, 8, 128): rows grouped by (row mod 4),
    lanes = w*3 + c, zero-padded 96 -> 128 (lane-dense loads, K=128 conv1 dots)."""
    n = x_nchw.shape[0]
    x = jnp.transpose(x_nchw, (0, 2, 3, 1)).reshape(n, 32, 96)
    x = jnp.pad(x, ((0, 0), (0, 0), (0, 32)))
    return x.reshape(n, 8, 4, 128).transpose(0, 2, 1, 3)


# ----------------------------------------------------------------------------
# Forward pass
# ----------------------------------------------------------------------------
def cnn_cifar_forward(x_nchw, kp):
    n = x_nchw.shape[0]
    num_classes = kp["b3"].shape[-1]
    xr = _split_rows(x_nchw.astype(jnp.float32))

    out = pl.pallas_call(
        _cnn_kernel,
        out_shape=jax.ShapeDtypeStruct((n, 1, num_classes), jnp.float32),
        grid=(n,),
        in_specs=[
            pl.BlockSpec((1, 4, 8, 128), lambda i: (i, 0, 0, 0)),   # per-image input
            pl.BlockSpec((5, 2, 128, 84), lambda i: (0, 0, 0, 0)),  # conv1 band weights
            pl.BlockSpec((5, 2, 84, 80), lambda i: (0, 0, 0, 0)),   # conv2 band weights
            pl.BlockSpec((1, 84), lambda i: (0, 0)),                # conv1 bias (tiled)
            pl.BlockSpec((1, 80), lambda i: (0, 0)),                # conv2 bias (tiled)
            pl.BlockSpec((5, 80, 120), lambda i: (0, 0, 0)),        # fc1 (permuted)
            pl.BlockSpec((1, 120), lambda i: (0, 0)),
            pl.BlockSpec((120, 84), lambda i: (0, 0)),              # fc2.T
            pl.BlockSpec((1, 84), lambda i: (0, 0)),
            pl.BlockSpec((84, num_classes), lambda i: (0, 0)),      # fc3.T
            pl.BlockSpec((1, num_classes), lambda i: (0, 0)),
        ],
        out_specs=pl.BlockSpec((1, 1, num_classes), lambda i: (i, 0, 0)),
        compiler_params=pltpu.CompilerParams(
            dimension_semantics=("parallel",)),   # batch axis -> both TCs on v7x
    )(xr, kp["a1"], kp["a2"], kp["bc1"], kp["bc2"],
      kp["w1s"], kp["b1"], kp["w2t"], kp["b2"], kp["w3t"], kp["b3"])
    return out[:, 0, :]      # (N, num_classes) log-probabilities


# ----------------------------------------------------------------------------
# Parameter init (PyTorch-shaped) and a pure-JAX reference for self-checking
# ----------------------------------------------------------------------------
def init_params(key, num_classes):
    ks = jax.random.split(key, 10)

    def u(k, shape, fan_in):
        bound = 1.0 / float(fan_in) ** 0.5
        return jax.random.uniform(k, shape, jnp.float32, -bound, bound)

    return {
        "conv1_w": u(ks[0], (6, 3, 5, 5), 3 * 25),
        "conv1_b": u(ks[1], (6,), 3 * 25),
        "conv2_w": u(ks[2], (16, 6, 5, 5), 6 * 25),
        "conv2_b": u(ks[3], (16,), 6 * 25),
        "fc1_w": u(ks[4], (120, 400), 400),
        "fc1_b": u(ks[5], (120,), 400),
        "fc2_w": u(ks[6], (84, 120), 120),
        "fc2_b": u(ks[7], (84,), 120),
        "fc3_w": u(ks[8], (num_classes, 84), 84),
        "fc3_b": u(ks[9], (num_classes,), 84),
    }


def _reference_forward(x_nchw, params):
    """Straightforward JAX transcription of CNNCifar.forward (for verification)."""
    mm = functools.partial(jnp.matmul, precision=jax.lax.Precision.HIGHEST)
    n = x_nchw.shape[0]
    x = jnp.transpose(x_nchw, (0, 2, 3, 1))

    def im2col(xx, kh, kw):
        _, hh, ww, _ = xx.shape
        ho, wo = hh - kh + 1, ww - kw + 1
        cols = [xx[:, i:i + ho, j:j + wo, :] for i in range(kh) for j in range(kw)]
        return jnp.concatenate(cols, axis=-1)

    def pool(y):
        nn, hh, ww, cc = y.shape
        return jnp.max(y.reshape(nn, hh // 2, 2, ww // 2, 2, cc), axis=(2, 4))

    w1 = jnp.transpose(params["conv1_w"], (2, 3, 1, 0)).reshape(75, 6)
    y = pool(jnp.maximum(mm(im2col(x, 5, 5), w1) + params["conv1_b"], 0.0))
    w2 = jnp.transpose(params["conv2_w"], (2, 3, 1, 0)).reshape(150, 16)
    y = pool(jnp.maximum(mm(im2col(y, 5, 5), w2) + params["conv2_b"], 0.0))
    flat = jnp.transpose(y, (0, 3, 1, 2)).reshape(n, 400)
    h = jnp.maximum(mm(flat, params["fc1_w"].T) + params["fc1_b"], 0.0)
    h = jnp.maximum(mm(h, params["fc2_w"].T) + params["fc2_b"], 0.0)
    logits = mm(h, params["fc3_w"].T) + params["fc3_b"]
    return jax.nn.log_softmax(logits, axis=-1)


if __name__ == "__main__":
    NUM_CLASSES = 10
    key = jax.random.PRNGKey(0)
    k_x, k_p = jax.random.split(key)

    # CIFAR-shaped input (32x32 spatial is required by the 16*5*5 flatten).
    x = jax.random.normal(k_x, (2, 3, 32, 32), jnp.float32)
    params = init_params(k_p, NUM_CLASSES)
    kparams = prepare_params(params)          # one-time weight preparation

    fwd = jax.jit(cnn_cifar_forward)
    out = jax.block_until_ready(fwd(x, kparams))

    assert out.shape == (2, NUM_CLASSES)
    # log_softmax rows must exponentiate-sum to ~1
    row_sums = jnp.exp(out).sum(axis=1)
    assert bool(jnp.all(jnp.abs(row_sums - 1.0) < 1e-4))
    # and match the plain-JAX transcription of the PyTorch module
    ref = _reference_forward(x, params)
    assert bool(jnp.max(jnp.abs(out - ref)) < 1e-2)
    print("KERNEL_OK")
</pallas_src>

<mosaic_0001>
module attributes {stable_mosaic.version = 11 : i64} {
  func.func @_cnn_kernel(%arg0: i32, %arg1: memref<1x4x8x128xf32, #tpu.memory_space<vmem>>, %arg2: memref<5x2x128x84xf32, #tpu.memory_space<vmem>>, %arg3: memref<5x2x84x80xf32, #tpu.memory_space<vmem>>, %arg4: memref<1x84xf32, #tpu.memory_space<vmem>>, %arg5: memref<1x80xf32, #tpu.memory_space<vmem>>, %arg6: memref<5x80x120xf32, #tpu.memory_space<vmem>>, %arg7: memref<1x120xf32, #tpu.memory_space<vmem>>, %arg8: memref<120x84xf32, #tpu.memory_space<vmem>>, %arg9: memref<1x84xf32, #tpu.memory_space<vmem>>, %arg10: memref<84x10xf32, #tpu.memory_space<vmem>>, %arg11: memref<1x10xf32, #tpu.memory_space<vmem>>, %arg12: memref<1x1x10xf32, #tpu.memory_space<vmem>>) attributes {dimension_semantics = [#tpu.dimension_semantics<parallel>], iteration_bounds = array<i64: 2>, scalar_prefetch = 0 : i64, scratch_operands = 0 : i64, tpu.core_type = #tpu.core_type<tc>, window_params = [{transform_indices = @transform_0, window_bounds = array<i64: 1, 4, 8, 128>}, {pipeline_mode = #tpu.pipeline_mode<synchronous>, transform_indices = @transform_1, window_bounds = array<i64: 5, 2, 128, 84>}, {pipeline_mode = #tpu.pipeline_mode<synchronous>, transform_indices = @transform_2, window_bounds = array<i64: 5, 2, 84, 80>}, {pipeline_mode = #tpu.pipeline_mode<synchronous>, transform_indices = @transform_3, window_bounds = array<i64: 1, 84>}, {pipeline_mode = #tpu.pipeline_mode<synchronous>, transform_indices = @transform_4, window_bounds = array<i64: 1, 80>}, {pipeline_mode = #tpu.pipeline_mode<synchronous>, transform_indices = @transform_5, window_bounds = array<i64: 5, 80, 120>}, {pipeline_mode = #tpu.pipeline_mode<synchronous>, transform_indices = @transform_6, window_bounds = array<i64: 1, 120>}, {pipeline_mode = #tpu.pipeline_mode<synchronous>, transform_indices = @transform_7, window_bounds = array<i64: 120, 84>}, {pipeline_mode = #tpu.pipeline_mode<synchronous>, transform_indices = @transform_8, window_bounds = array<i64: 1, 84>}, {pipeline_mode = #tpu.pipeline_mode<synchronous>, transform_indices = @transform_9, window_bounds = array<i64: 84, 10>}, {pipeline_mode = #tpu.pipeline_mode<synchronous>, transform_indices = @transform_10, window_bounds = array<i64: 1, 10>}, {transform_indices = @transform_11, window_bounds = array<i64: 1, 1, 10>}]} {
    %c0 = arith.constant 0 : index
    %c0_0 = arith.constant 0 : index
    %c0_1 = arith.constant 0 : index
    %c0_2 = arith.constant 0 : index
    %0 = vector.load %arg1[%c0, %c0_0, %c0_1, %c0_2] : memref<1x4x8x128xf32, #tpu.memory_space<vmem>>, vector<1x1x7x128xf32>
    %1 = vector.shape_cast %0 : vector<1x1x7x128xf32> to vector<7x128xf32>
    %c0_3 = arith.constant 0 : index
    %c0_4 = arith.constant 0 : index
    %c0_5 = arith.constant 0 : index
    %c0_6 = arith.constant 0 : index
    %2 = vector.load %arg2[%c0_3, %c0_4, %c0_5, %c0_6] : memref<5x2x128x84xf32, #tpu.memory_space<vmem>>, vector<1x1x128x84xf32>
    %3 = vector.shape_cast %2 : vector<1x1x128x84xf32> to vector<128x84xf32>
    %cst = arith.constant dense<0.000000e+00> : vector<7x84xf32>
    %4 = tpu.matmul %1, %3, %cst {dimension_numbers = #tpu.dot_dimension_numbers<[1], [0], [0], [1], [0, 0, 1, 1], [], []>} : vector<7x128xf32>, vector<128x84xf32>, vector<7x84xf32> -> vector<7x84xf32>
    %c0_7 = arith.constant 0 : index
    %c1 = arith.constant 1 : index
    %c0_8 = arith.constant 0 : index
    %c0_9 = arith.constant 0 : index
    %5 = vector.load %arg2[%c0_7, %c1, %c0_8, %c0_9] : memref<5x2x128x84xf32, #tpu.memory_space<vmem>>, vector<1x1x128x84xf32>
    %6 = vector.shape_cast %5 : vector<1x1x128x84xf32> to vector<128x84xf32>
    %cst_10 = arith.constant dense<0.000000e+00> : vector<7x84xf32>
    %7 = tpu.matmul %1, %6, %cst_10 {dimension_numbers = #tpu.dot_dimension_numbers<[1], [0], [0], [1], [0, 0, 1, 1], [], []>} : vector<7x128xf32>, vector<128x84xf32>, vector<7x84xf32> -> vector<7x84xf32>
    %c0_11 = arith.constant 0 : index
    %c1_12 = arith.constant 1 : index
    %c0_13 = arith.constant 0 : index
    %c0_14 = arith.constant 0 : index
    %8 = vector.load %arg1[%c0_11, %c1_12, %c0_13, %c0_14] : memref<1x4x8x128xf32, #tpu.memory_space<vmem>>, vector<1x1x7x128xf32>
    %9 = vector.shape_cast %8 : vector<1x1x7x128xf32> to vector<7x128xf32>
    %c1_15 = arith.constant 1 : index
    %c0_16 = arith.constant 0 : index
    %c0_17 = arith.constant 0 : index
    %c0_18 = arith.constant 0 : index
    %10 = vector.load %arg2[%c1_15, %c0_16, %c0_17, %c0_18] : memref<5x2x128x84xf32, #tpu.memory_space<vmem>>, vector<1x1x128x84xf32>
    %11 = vector.shape_cast %10 : vector<1x1x128x84xf32> to vector<128x84xf32>
    %cst_19 = arith.constant dense<0.000000e+00> : vector<7x84xf32>
    %12 = tpu.matmul %9, %11, %cst_19 {dimension_numbers = #tpu.dot_dimension_numbers<[1], [0], [0], [1], [0, 0, 1, 1], [], []>} : vector<7x128xf32>, vector<128x84xf32>, vector<7x84xf32> -> vector<7x84xf32>
    %c1_20 = arith.constant 1 : index
    %c1_21 = arith.constant 1 : index
    %c0_22 = arith.constant 0 : index
    %c0_23 = arith.constant 0 : index
    %13 = vector.load %arg2[%c1_20, %c1_21, %c0_22, %c0_23] : memref<5x2x128x84xf32, #tpu.memory_space<vmem>>, vector<1x1x128x84xf32>
    %14 = vector.shape_cast %13 : vector<1x1x128x84xf32> to vector<128x84xf32>
    %cst_24 = arith.constant dense<0.000000e+00> : vector<7x84xf32>
    %15 = tpu.matmul %9, %14, %cst_24 {dimension_numbers = #tpu.dot_dimension_numbers<[1], [0], [0], [1], [0, 0, 1, 1], [], []>} : vector<7x128xf32>, vector<128x84xf32>, vector<7x84xf32> -> vector<7x84xf32>
    %16 = arith.addf %4, %12 : vector<7x84xf32>
    %17 = arith.addf %7, %15 : vector<7x84xf32>
    %c0_25 = arith.constant 0 : index
    %c2 = arith.constant 2 : index
    %c0_26 = arith.constant 0 : index
    %c0_27 = arith.constant 0 : index
    %18 = vector.load %arg1[%c0_25, %c2, %c0_26, %c0_27] : memref<1x4x8x128xf32, #tpu.memory_space<vmem>>, vector<1x1x7x128xf32>
    %19 = vector.shape_cast %18 : vector<1x1x7x128xf32> to vector<7x128xf32>
    %c2_28 = arith.constant 2 : index
    %c0_29 = arith.constant 0 : index
    %c0_30 = arith.constant 0 : index
    %c0_31 = arith.constant 0 : index
    %20 = vector.load %arg2[%c2_28, %c0_29, %c0_30, %c0_31] : memref<5x2x128x84xf32, #tpu.memory_space<vmem>>, vector<1x1x128x84xf32>
    %21 = vector.shape_cast %20 : vector<1x1x128x84xf32> to vector<128x84xf32>
    %cst_32 = arith.constant dense<0.000000e+00> : vector<7x84xf32>
    %22 = tpu.matmul %19, %21, %cst_32 {dimension_numbers = #tpu.dot_dimension_numbers<[1], [0], [0], [1], [0, 0, 1, 1], [], []>} : vector<7x128xf32>, vector<128x84xf32>, vector<7x84xf32> -> vector<7x84xf32>
    %c2_33 = arith.constant 2 : index
    %c1_34 = arith.constant 1 : index
    %c0_35 = arith.constant 0 : index
    %c0_36 = arith.constant 0 : index
    %23 = vector.load %arg2[%c2_33, %c1_34, %c0_35, %c0_36] : memref<5x2x128x84xf32, #tpu.memory_space<vmem>>, vector<1x1x128x84xf32>
    %24 = vector.shape_cast %23 : vector<1x1x128x84xf32> to vector<128x84xf32>
    %cst_37 = arith.constant dense<0.000000e+00> : vector<7x84xf32>
    %25 = tpu.matmul %19, %24, %cst_37 {dimension_numbers = #tpu.dot_dimension_numbers<[1], [0], [0], [1], [0, 0, 1, 1], [], []>} : vector<7x128xf32>, vector<128x84xf32>, vector<7x84xf32> -> vector<7x84xf32>
    %26 = arith.addf %16, %22 : vector<7x84xf32>
    %27 = arith.addf %17, %25 : vector<7x84xf32>
    %c0_38 = arith.constant 0 : index
    %c3 = arith.constant 3 : index
    %c0_39 = arith.constant 0 : index
    %c0_40 = arith.constant 0 : index
    %28 = vector.load %arg1[%c0_38, %c3, %c0_39, %c0_40] : memref<1x4x8x128xf32, #tpu.memory_space<vmem>>, vector<1x1x7x128xf32>
    %29 = vector.shape_cast %28 : vector<1x1x7x128xf32> to vector<7x128xf32>
    %c3_41 = arith.constant 3 : index
    %c0_42 = arith.constant 0 : index
    %c0_43 = arith.constant 0 : index
    %c0_44 = arith.constant 0 : index
    %30 = vector.load %arg2[%c3_41, %c0_42, %c0_43, %c0_44] : memref<5x2x128x84xf32, #tpu.memory_space<vmem>>, vector<1x1x128x84xf32>
    %31 = vector.shape_cast %30 : vector<1x1x128x84xf32> to vector<128x84xf32>
    %cst_45 = arith.constant dense<0.000000e+00> : vector<7x84xf32>
    %32 = tpu.matmul %29, %31, %cst_45 {dimension_numbers = #tpu.dot_dimension_numbers<[1], [0], [0], [1], [0, 0, 1, 1], [], []>} : vector<7x128xf32>, vector<128x84xf32>, vector<7x84xf32> -> vector<7x84xf32>
    %c3_46 = arith.constant 3 : index
    %c1_47 = arith.constant 1 : index
    %c0_48 = arith.constant 0 : index
    %c0_49 = arith.constant 0 : index
    %33 = vector.load %arg2[%c3_46, %c1_47, %c0_48, %c0_49] : memref<5x2x128x84xf32, #tpu.memory_space<vmem>>, vector<1x1x128x84xf32>
    %34 = vector.shape_cast %33 : vector<1x1x128x84xf32> to vector<128x84xf32>
    %cst_50 = arith.constant dense<0.000000e+00> : vector<7x84xf32>
    %35 = tpu.matmul %29, %34, %cst_50 {dimension_numbers = #tpu.dot_dimension_numbers<[1], [0], [0], [1], [0, 0, 1, 1], [], []>} : vector<7x128xf32>, vector<128x84xf32>, vector<7x84xf32> -> vector<7x84xf32>
    %36 = arith.addf %26, %32 : vector<7x84xf32>
    %37 = arith.addf %27, %35 : vector<7x84xf32>
    %c0_51 = arith.constant 0 : index
    %c0_52 = arith.constant 0 : index
    %c1_53 = arith.constant 1 : index
    %c0_54 = arith.constant 0 : index
    %38 = vector.load %arg1[%c0_51, %c0_52, %c1_53, %c0_54] : memref<1x4x8x128xf32, #tpu.memory_space<vmem>>, vector<1x1x7x128xf32>
    %39 = vector.shape_cast %38 : vector<1x1x7x128xf32> to vector<7x128xf32>
    %c4 = arith.constant 4 : index
    %c0_55 = arith.constant 0 : index
    %c0_56 = arith.constant 0 : index
    %c0_57 = arith.constant 0 : index
    %40 = vector.load %arg2[%c4, %c0_55, %c0_56, %c0_57] : memref<5x2x128x84xf32, #tpu.memory_space<vmem>>, vector<1x1x128x84xf32>
    %41 = vector.shape_cast %40 : vector<1x1x128x84xf32> to vector<128x84xf32>
    %cst_58 = arith.constant dense<0.000000e+00> : vector<7x84xf32>
    %42 = tpu.matmul %39, %41, %cst_58 {dimension_numbers = #tpu.dot_dimension_numbers<[1], [0], [0], [1], [0, 0, 1, 1], [], []>} : vector<7x128xf32>, vector<128x84xf32>, vector<7x84xf32> -> vector<7x84xf32>
    %c4_59 = arith.constant 4 : index
    %c1_60 = arith.constant 1 : index
    %c0_61 = arith.constant 0 : index
    %c0_62 = arith.constant 0 : index
    %43 = vector.load %arg2[%c4_59, %c1_60, %c0_61, %c0_62] : memref<5x2x128x84xf32, #tpu.memory_space<vmem>>, vector<1x1x128x84xf32>
    %44 = vector.shape_cast %43 : vector<1x1x128x84xf32> to vector<128x84xf32>
    %cst_63 = arith.constant dense<0.000000e+00> : vector<7x84xf32>
    %45 = tpu.matmul %39, %44, %cst_63 {dimension_numbers = #tpu.dot_dimension_numbers<[1], [0], [0], [1], [0, 0, 1, 1], [], []>} : vector<7x128xf32>, vector<128x84xf32>, vector<7x84xf32> -> vector<7x84xf32>
    %46 = arith.addf %36, %42 : vector<7x84xf32>
    %47 = arith.addf %37, %45 : vector<7x84xf32>
    %48 = arith.maximumf %46, %47 : vector<7x84xf32>
    %c0_64 = arith.constant 0 : index
    %c0_65 = arith.constant 0 : index
    %49 = vector.load %arg4[%c0_64, %c0_65] : memref<1x84xf32, #tpu.memory_space<vmem>>, vector<1x84xf32>
    %50 = vector.broadcast %49 : vector<1x84xf32> to vector<7x84xf32>
    %51 = arith.addf %48, %50 : vector<7x84xf32>
    %c0_66 = arith.constant 0 : index
    %c1_67 = arith.constant 1 : index
    %c0_68 = arith.constant 0 : index
    %c0_69 = arith.constant 0 : index
    %52 = vector.load %arg1[%c0_66, %c1_67, %c0_68, %c0_69] : memref<1x4x8x128xf32, #tpu.memory_space<vmem>>, vector<1x1x7x128xf32>
    %53 = vector.shape_cast %52 : vector<1x1x7x128xf32> to vector<7x128xf32>
    %c0_70 = arith.constant 0 : index
    %c0_71 = arith.constant 0 : index
    %c0_72 = arith.constant 0 : index
    %c0_73 = arith.constant 0 : index
    %54 = vector.load %arg2[%c0_70, %c0_71, %c0_72, %c0_73] : memref<5x2x128x84xf32, #tpu.memory_space<vmem>>, vector<1x1x128x84xf32>
    %55 = vector.shape_cast %54 : vector<1x1x128x84xf32> to vector<128x84xf32>
    %cst_74 = arith.constant dense<0.000000e+00> : vector<7x84xf32>
    %56 = tpu.matmul %53, %55, %cst_74 {dimension_numbers = #tpu.dot_dimension_numbers<[1], [0], [0], [1], [0, 0, 1, 1], [], []>} : vector<7x128xf32>, vector<128x84xf32>, vector<7x84xf32> -> vector<7x84xf32>
    %c0_75 = arith.constant 0 : index
    %c1_76 = arith.constant 1 : index
    %c0_77 = arith.constant 0 : index
    %c0_78 = arith.constant 0 : index
    %57 = vector.load %arg2[%c0_75, %c1_76, %c0_77, %c0_78] : memref<5x2x128x84xf32, #tpu.memory_space<vmem>>, vector<1x1x128x84xf32>
    %58 = vector.shape_cast %57 : vector<1x1x128x84xf32> to vector<128x84xf32>
    %cst_79 = arith.constant dense<0.000000e+00> : vector<7x84xf32>
    %59 = tpu.matmul %53, %58, %cst_79 {dimension_numbers = #tpu.dot_dimension_numbers<[1], [0], [0], [1], [0, 0, 1, 1], [], []>} : vector<7x128xf32>, vector<128x84xf32>, vector<7x84xf32> -> vector<7x84xf32>
    %c0_80 = arith.constant 0 : index
    %c2_81 = arith.constant 2 : index
    %c0_82 = arith.constant 0 : index
    %c0_83 = arith.constant 0 : index
    %60 = vector.load %arg1[%c0_80, %c2_81, %c0_82, %c0_83] : memref<1x4x8x128xf32, #tpu.memory_space<vmem>>, vector<1x1x7x128xf32>
    %61 = vector.shape_cast %60 : vector<1x1x7x128xf32> to vector<7x128xf32>
    %c1_84 = arith.constant 1 : index
    %c0_85 = arith.constant 0 : index
    %c0_86 = arith.constant 0 : index
    %c0_87 = arith.constant 0 : index
    %62 = vector.load %arg2[%c1_84, %c0_85, %c0_86, %c0_87] : memref<5x2x128x84xf32, #tpu.memory_space<vmem>>, vector<1x1x128x84xf32>
    %63 = vector.shape_cast %62 : vector<1x1x128x84xf32> to vector<128x84xf32>
    %cst_88 = arith.constant dense<0.000000e+00> : vector<7x84xf32>
    %64 = tpu.matmul %61, %63, %cst_88 {dimension_numbers = #tpu.dot_dimension_numbers<[1], [0], [0], [1], [0, 0, 1, 1], [], []>} : vector<7x128xf32>, vector<128x84xf32>, vector<7x84xf32> -> vector<7x84xf32>
    %c1_89 = arith.constant 1 : index
    %c1_90 = arith.constant 1 : index
    %c0_91 = arith.constant 0 : index
    %c0_92 = arith.constant 0 : index
    %65 = vector.load %arg2[%c1_89, %c1_90, %c0_91, %c0_92] : memref<5x2x128x84xf32, #tpu.memory_space<vmem>>, vector<1x1x128x84xf32>
    %66 = vector.shape_cast %65 : vector<1x1x128x84xf32> to vector<128x84xf32>
    %cst_93 = arith.constant dense<0.000000e+00> : vector<7x84xf32>
    %67 = tpu.matmul %61, %66, %cst_93 {dimension_numbers = #tpu.dot_dimension_numbers<[1], [0], [0], [1], [0, 0, 1, 1], [], []>} : vector<7x128xf32>, vector<128x84xf32>, vector<7x84xf32> -> vector<7x84xf32>
    %68 = arith.addf %56, %64 : vector<7x84xf32>
    %69 = arith.addf %59, %67 : vector<7x84xf32>
    %c0_94 = arith.constant 0 : index
    %c3_95 = arith.constant 3 : index
    %c0_96 = arith.constant 0 : index
    %c0_97 = arith.constant 0 : index
    %70 = vector.load %arg1[%c0_94, %c3_95, %c0_96, %c0_97] : memref<1x4x8x128xf32, #tpu.memory_space<vmem>>, vector<1x1x7x128xf32>
    %71 = vector.shape_cast %70 : vector<1x1x7x128xf32> to vector<7x128xf32>
    %c2_98 = arith.constant 2 : index
    %c0_99 = arith.constant 0 : index
    %c0_100 = arith.constant 0 : index
    %c0_101 = arith.constant 0 : index
    %72 = vector.load %arg2[%c2_98, %c0_99, %c0_100, %c0_101] : memref<5x2x128x84xf32, #tpu.memory_space<vmem>>, vector<1x1x128x84xf32>
    %73 = vector.shape_cast %72 : vector<1x1x128x84xf32> to vector<128x84xf32>
    %cst_102 = arith.constant dense<0.000000e+00> : vector<7x84xf32>
    %74 = tpu.matmul %71, %73, %cst_102 {dimension_numbers = #tpu.dot_dimension_numbers<[1], [0], [0], [1], [0, 0, 1, 1], [], []>} : vector<7x128xf32>, vector<128x84xf32>, vector<7x84xf32> -> vector<7x84xf32>
    %c2_103 = arith.constant 2 : index
    %c1_104 = arith.constant 1 : index
    %c0_105 = arith.constant 0 : index
    %c0_106 = arith.constant 0 : index
    %75 = vector.load %arg2[%c2_103, %c1_104, %c0_105, %c0_106] : memref<5x2x128x84xf32, #tpu.memory_space<vmem>>, vector<1x1x128x84xf32>
    %76 = vector.shape_cast %75 : vector<1x1x128x84xf32> to vector<128x84xf32>
    %cst_107 = arith.constant dense<0.000000e+00> : vector<7x84xf32>
    %77 = tpu.matmul %71, %76, %cst_107 {dimension_numbers = #tpu.dot_dimension_numbers<[1], [0], [0], [1], [0, 0, 1, 1], [], []>} : vector<7x128xf32>, vector<128x84xf32>, vector<7x84xf32> -> vector<7x84xf32>
    %78 = arith.addf %68, %74 : vector<7x84xf32>
    %79 = arith.addf %69, %77 : vector<7x84xf32>
    %c0_108 = arith.constant 0 : index
    %c0_109 = arith.constant 0 : index
    %c1_110 = arith.constant 1 : index
    %c0_111 = arith.constant 0 : index
    %80 = vector.load %arg1[%c0_108, %c0_109, %c1_110, %c0_111] : memref<1x4x8x128xf32, #tpu.memory_space<vmem>>, vector<1x1x7x128xf32>
    %81 = vector.shape_cast %80 : vector<1x1x7x128xf32> to vector<7x128xf32>
    %c3_112 = arith.constant 3 : index
    %c0_113 = arith.constant 0 : index
    %c0_114 = arith.constant 0 : index
    %c0_115 = arith.constant 0 : index
    %82 = vector.load %arg2[%c3_112, %c0_113, %c0_114, %c0_115] : memref<5x2x128x84xf32, #tpu.memory_space<vmem>>, vector<1x1x128x84xf32>
    %83 = vector.shape_cast %82 : vector<1x1x128x84xf32> to vector<128x84xf32>
    %cst_116 = arith.constant dense<0.000000e+00> : vector<7x84xf32>
    %84 = tpu.matmul %81, %83, %cst_116 {dimension_numbers = #tpu.dot_dimension_numbers<[1], [0], [0], [1], [0, 0, 1, 1], [], []>} : vector<7x128xf32>, vector<128x84xf32>, vector<7x84xf32> -> vector<7x84xf32>
    %c3_117 = arith.constant 3 : index
    %c1_118 = arith.constant 1 : index
    %c0_119 = arith.constant 0 : index
    %c0_120 = arith.constant 0 : index
    %85 = vector.load %arg2[%c3_117, %c1_118, %c0_119, %c0_120] : memref<5x2x128x84xf32, #tpu.memory_space<vmem>>, vector<1x1x128x84xf32>
    %86 = vector.shape_cast %85 : vector<1x1x128x84xf32> to vector<128x84xf32>
    %cst_121 = arith.constant dense<0.000000e+00> : vector<7x84xf32>
    %87 = tpu.matmul %81, %86, %cst_121 {dimension_numbers = #tpu.dot_dimension_numbers<[1], [0], [0], [1], [0, 0, 1, 1], [], []>} : vector<7x128xf32>, vector<128x84xf32>, vector<7x84xf32> -> vector<7x84xf32>
    %88 = arith.addf %78, %84 : vector<7x84xf32>
    %89 = arith.addf %79, %87 : vector<7x84xf32>
    %c0_122 = arith.constant 0 : index
    %c1_123 = arith.constant 1 : index
    %c1_124 = arith.constant 1 : index
    %c0_125 = arith.constant 0 : index
    %90 = vector.load %arg1[%c0_122, %c1_123, %c1_124, %c0_125] : memref<1x4x8x128xf32, #tpu.memory_space<vmem>>, vector<1x1x7x128xf32>
    %91 = vector.shape_cast %90 : vector<1x1x7x128xf32> to vector<7x128xf32>
    %c4_126 = arith.constant 4 : index
    %c0_127 = arith.constant 0 : index
    %c0_128 = arith.constant 0 : index
    %c0_129 = arith.constant 0 : index
    %92 = vector.load %arg2[%c4_126, %c0_127, %c0_128, %c0_129] : memref<5x2x128x84xf32, #tpu.memory_space<vmem>>, vector<1x1x128x84xf32>
    %93 = vector.shape_cast %92 : vector<1x1x128x84xf32> to vector<128x84xf32>
    %cst_130 = arith.constant dense<0.000000e+00> : vector<7x84xf32>
    %94 = tpu.matmul %91, %93, %cst_130 {dimension_numbers = #tpu.dot_dimension_numbers<[1], [0], [0], [1], [0, 0, 1, 1], [], []>} : vector<7x128xf32>, vector<128x84xf32>, vector<7x84xf32> -> vector<7x84xf32>
    %c4_131 = arith.constant 4 : index
    %c1_132 = arith.constant 1 : index
    %c0_133 = arith.constant 0 : index
    %c0_134 = arith.constant 0 : index
    %95 = vector.load %arg2[%c4_131, %c1_132, %c0_133, %c0_134] : memref<5x2x128x84xf32, #tpu.memory_space<vmem>>, vector<1x1x128x84xf32>
    %96 = vector.shape_cast %95 : vector<1x1x128x84xf32> to vector<128x84xf32>
    %cst_135 = arith.constant dense<0.000000e+00> : vector<7x84xf32>
    %97 = tpu.matmul %91, %96, %cst_135 {dimension_numbers = #tpu.dot_dimension_numbers<[1], [0], [0], [1], [0, 0, 1, 1], [], []>} : vector<7x128xf32>, vector<128x84xf32>, vector<7x84xf32> -> vector<7x84xf32>
    %98 = arith.addf %88, %94 : vector<7x84xf32>
    %99 = arith.addf %89, %97 : vector<7x84xf32>
    %100 = arith.maximumf %98, %99 : vector<7x84xf32>
    %c0_136 = arith.constant 0 : index
    %c0_137 = arith.constant 0 : index
    %101 = vector.load %arg4[%c0_136, %c0_137] : memref<1x84xf32, #tpu.memory_space<vmem>>, vector<1x84xf32>
    %102 = vector.broadcast %101 : vector<1x84xf32> to vector<7x84xf32>
    %103 = arith.addf %100, %102 : vector<7x84xf32>
    %c0_138 = arith.constant 0 : index
    %c2_139 = arith.constant 2 : index
    %c0_140 = arith.constant 0 : index
    %c0_141 = arith.constant 0 : index
    %104 = vector.load %arg1[%c0_138, %c2_139, %c0_140, %c0_141] : memref<1x4x8x128xf32, #tpu.memory_space<vmem>>, vector<1x1x7x128xf32>
    %105 = vector.shape_cast %104 : vector<1x1x7x128xf32> to vector<7x128xf32>
    %c0_142 = arith.constant 0 : index
    %c0_143 = arith.constant 0 : index
    %c0_144 = arith.constant 0 : index
    %c0_145 = arith.constant 0 : index
    %106 = vector.load %arg2[%c0_142, %c0_143, %c0_144, %c0_145] : memref<5x2x128x84xf32, #tpu.memory_space<vmem>>, vector<1x1x128x84xf32>
    %107 = vector.shape_cast %106 : vector<1x1x128x84xf32> to vector<128x84xf32>
    %cst_146 = arith.constant dense<0.000000e+00> : vector<7x84xf32>
    %108 = tpu.matmul %105, %107, %cst_146 {dimension_numbers = #tpu.dot_dimension_numbers<[1], [0], [0], [1], [0, 0, 1, 1], [], []>} : vector<7x128xf32>, vector<128x84xf32>, vector<7x84xf32> -> vector<7x84xf32>
    %c0_147 = arith.constant 0 : index
    %c1_148 = arith.constant 1 : index
    %c0_149 = arith.constant 0 : index
    %c0_150 = arith.constant 0 : index
    %109 = vector.load %arg2[%c0_147, %c1_148, %c0_149, %c0_150] : memref<5x2x128x84xf32, #tpu.memory_space<vmem>>, vector<1x1x128x84xf32>
    %110 = vector.shape_cast %109 : vector<1x1x128x84xf32> to vector<128x84xf32>
    %cst_151 = arith.constant dense<0.000000e+00> : vector<7x84xf32>
    %111 = tpu.matmul %105, %110, %cst_151 {dimension_numbers = #tpu.dot_dimension_numbers<[1], [0], [0], [1], [0, 0, 1, 1], [], []>} : vector<7x128xf32>, vector<128x84xf32>, vector<7x84xf32> -> vector<7x84xf32>
    %c0_152 = arith.constant 0 : index
    %c3_153 = arith.constant 3 : index
    %c0_154 = arith.constant 0 : index
    %c0_155 = arith.constant 0 : index
    %112 = vector.load %arg1[%c0_152, %c3_153, %c0_154, %c0_155] : memref<1x4x8x128xf32, #tpu.memory_space<vmem>>, vector<1x1x7x128xf32>
    %113 = vector.shape_cast %112 : vector<1x1x7x128xf32> to vector<7x128xf32>
    %c1_156 = arith.constant 1 : index
    %c0_157 = arith.constant 0 : index
    %c0_158 = arith.constant 0 : index
    %c0_159 = arith.constant 0 : index
    %114 = vector.load %arg2[%c1_156, %c0_157, %c0_158, %c0_159] : memref<5x2x128x84xf32, #tpu.memory_space<vmem>>, vector<1x1x128x84xf32>
    %115 = vector.shape_cast %114 : vector<1x1x128x84xf32> to vector<128x84xf32>
    %cst_160 = arith.constant dense<0.000000e+00> : vector<7x84xf32>
    %116 = tpu.matmul %113, %115, %cst_160 {dimension_numbers = #tpu.dot_dimension_numbers<[1], [0], [0], [1], [0, 0, 1, 1], [], []>} : vector<7x128xf32>, vector<128x84xf32>, vector<7x84xf32> -> vector<7x84xf32>
    %c1_161 = arith.constant 1 : index
    %c1_162 = arith.constant 1 : index
    %c0_163 = arith.constant 0 : index
    %c0_164 = arith.constant 0 : index
    %117 = vector.load %arg2[%c1_161, %c1_162, %c0_163, %c0_164] : memref<5x2x128x84xf32, #tpu.memory_space<vmem>>, vector<1x1x128x84xf32>
    %118 = vector.shape_cast %117 : vector<1x1x128x84xf32> to vector<128x84xf32>
    %cst_165 = arith.constant dense<0.000000e+00> : vector<7x84xf32>
    %119 = tpu.matmul %113, %118, %cst_165 {dimension_numbers = #tpu.dot_dimension_numbers<[1], [0], [0], [1], [0, 0, 1, 1], [], []>} : vector<7x128xf32>, vector<128x84xf32>, vector<7x84xf32> -> vector<7x84xf32>
    %120 = arith.addf %108, %116 : vector<7x84xf32>
    %121 = arith.addf %111, %119 : vector<7x84xf32>
    %c0_166 = arith.constant 0 : index
    %c0_167 = arith.constant 0 : index
    %c1_168 = arith.constant 1 : index
    %c0_169 = arith.constant 0 : index
    %122 = vector.load %arg1[%c0_166, %c0_167, %c1_168, %c0_169] : memref<1x4x8x128xf32, #tpu.memory_space<vmem>>, vector<1x1x7x128xf32>
    %123 = vector.shape_cast %122 : vector<1x1x7x128xf32> to vector<7x128xf32>
    %c2_170 = arith.constant 2 : index
    %c0_171 = arith.constant 0 : index
    %c0_172 = arith.constant 0 : index
    %c0_173 = arith.constant 0 : index
    %124 = vector.load %arg2[%c2_170, %c0_171, %c0_172, %c0_173] : memref<5x2x128x84xf32, #tpu.memory_space<vmem>>, vector<1x1x128x84xf32>
    %125 = vector.shape_cast %124 : vector<1x1x128x84xf32> to vector<128x84xf32>
    %cst_174 = arith.constant dense<0.000000e+00> : vector<7x84xf32>
    %126 = tpu.matmul %123, %125, %cst_174 {dimension_numbers = #tpu.dot_dimension_numbers<[1], [0], [0], [1], [0, 0, 1, 1], [], []>} : vector<7x128xf32>, vector<128x84xf32>, vector<7x84xf32> -> vector<7x84xf32>
    %c2_175 = arith.constant 2 : index
    %c1_176 = arith.constant 1 : index
    %c0_177 = arith.constant 0 : index
    %c0_178 = arith.constant 0 : index
    %127 = vector.load %arg2[%c2_175, %c1_176, %c0_177, %c0_178] : memref<5x2x128x84xf32, #tpu.memory_space<vmem>>, vector<1x1x128x84xf32>
    %128 = vector.shape_cast %127 : vector<1x1x128x84xf32> to vector<128x84xf32>
    %cst_179 = arith.constant dense<0.000000e+00> : vector<7x84xf32>
    %129 = tpu.matmul %123, %128, %cst_179 {dimension_numbers = #tpu.dot_dimension_numbers<[1], [0], [0], [1], [0, 0, 1, 1], [], []>} : vector<7x128xf32>, vector<128x84xf32>, vector<7x84xf32> -> vector<7x84xf32>
    %130 = arith.addf %120, %126 : vector<7x84xf32>
    %131 = arith.addf %121, %129 : vector<7x84xf32>
    %c0_180 = arith.constant 0 : index
    %c1_181 = arith.constant 1 : index
    %c1_182 = arith.constant 1 : index
    %c0_183 = arith.constant 0 : index
    %132 = vector.load %arg1[%c0_180, %c1_181, %c1_182, %c0_183] : memref<1x4x8x128xf32, #tpu.memory_space<vmem>>, vector<1x1x7x128xf32>
    %133 = vector.shape_cast %132 : vector<1x1x7x128xf32> to vector<7x128xf32>
    %c3_184 = arith.constant 3 : index
    %c0_185 = arith.constant 0 : index
    %c0_186 = arith.constant 0 : index
    %c0_187 = arith.constant 0 : index
    %134 = vector.load %arg2[%c3_184, %c0_185, %c0_186, %c0_187] : memref<5x2x128x84xf32, #tpu.memory_space<vmem>>, vector<1x1x128x84xf32>
    %135 = vector.shape_cast %134 : vector<1x1x128x84xf32> to vector<128x84xf32>
    %cst_188 = arith.constant dense<0.000000e+00> : vector<7x84xf32>
    %136 = tpu.matmul %133, %135, %cst_188 {dimension_numbers = #tpu.dot_dimension_numbers<[1], [0], [0], [1], [0, 0, 1, 1], [], []>} : vector<7x128xf32>, vector<128x84xf32>, vector<7x84xf32> -> vector<7x84xf32>
    %c3_189 = arith.constant 3 : index
    %c1_190 = arith.constant 1 : index
    %c0_191 = arith.constant 0 : index
    %c0_192 = arith.constant 0 : index
    %137 = vector.load %arg2[%c3_189, %c1_190, %c0_191, %c0_192] : memref<5x2x128x84xf32, #tpu.memory_space<vmem>>, vector<1x1x128x84xf32>
    %138 = vector.shape_cast %137 : vector<1x1x128x84xf32> to vector<128x84xf32>
    %cst_193 = arith.constant dense<0.000000e+00> : vector<7x84xf32>
    %139 = tpu.matmul %133, %138, %cst_193 {dimension_numbers = #tpu.dot_dimension_numbers<[1], [0], [0], [1], [0, 0, 1, 1], [], []>} : vector<7x128xf32>, vector<128x84xf32>, vector<7x84xf32> -> vector<7x84xf32>
    %140 = arith.addf %130, %136 : vector<7x84xf32>
    %141 = arith.addf %131, %139 : vector<7x84xf32>
    %c0_194 = arith.constant 0 : index
    %c2_195 = arith.constant 2 : index
    %c1_196 = arith.constant 1 : index
    %c0_197 = arith.constant 0 : index
    %142 = vector.load %arg1[%c0_194, %c2_195, %c1_196, %c0_197] : memref<1x4x8x128xf32, #tpu.memory_space<vmem>>, vector<1x1x7x128xf32>
    %143 = vector.shape_cast %142 : vector<1x1x7x128xf32> to vector<7x128xf32>
    %c4_198 = arith.constant 4 : index
    %c0_199 = arith.constant 0 : index
    %c0_200 = arith.constant 0 : index
    %c0_201 = arith.constant 0 : index
    %144 = vector.load %arg2[%c4_198, %c0_199, %c0_200, %c0_201] : memref<5x2x128x84xf32, #tpu.memory_space<vmem>>, vector<1x1x128x84xf32>
    %145 = vector.shape_cast %144 : vector<1x1x128x84xf32> to vector<128x84xf32>
    %cst_202 = arith.constant dense<0.000000e+00> : vector<7x84xf32>
    %146 = tpu.matmul %143, %145, %cst_202 {dimension_numbers = #tpu.dot_dimension_numbers<[1], [0], [0], [1], [0, 0, 1, 1], [], []>} : vector<7x128xf32>, vector<128x84xf32>, vector<7x84xf32> -> vector<7x84xf32>
    %c4_203 = arith.constant 4 : index
    %c1_204 = arith.constant 1 : index
    %c0_205 = arith.constant 0 : index
    %c0_206 = arith.constant 0 : index
    %147 = vector.load %arg2[%c4_203, %c1_204, %c0_205, %c0_206] : memref<5x2x128x84xf32, #tpu.memory_space<vmem>>, vector<1x1x128x84xf32>
    %148 = vector.shape_cast %147 : vector<1x1x128x84xf32> to vector<128x84xf32>
    %cst_207 = arith.constant dense<0.000000e+00> : vector<7x84xf32>
    %149 = tpu.matmul %143, %148, %cst_207 {dimension_numbers = #tpu.dot_dimension_numbers<[1], [0], [0], [1], [0, 0, 1, 1], [], []>} : vector<7x128xf32>, vector<128x84xf32>, vector<7x84xf32> -> vector<7x84xf32>
    %150 = arith.addf %140, %146 : vector<7x84xf32>
    %151 = arith.addf %141, %149 : vector<7x84xf32>
    %152 = arith.maximumf %150, %151 : vector<7x84xf32>
    %c0_208 = arith.constant 0 : index
    %c0_209 = arith.constant 0 : index
    %153 = vector.load %arg4[%c0_208, %c0_209] : memref<1x84xf32, #tpu.memory_space<vmem>>, vector<1x84xf32>
    %154 = vector.broadcast %153 : vector<1x84xf32> to vector<7x84xf32>
    %155 = arith.addf %152, %154 : vector<7x84xf32>
    %c0_210 = arith.constant 0 : index
    %c3_211 = arith.constant 3 : index
    %c0_212 = arith.constant 0 : index
    %c0_213 = arith.constant 0 : index
    %156 = vector.load %arg1[%c0_210, %c3_211, %c0_212, %c0_213] : memref<1x4x8x128xf32, #tpu.memory_space<vmem>>, vector<1x1x7x128xf32>
    %157 = vector.shape_cast %156 : vector<1x1x7x128xf32> to vector<7x128xf32>
    %c0_214 = arith.constant 0 : index
    %c0_215 = arith.constant 0 : index
    %c0_216 = arith.constant 0 : index
    %c0_217 = arith.constant 0 : index
    %158 = vector.load %arg2[%c0_214, %c0_215, %c0_216, %c0_217] : memref<5x2x128x84xf32, #tpu.memory_space<vmem>>, vector<1x1x128x84xf32>
    %159 = vector.shape_cast %158 : vector<1x1x128x84xf32> to vector<128x84xf32>
    %cst_218 = arith.constant dense<0.000000e+00> : vector<7x84xf32>
    %160 = tpu.matmul %157, %159, %cst_218 {dimension_numbers = #tpu.dot_dimension_numbers<[1], [0], [0], [1], [0, 0, 1, 1], [], []>} : vector<7x128xf32>, vector<128x84xf32>, vector<7x84xf32> -> vector<7x84xf32>
    %c0_219 = arith.constant 0 : index
    %c1_220 = arith.constant 1 : index
    %c0_221 = arith.constant 0 : index
    %c0_222 = arith.constant 0 : index
    %161 = vector.load %arg2[%c0_219, %c1_220, %c0_221, %c0_222] : memref<5x2x128x84xf32, #tpu.memory_space<vmem>>, vector<1x1x128x84xf32>
    %162 = vector.shape_cast %161 : vector<1x1x128x84xf32> to vector<128x84xf32>
    %cst_223 = arith.constant dense<0.000000e+00> : vector<7x84xf32>
    %163 = tpu.matmul %157, %162, %cst_223 {dimension_numbers = #tpu.dot_dimension_numbers<[1], [0], [0], [1], [0, 0, 1, 1], [], []>} : vector<7x128xf32>, vector<128x84xf32>, vector<7x84xf32> -> vector<7x84xf32>
    %c0_224 = arith.constant 0 : index
    %c0_225 = arith.constant 0 : index
    %c1_226 = arith.constant 1 : index
    %c0_227 = arith.constant 0 : index
    %164 = vector.load %arg1[%c0_224, %c0_225, %c1_226, %c0_227] : memref<1x4x8x128xf32, #tpu.memory_space<vmem>>, vector<1x1x7x128xf32>
    %165 = vector.shape_cast %164 : vector<1x1x7x128xf32> to vector<7x128xf32>
    %c1_228 = arith.constant 1 : index
    %c0_229 = arith.constant 0 : index
    %c0_230 = arith.constant 0 : index
    %c0_231 = arith.constant 0 : index
    %166 = vector.load %arg2[%c1_228, %c0_229, %c0_230, %c0_231] : memref<5x2x128x84xf32, #tpu.memory_space<vmem>>, vector<1x1x128x84xf32>
    %167 = vector.shape_cast %166 : vector<1x1x128x84xf32> to vector<128x84xf32>
    %cst_232 = arith.constant dense<0.000000e+00> : vector<7x84xf32>
    %168 = tpu.matmul %165, %167, %cst_232 {dimension_numbers = #tpu.dot_dimension_numbers<[1], [0], [0], [1], [0, 0, 1, 1], [], []>} : vector<7x128xf32>, vector<128x84xf32>, vector<7x84xf32> -> vector<7x84xf32>
    %c1_233 = arith.constant 1 : index
    %c1_234 = arith.constant 1 : index
    %c0_235 = arith.constant 0 : index
    %c0_236 = arith.constant 0 : index
    %169 = vector.load %arg2[%c1_233, %c1_234, %c0_235, %c0_236] : memref<5x2x128x84xf32, #tpu.memory_space<vmem>>, vector<1x1x128x84xf32>
    %170 = vector.shape_cast %169 : vector<1x1x128x84xf32> to vector<128x84xf32>
    %cst_237 = arith.constant dense<0.000000e+00> : vector<7x84xf32>
    %171 = tpu.matmul %165, %170, %cst_237 {dimension_numbers = #tpu.dot_dimension_numbers<[1], [0], [0], [1], [0, 0, 1, 1], [], []>} : vector<7x128xf32>, vector<128x84xf32>, vector<7x84xf32> -> vector<7x84xf32>
    %172 = arith.addf %160, %168 : vector<7x84xf32>
    %173 = arith.addf %163, %171 : vector<7x84xf32>
    %c0_238 = arith.constant 0 : index
    %c1_239 = arith.constant 1 : index
    %c1_240 = arith.constant 1 : index
    %c0_241 = arith.constant 0 : index
    %174 = vector.load %arg1[%c0_238, %c1_239, %c1_240, %c0_241] : memref<1x4x8x128xf32, #tpu.memory_space<vmem>>, vector<1x1x7x128xf32>
    %175 = vector.shape_cast %174 : vector<1x1x7x128xf32> to vector<7x128xf32>
    %c2_242 = arith.constant 2 : index
    %c0_243 = arith.constant 0 : index
    %c0_244 = arith.constant 0 : index
    %c0_245 = arith.constant 0 : index
    %176 = vector.load %arg2[%c2_242, %c0_243, %c0_244, %c0_245] : memref<5x2x128x84xf32, #tpu.memory_space<vmem>>, vector<1x1x128x84xf32>
    %177 = vector.shape_cast %176 : vector<1x1x128x84xf32> to vector<128x84xf32>
    %cst_246 = arith.constant dense<0.000000e+00> : vector<7x84xf32>
    %178 = tpu.matmul %175, %177, %cst_246 {dimension_numbers = #tpu.dot_dimension_numbers<[1], [0], [0], [1], [0, 0, 1, 1], [], []>} : vector<7x128xf32>, vector<128x84xf32>, vector<7x84xf32> -> vector<7x84xf32>
    %c2_247 = arith.constant 2 : index
    %c1_248 = arith.constant 1 : index
    %c0_249 = arith.constant 0 : index
    %c0_250 = arith.constant 0 : index
    %179 = vector.load %arg2[%c2_247, %c1_248, %c0_249, %c0_250] : memref<5x2x128x84xf32, #tpu.memory_space<vmem>>, vector<1x1x128x84xf32>
    %180 = vector.shape_cast %179 : vector<1x1x128x84xf32> to vector<128x84xf32>
    %cst_251 = arith.constant dense<0.000000e+00> : vector<7x84xf32>
    %181 = tpu.matmul %175, %180, %cst_251 {dimension_numbers = #tpu.dot_dimension_numbers<[1], [0], [0], [1], [0, 0, 1, 1], [], []>} : vector<7x128xf32>, vector<128x84xf32>, vector<7x84xf32> -> vector<7x84xf32>
    %182 = arith.addf %172, %178 : vector<7x84xf32>
    %183 = arith.addf %173, %181 : vector<7x84xf32>
    %c0_252 = arith.constant 0 : index
    %c2_253 = arith.constant 2 : index
    %c1_254 = arith.constant 1 : index
    %c0_255 = arith.constant 0 : index
    %184 = vector.load %arg1[%c0_252, %c2_253, %c1_254, %c0_255] : memref<1x4x8x128xf32, #tpu.memory_space<vmem>>, vector<1x1x7x128xf32>
    %185 = vector.shape_cast %184 : vector<1x1x7x128xf32> to vector<7x128xf32>
    %c3_256 = arith.constant 3 : index
    %c0_257 = arith.constant 0 : index
    %c0_258 = arith.constant 0 : index
    %c0_259 = arith.constant 0 : index
    %186 = vector.load %arg2[%c3_256, %c0_257, %c0_258, %c0_259] : memref<5x2x128x84xf32, #tpu.memory_space<vmem>>, vector<1x1x128x84xf32>
    %187 = vector.shape_cast %186 : vector<1x1x128x84xf32> to vector<128x84xf32>
    %cst_260 = arith.constant dense<0.000000e+00> : vector<7x84xf32>
    %188 = tpu.matmul %185, %187, %cst_260 {dimension_numbers = #tpu.dot_dimension_numbers<[1], [0], [0], [1], [0, 0, 1, 1], [], []>} : vector<7x128xf32>, vector<128x84xf32>, vector<7x84xf32> -> vector<7x84xf32>
    %c3_261 = arith.constant 3 : index
    %c1_262 = arith.constant 1 : index
    %c0_263 = arith.constant 0 : index
    %c0_264 = arith.constant 0 : index
    %189 = vector.load %arg2[%c3_261, %c1_262, %c0_263, %c0_264] : memref<5x2x128x84xf32, #tpu.memory_space<vmem>>, vector<1x1x128x84xf32>
    %190 = vector.shape_cast %189 : vector<1x1x128x84xf32> to vector<128x84xf32>
    %cst_265 = arith.constant dense<0.000000e+00> : vector<7x84xf32>
    %191 = tpu.matmul %185, %190, %cst_265 {dimension_numbers = #tpu.dot_dimension_numbers<[1], [0], [0], [1], [0, 0, 1, 1], [], []>} : vector<7x128xf32>, vector<128x84xf32>, vector<7x84xf32> -> vector<7x84xf32>
    %192 = arith.addf %182, %188 : vector<7x84xf32>
    %193 = arith.addf %183, %191 : vector<7x84xf32>
    %c0_266 = arith.constant 0 : index
    %c3_267 = arith.constant 3 : index
    %c1_268 = arith.constant 1 : index
    %c0_269 = arith.constant 0 : index
    %194 = vector.load %arg1[%c0_266, %c3_267, %c1_268, %c0_269] : memref<1x4x8x128xf32, #tpu.memory_space<vmem>>, vector<1x1x7x128xf32>
    %195 = vector.shape_cast %194 : vector<1x1x7x128xf32> to vector<7x128xf32>
    %c4_270 = arith.constant 4 : index
    %c0_271 = arith.constant 0 : index
    %c0_272 = arith.constant 0 : index
    %c0_273 = arith.constant 0 : index
    %196 = vector.load %arg2[%c4_270, %c0_271, %c0_272, %c0_273] : memref<5x2x128x84xf32, #tpu.memory_space<vmem>>, vector<1x1x128x84xf32>
    %197 = vector.shape_cast %196 : vector<1x1x128x84xf32> to vector<128x84xf32>
    %cst_274 = arith.constant dense<0.000000e+00> : vector<7x84xf32>
    %198 = tpu.matmul %195, %197, %cst_274 {dimension_numbers = #tpu.dot_dimension_numbers<[1], [0], [0], [1], [0, 0, 1, 1], [], []>} : vector<7x128xf32>, vector<128x84xf32>, vector<7x84xf32> -> vector<7x84xf32>
    %c4_275 = arith.constant 4 : index
    %c1_276 = arith.constant 1 : index
    %c0_277 = arith.constant 0 : index
    %c0_278 = arith.constant 0 : index
    %199 = vector.load %arg2[%c4_275, %c1_276, %c0_277, %c0_278] : memref<5x2x128x84xf32, #tpu.memory_space<vmem>>, vector<1x1x128x84xf32>
    %200 = vector.shape_cast %199 : vector<1x1x128x84xf32> to vector<128x84xf32>
    %cst_279 = arith.constant dense<0.000000e+00> : vector<7x84xf32>
    %201 = tpu.matmul %195, %200, %cst_279 {dimension_numbers = #tpu.dot_dimension_numbers<[1], [0], [0], [1], [0, 0, 1, 1], [], []>} : vector<7x128xf32>, vector<128x84xf32>, vector<7x84xf32> -> vector<7x84xf32>
    %202 = arith.addf %192, %198 : vector<7x84xf32>
    %203 = arith.addf %193, %201 : vector<7x84xf32>
    %204 = arith.maximumf %202, %203 : vector<7x84xf32>
    %c0_280 = arith.constant 0 : index
    %c0_281 = arith.constant 0 : index
    %205 = vector.load %arg4[%c0_280, %c0_281] : memref<1x84xf32, #tpu.memory_space<vmem>>, vector<1x84xf32>
    %206 = vector.broadcast %205 : vector<1x84xf32> to vector<7x84xf32>
    %207 = arith.addf %204, %206 : vector<7x84xf32>
    %208 = arith.maximumf %51, %103 : vector<7x84xf32>
    %cst_282 = arith.constant 0.000000e+00 : f32
    %209 = vector.broadcast %cst_282 : f32 to vector<7x84xf32>
    %210 = arith.maximumf %208, %209 : vector<7x84xf32>
    %211 = arith.maximumf %155, %207 : vector<7x84xf32>
    %cst_283 = arith.constant 0.000000e+00 : f32
    %212 = vector.broadcast %cst_283 : f32 to vector<7x84xf32>
    %213 = arith.maximumf %211, %212 : vector<7x84xf32>
    %214 = vector.extract_strided_slice %210 {offsets = [0, 0], sizes = [5, 84], strides = [1, 1]} : vector<7x84xf32> to vector<5x84xf32>
    %c0_284 = arith.constant 0 : index
    %c0_285 = arith.constant 0 : index
    %c0_286 = arith.constant 0 : index
    %c0_287 = arith.constant 0 : index
    %215 = vector.load %arg3[%c0_284, %c0_285, %c0_286, %c0_287] : memref<5x2x84x80xf32, #tpu.memory_space<vmem>>, vector<1x1x84x80xf32>
    %216 = vector.shape_cast %215 : vector<1x1x84x80xf32> to vector<84x80xf32>
    %cst_288 = arith.constant dense<0.000000e+00> : vector<5x80xf32>
    %217 = tpu.matmul %214, %216, %cst_288 {dimension_numbers = #tpu.dot_dimension_numbers<[1], [0], [0], [1], [0, 0, 1, 1], [], []>} : vector<5x84xf32>, vector<84x80xf32>, vector<5x80xf32> -> vector<5x80xf32>
    %c0_289 = arith.constant 0 : index
    %c1_290 = arith.constant 1 : index
    %c0_291 = arith.constant 0 : index
    %c0_292 = arith.constant 0 : index
    %218 = vector.load %arg3[%c0_289, %c1_290, %c0_291, %c0_292] : memref<5x2x84x80xf32, #tpu.memory_space<vmem>>, vector<1x1x84x80xf32>
    %219 = vector.shape_cast %218 : vector<1x1x84x80xf32> to vector<84x80xf32>
    %cst_293 = arith.constant dense<0.000000e+00> : vector<5x80xf32>
    %220 = tpu.matmul %214, %219, %cst_293 {dimension_numbers = #tpu.dot_dimension_numbers<[1], [0], [0], [1], [0, 0, 1, 1], [], []>} : vector<5x84xf32>, vector<84x80xf32>, vector<5x80xf32> -> vector<5x80xf32>
    %221 = vector.extract_strided_slice %213 {offsets = [0, 0], sizes = [5, 84], strides = [1, 1]} : vector<7x84xf32> to vector<5x84xf32>
    %c1_294 = arith.constant 1 : index
    %c0_295 = arith.constant 0 : index
    %c0_296 = arith.constant 0 : index
    %c0_297 = arith.constant 0 : index
    %222 = vector.load %arg3[%c1_294, %c0_295, %c0_296, %c0_297] : memref<5x2x84x80xf32, #tpu.memory_space<vmem>>, vector<1x1x84x80xf32>
    %223 = vector.shape_cast %222 : vector<1x1x84x80xf32> to vector<84x80xf32>
    %cst_298 = arith.constant dense<0.000000e+00> : vector<5x80xf32>
    %224 = tpu.matmul %221, %223, %cst_298 {dimension_numbers = #tpu.dot_dimension_numbers<[1], [0], [0], [1], [0, 0, 1, 1], [], []>} : vector<5x84xf32>, vector<84x80xf32>, vector<5x80xf32> -> vector<5x80xf32>
    %c1_299 = arith.constant 1 : index
    %c1_300 = arith.constant 1 : index
    %c0_301 = arith.constant 0 : index
    %c0_302 = arith.constant 0 : index
    %225 = vector.load %arg3[%c1_299, %c1_300, %c0_301, %c0_302] : memref<5x2x84x80xf32, #tpu.memory_space<vmem>>, vector<1x1x84x80xf32>
    %226 = vector.shape_cast %225 : vector<1x1x84x80xf32> to vector<84x80xf32>
    %cst_303 = arith.constant dense<0.000000e+00> : vector<5x80xf32>
    %227 = tpu.matmul %221, %226, %cst_303 {dimension_numbers = #tpu.dot_dimension_numbers<[1], [0], [0], [1], [0, 0, 1, 1], [], []>} : vector<5x84xf32>, vector<84x80xf32>, vector<5x80xf32> -> vector<5x80xf32>
    %228 = arith.addf %217, %224 : vector<5x80xf32>
    %229 = arith.addf %220, %227 : vector<5x80xf32>
    %230 = vector.extract_strided_slice %210 {offsets = [1, 0], sizes = [5, 84], strides = [1, 1]} : vector<7x84xf32> to vector<5x84xf32>
    %c2_304 = arith.constant 2 : index
    %c0_305 = arith.constant 0 : index
    %c0_306 = arith.constant 0 : index
    %c0_307 = arith.constant 0 : index
    %231 = vector.load %arg3[%c2_304, %c0_305, %c0_306, %c0_307] : memref<5x2x84x80xf32, #tpu.memory_space<vmem>>, vector<1x1x84x80xf32>
    %232 = vector.shape_cast %231 : vector<1x1x84x80xf32> to vector<84x80xf32>
    %cst_308 = arith.constant dense<0.000000e+00> : vector<5x80xf32>
    %233 = tpu.matmul %230, %232, %cst_308 {dimension_numbers = #tpu.dot_dimension_numbers<[1], [0], [0], [1], [0, 0, 1, 1], [], []>} : vector<5x84xf32>, vector<84x80xf32>, vector<5x80xf32> -> vector<5x80xf32>
    %c2_309 = arith.constant 2 : index
    %c1_310 = arith.constant 1 : index
    %c0_311 = arith.constant 0 : index
    %c0_312 = arith.constant 0 : index
    %234 = vector.load %arg3[%c2_309, %c1_310, %c0_311, %c0_312] : memref<5x2x84x80xf32, #tpu.memory_space<vmem>>, vector<1x1x84x80xf32>
    %235 = vector.shape_cast %234 : vector<1x1x84x80xf32> to vector<84x80xf32>
    %cst_313 = arith.constant dense<0.000000e+00> : vector<5x80xf32>
    %236 = tpu.matmul %230, %235, %cst_313 {dimension_numbers = #tpu.dot_dimension_numbers<[1], [0], [0], [1], [0, 0, 1, 1], [], []>} : vector<5x84xf32>, vector<84x80xf32>, vector<5x80xf32> -> vector<5x80xf32>
    %237 = arith.addf %228, %233 : vector<5x80xf32>
    %238 = arith.addf %229, %236 : vector<5x80xf32>
    %239 = vector.extract_strided_slice %213 {offsets = [1, 0], sizes = [5, 84], strides = [1, 1]} : vector<7x84xf32> to vector<5x84xf32>
    %c3_314 = arith.constant 3 : index
    %c0_315 = arith.constant 0 : index
    %c0_316 = arith.constant 0 : index
    %c0_317 = arith.constant 0 : index
    %240 = vector.load %arg3[%c3_314, %c0_315, %c0_316, %c0_317] : memref<5x2x84x80xf32, #tpu.memory_space<vmem>>, vector<1x1x84x80xf32>
    %241 = vector.shape_cast %240 : vector<1x1x84x80xf32> to vector<84x80xf32>
    %cst_318 = arith.constant dense<0.000000e+00> : vector<5x80xf32>
    %242 = tpu.matmul %239, %241, %cst_318 {dimension_numbers = #tpu.dot_dimension_numbers<[1], [0], [0], [1], [0, 0, 1, 1], [], []>} : vector<5x84xf32>, vector<84x80xf32>, vector<5x80xf32> -> vector<5x80xf32>
    %c3_319 = arith.constant 3 : index
    %c1_320 = arith.constant 1 : index
    %c0_321 = arith.constant 0 : index
    %c0_322 = arith.constant 0 : index
    %243 = vector.load %arg3[%c3_319, %c1_320, %c0_321, %c0_322] : memref<5x2x84x80xf32, #tpu.memory_space<vmem>>, vector<1x1x84x80xf32>
    %244 = vector.shape_cast %243 : vector<1x1x84x80xf32> to vector<84x80xf32>
    %cst_323 = arith.constant dense<0.000000e+00> : vector<5x80xf32>
    %245 = tpu.matmul %239, %244, %cst_323 {dimension_numbers = #tpu.dot_dimension_numbers<[1], [0], [0], [1], [0, 0, 1, 1], [], []>} : vector<5x84xf32>, vector<84x80xf32>, vector<5x80xf32> -> vector<5x80xf32>
    %246 = arith.addf %237, %242 : vector<5x80xf32>
    %247 = arith.addf %238, %245 : vector<5x80xf32>
    %248 = vector.extract_strided_slice %210 {offsets = [2, 0], sizes = [5, 84], strides = [1, 1]} : vector<7x84xf32> to vector<5x84xf32>
    %c4_324 = arith.constant 4 : index
    %c0_325 = arith.constant 0 : index
    %c0_326 = arith.constant 0 : index
    %c0_327 = arith.constant 0 : index
    %249 = vector.load %arg3[%c4_324, %c0_325, %c0_326, %c0_327] : memref<5x2x84x80xf32, #tpu.memory_space<vmem>>, vector<1x1x84x80xf32>
    %250 = vector.shape_cast %249 : vector<1x1x84x80xf32> to vector<84x80xf32>
    %cst_328 = arith.constant dense<0.000000e+00> : vector<5x80xf32>
    %251 = tpu.matmul %248, %250, %cst_328 {dimension_numbers = #tpu.dot_dimension_numbers<[1], [0], [0], [1], [0, 0, 1, 1], [], []>} : vector<5x84xf32>, vector<84x80xf32>, vector<5x80xf32> -> vector<5x80xf32>
    %c4_329 = arith.constant 4 : index
    %c1_330 = arith.constant 1 : index
    %c0_331 = arith.constant 0 : index
    %c0_332 = arith.constant 0 : index
    %252 = vector.load %arg3[%c4_329, %c1_330, %c0_331, %c0_332] : memref<5x2x84x80xf32, #tpu.memory_space<vmem>>, vector<1x1x84x80xf32>
    %253 = vector.shape_cast %252 : vector<1x1x84x80xf32> to vector<84x80xf32>
    %cst_333 = arith.constant dense<0.000000e+00> : vector<5x80xf32>
    %254 = tpu.matmul %248, %253, %cst_333 {dimension_numbers = #tpu.dot_dimension_numbers<[1], [0], [0], [1], [0, 0, 1, 1], [], []>} : vector<5x84xf32>, vector<84x80xf32>, vector<5x80xf32> -> vector<5x80xf32>
    %255 = arith.addf %246, %251 : vector<5x80xf32>
    %256 = arith.addf %247, %254 : vector<5x80xf32>
    %257 = arith.maximumf %255, %256 : vector<5x80xf32>
    %c0_334 = arith.constant 0 : index
    %c0_335 = arith.constant 0 : index
    %258 = vector.load %arg5[%c0_334, %c0_335] : memref<1x80xf32, #tpu.memory_space<vmem>>, vector<1x80xf32>
    %259 = vector.broadcast %258 : vector<1x80xf32> to vector<5x80xf32>
    %260 = arith.addf %257, %259 : vector<5x80xf32>
    %261 = vector.extract_strided_slice %213 {offsets = [0, 0], sizes = [5, 84], strides = [1, 1]} : vector<7x84xf32> to vector<5x84xf32>
    %c0_336 = arith.constant 0 : index
    %c0_337 = arith.constant 0 : index
    %c0_338 = arith.constant 0 : index
    %c0_339 = arith.constant 0 : index
    %262 = vector.load %arg3[%c0_336, %c0_337, %c0_338, %c0_339] : memref<5x2x84x80xf32, #tpu.memory_space<vmem>>, vector<1x1x84x80xf32>
    %263 = vector.shape_cast %262 : vector<1x1x84x80xf32> to vector<84x80xf32>
    %cst_340 = arith.constant dense<0.000000e+00> : vector<5x80xf32>
    %264 = tpu.matmul %261, %263, %cst_340 {dimension_numbers = #tpu.dot_dimension_numbers<[1], [0], [0], [1], [0, 0, 1, 1], [], []>} : vector<5x84xf32>, vector<84x80xf32>, vector<5x80xf32> -> vector<5x80xf32>
    %c0_341 = arith.constant 0 : index
    %c1_342 = arith.constant 1 : index
    %c0_343 = arith.constant 0 : index
    %c0_344 = arith.constant 0 : index
    %265 = vector.load %arg3[%c0_341, %c1_342, %c0_343, %c0_344] : memref<5x2x84x80xf32, #tpu.memory_space<vmem>>, vector<1x1x84x80xf32>
    %266 = vector.shape_cast %265 : vector<1x1x84x80xf32> to vector<84x80xf32>
    %cst_345 = arith.constant dense<0.000000e+00> : vector<5x80xf32>
    %267 = tpu.matmul %261, %266, %cst_345 {dimension_numbers = #tpu.dot_dimension_numbers<[1], [0], [0], [1], [0, 0, 1, 1], [], []>} : vector<5x84xf32>, vector<84x80xf32>, vector<5x80xf32> -> vector<5x80xf32>
    %268 = vector.extract_strided_slice %210 {offsets = [1, 0], sizes = [5, 84], strides = [1, 1]} : vector<7x84xf32> to vector<5x84xf32>
    %c1_346 = arith.constant 1 : index
    %c0_347 = arith.constant 0 : index
    %c0_348 = arith.constant 0 : index
    %c0_349 = arith.constant 0 : index
    %269 = vector.load %arg3[%c1_346, %c0_347, %c0_348, %c0_349] : memref<5x2x84x80xf32, #tpu.memory_space<vmem>>, vector<1x1x84x80xf32>
    %270 = vector.shape_cast %269 : vector<1x1x84x80xf32> to vector<84x80xf32>
    %cst_350 = arith.constant dense<0.000000e+00> : vector<5x80xf32>
    %271 = tpu.matmul %268, %270, %cst_350 {dimension_numbers = #tpu.dot_dimension_numbers<[1], [0], [0], [1], [0, 0, 1, 1], [], []>} : vector<5x84xf32>, vector<84x80xf32>, vector<5x80xf32> -> vector<5x80xf32>
    %c1_351 = arith.constant 1 : index
    %c1_352 = arith.constant 1 : index
    %c0_353 = arith.constant 0 : index
    %c0_354 = arith.constant 0 : index
    %272 = vector.load %arg3[%c1_351, %c1_352, %c0_353, %c0_354] : memref<5x2x84x80xf32, #tpu.memory_space<vmem>>, vector<1x1x84x80xf32>
    %273 = vector.shape_cast %272 : vector<1x1x84x80xf32> to vector<84x80xf32>
    %cst_355 = arith.constant dense<0.000000e+00> : vector<5x80xf32>
    %274 = tpu.matmul %268, %273, %cst_355 {dimension_numbers = #tpu.dot_dimension_numbers<[1], [0], [0], [1], [0, 0, 1, 1], [], []>} : vector<5x84xf32>, vector<84x80xf32>, vector<5x80xf32> -> vector<5x80xf32>
    %275 = arith.addf %264, %271 : vector<5x80xf32>
    %276 = arith.addf %267, %274 : vector<5x80xf32>
    %277 = vector.extract_strided_slice %213 {offsets = [1, 0], sizes = [5, 84], strides = [1, 1]} : vector<7x84xf32> to vector<5x84xf32>
    %c2_356 = arith.constant 2 : index
    %c0_357 = arith.constant 0 : index
    %c0_358 = arith.constant 0 : index
    %c0_359 = arith.constant 0 : index
    %278 = vector.load %arg3[%c2_356, %c0_357, %c0_358, %c0_359] : memref<5x2x84x80xf32, #tpu.memory_space<vmem>>, vector<1x1x84x80xf32>
    %279 = vector.shape_cast %278 : vector<1x1x84x80xf32> to vector<84x80xf32>
    %cst_360 = arith.constant dense<0.000000e+00> : vector<5x80xf32>
    %280 = tpu.matmul %277, %279, %cst_360 {dimension_numbers = #tpu.dot_dimension_numbers<[1], [0], [0], [1], [0, 0, 1, 1], [], []>} : vector<5x84xf32>, vector<84x80xf32>, vector<5x80xf32> -> vector<5x80xf32>
    %c2_361 = arith.constant 2 : index
    %c1_362 = arith.constant 1 : index
    %c0_363 = arith.constant 0 : index
    %c0_364 = arith.constant 0 : index
    %281 = vector.load %arg3[%c2_361, %c1_362, %c0_363, %c0_364] : memref<5x2x84x80xf32, #tpu.memory_space<vmem>>, vector<1x1x84x80xf32>
    %282 = vector.shape_cast %281 : vector<1x1x84x80xf32> to vector<84x80xf32>
    %cst_365 = arith.constant dense<0.000000e+00> : vector<5x80xf32>
    %283 = tpu.matmul %277, %282, %cst_365 {dimension_numbers = #tpu.dot_dimension_numbers<[1], [0], [0], [1], [0, 0, 1, 1], [], []>} : vector<5x84xf32>, vector<84x80xf32>, vector<5x80xf32> -> vector<5x80xf32>
    %284 = arith.addf %275, %280 : vector<5x80xf32>
    %285 = arith.addf %276, %283 : vector<5x80xf32>
    %286 = vector.extract_strided_slice %210 {offsets = [2, 0], sizes = [5, 84], strides = [1, 1]} : vector<7x84xf32> to vector<5x84xf32>
    %c3_366 = arith.constant 3 : index
    %c0_367 = arith.constant 0 : index
    %c0_368 = arith.constant 0 : index
    %c0_369 = arith.constant 0 : index
    %287 = vector.load %arg3[%c3_366, %c0_367, %c0_368, %c0_369] : memref<5x2x84x80xf32, #tpu.memory_space<vmem>>, vector<1x1x84x80xf32>
    %288 = vector.shape_cast %287 : vector<1x1x84x80xf32> to vector<84x80xf32>
    %cst_370 = arith.constant dense<0.000000e+00> : vector<5x80xf32>
    %289 = tpu.matmul %286, %288, %cst_370 {dimension_numbers = #tpu.dot_dimension_numbers<[1], [0], [0], [1], [0, 0, 1, 1], [], []>} : vector<5x84xf32>, vector<84x80xf32>, vector<5x80xf32> -> vector<5x80xf32>
    %c3_371 = arith.constant 3 : index
    %c1_372 = arith.constant 1 : index
    %c0_373 = arith.constant 0 : index
    %c0_374 = arith.constant 0 : index
    %290 = vector.load %arg3[%c3_371, %c1_372, %c0_373, %c0_374] : memref<5x2x84x80xf32, #tpu.memory_space<vmem>>, vector<1x1x84x80xf32>
    %291 = vector.shape_cast %290 : vector<1x1x84x80xf32> to vector<84x80xf32>
    %cst_375 = arith.constant dense<0.000000e+00> : vector<5x80xf32>
    %292 = tpu.matmul %286, %291, %cst_375 {dimension_numbers = #tpu.dot_dimension_numbers<[1], [0], [0], [1], [0, 0, 1, 1], [], []>} : vector<5x84xf32>, vector<84x80xf32>, vector<5x80xf32> -> vector<5x80xf32>
    %293 = arith.addf %284, %289 : vector<5x80xf32>
    %294 = arith.addf %285, %292 : vector<5x80xf32>
    %295 = vector.extract_strided_slice %213 {offsets = [2, 0], sizes = [5, 84], strides = [1, 1]} : vector<7x84xf32> to vector<5x84xf32>
    %c4_376 = arith.constant 4 : index
    %c0_377 = arith.constant 0 : index
    %c0_378 = arith.constant 0 : index
    %c0_379 = arith.constant 0 : index
    %296 = vector.load %arg3[%c4_376, %c0_377, %c0_378, %c0_379] : memref<5x2x84x80xf32, #tpu.memory_space<vmem>>, vector<1x1x84x80xf32>
    %297 = vector.shape_cast %296 : vector<1x1x84x80xf32> to vector<84x80xf32>
    %cst_380 = arith.constant dense<0.000000e+00> : vector<5x80xf32>
    %298 = tpu.matmul %295, %297, %cst_380 {dimension_numbers = #tpu.dot_dimension_numbers<[1], [0], [0], [1], [0, 0, 1, 1], [], []>} : vector<5x84xf32>, vector<84x80xf32>, vector<5x80xf32> -> vector<5x80xf32>
    %c4_381 = arith.constant 4 : index
    %c1_382 = arith.constant 1 : index
    %c0_383 = arith.constant 0 : index
    %c0_384 = arith.constant 0 : index
    %299 = vector.load %arg3[%c4_381, %c1_382, %c0_383, %c0_384] : memref<5x2x84x80xf32, #tpu.memory_space<vmem>>, vector<1x1x84x80xf32>
    %300 = vector.shape_cast %299 : vector<1x1x84x80xf32> to vector<84x80xf32>
    %cst_385 = arith.constant dense<0.000000e+00> : vector<5x80xf32>
    %301 = tpu.matmul %295, %300, %cst_385 {dimension_numbers = #tpu.dot_dimension_numbers<[1], [0], [0], [1], [0, 0, 1, 1], [], []>} : vector<5x84xf32>, vector<84x80xf32>, vector<5x80xf32> -> vector<5x80xf32>
    %302 = arith.addf %293, %298 : vector<5x80xf32>
    %303 = arith.addf %294, %301 : vector<5x80xf32>
    %304 = arith.maximumf %302, %303 : vector<5x80xf32>
    %c0_386 = arith.constant 0 : index
    %c0_387 = arith.constant 0 : index
    %305 = vector.load %arg5[%c0_386, %c0_387] : memref<1x80xf32, #tpu.memory_space<vmem>>, vector<1x80xf32>
    %306 = vector.broadcast %305 : vector<1x80xf32> to vector<5x80xf32>
    %307 = arith.addf %304, %306 : vector<5x80xf32>
    %308 = arith.maximumf %260, %307 : vector<5x80xf32>
    %cst_388 = arith.constant 0.000000e+00 : f32
    %309 = vector.broadcast %cst_388 : f32 to vector<5x80xf32>
    %310 = arith.maximumf %308, %309 : vector<5x80xf32>
    %c0_389 = arith.constant 0 : index
    %c0_390 = arith.constant 0 : index
    %311 = vector.load %arg7[%c0_389, %c0_390] : memref<1x120xf32, #tpu.memory_space<vmem>>, vector<1x120xf32>
    %312 = vector.extract_strided_slice %310 {offsets = [0, 0], sizes = [1, 80], strides = [1, 1]} : vector<5x80xf32> to vector<1x80xf32>
    %c0_391 = arith.constant 0 : index
    %c0_392 = arith.constant 0 : index
    %c0_393 = arith.constant 0 : index
    %313 = vector.load %arg6[%c0_391, %c0_392, %c0_393] : memref<5x80x120xf32, #tpu.memory_space<vmem>>, vector<1x80x120xf32>
    %314 = vector.shape_cast %313 : vector<1x80x120xf32> to vector<80x120xf32>
    %cst_394 = arith.constant dense<0.000000e+00> : vector<1x120xf32>
    %315 = tpu.matmul %312, %314, %cst_394 {dimension_numbers = #tpu.dot_dimension_numbers<[1], [0], [0], [1], [0, 0, 1, 1], [], []>} : vector<1x80xf32>, vector<80x120xf32>, vector<1x120xf32> -> vector<1x120xf32>
    %316 = arith.addf %311, %315 : vector<1x120xf32>
    %317 = vector.extract_strided_slice %310 {offsets = [1, 0], sizes = [1, 80], strides = [1, 1]} : vector<5x80xf32> to vector<1x80xf32>
    %c1_395 = arith.constant 1 : index
    %c0_396 = arith.constant 0 : index
    %c0_397 = arith.constant 0 : index
    %318 = vector.load %arg6[%c1_395, %c0_396, %c0_397] : memref<5x80x120xf32, #tpu.memory_space<vmem>>, vector<1x80x120xf32>
    %319 = vector.shape_cast %318 : vector<1x80x120xf32> to vector<80x120xf32>
    %cst_398 = arith.constant dense<0.000000e+00> : vector<1x120xf32>
    %320 = tpu.matmul %317, %319, %cst_398 {dimension_numbers = #tpu.dot_dimension_numbers<[1], [0], [0], [1], [0, 0, 1, 1], [], []>} : vector<1x80xf32>, vector<80x120xf32>, vector<1x120xf32> -> vector<1x120xf32>
    %321 = arith.addf %316, %320 : vector<1x120xf32>
    %322 = vector.extract_strided_slice %310 {offsets = [2, 0], sizes = [1, 80], strides = [1, 1]} : vector<5x80xf32> to vector<1x80xf32>
    %c2_399 = arith.constant 2 : index
    %c0_400 = arith.constant 0 : index
    %c0_401 = arith.constant 0 : index
    %323 = vector.load %arg6[%c2_399, %c0_400, %c0_401] : memref<5x80x120xf32, #tpu.memory_space<vmem>>, vector<1x80x120xf32>
    %324 = vector.shape_cast %323 : vector<1x80x120xf32> to vector<80x120xf32>
    %cst_402 = arith.constant dense<0.000000e+00> : vector<1x120xf32>
    %325 = tpu.matmul %322, %324, %cst_402 {dimension_numbers = #tpu.dot_dimension_numbers<[1], [0], [0], [1], [0, 0, 1, 1], [], []>} : vector<1x80xf32>, vector<80x120xf32>, vector<1x120xf32> -> vector<1x120xf32>
    %326 = arith.addf %321, %325 : vector<1x120xf32>
    %327 = vector.extract_strided_slice %310 {offsets = [3, 0], sizes = [1, 80], strides = [1, 1]} : vector<5x80xf32> to vector<1x80xf32>
    %c3_403 = arith.constant 3 : index
    %c0_404 = arith.constant 0 : index
    %c0_405 = arith.constant 0 : index
    %328 = vector.load %arg6[%c3_403, %c0_404, %c0_405] : memref<5x80x120xf32, #tpu.memory_space<vmem>>, vector<1x80x120xf32>
    %329 = vector.shape_cast %328 : vector<1x80x120xf32> to vector<80x120xf32>
    %cst_406 = arith.constant dense<0.000000e+00> : vector<1x120xf32>
    %330 = tpu.matmul %327, %329, %cst_406 {dimension_numbers = #tpu.dot_dimension_numbers<[1], [0], [0], [1], [0, 0, 1, 1], [], []>} : vector<1x80xf32>, vector<80x120xf32>, vector<1x120xf32> -> vector<1x120xf32>
    %331 = arith.addf %326, %330 : vector<1x120xf32>
    %332 = vector.extract_strided_slice %310 {offsets = [4, 0], sizes = [1, 80], strides = [1, 1]} : vector<5x80xf32> to vector<1x80xf32>
    %c4_407 = arith.constant 4 : index
    %c0_408 = arith.constant 0 : index
    %c0_409 = arith.constant 0 : index
    %333 = vector.load %arg6[%c4_407, %c0_408, %c0_409] : memref<5x80x120xf32, #tpu.memory_space<vmem>>, vector<1x80x120xf32>
    %334 = vector.shape_cast %333 : vector<1x80x120xf32> to vector<80x120xf32>
    %cst_410 = arith.constant dense<0.000000e+00> : vector<1x120xf32>
    %335 = tpu.matmul %332, %334, %cst_410 {dimension_numbers = #tpu.dot_dimension_numbers<[1], [0], [0], [1], [0, 0, 1, 1], [], []>} : vector<1x80xf32>, vector<80x120xf32>, vector<1x120xf32> -> vector<1x120xf32>
    %336 = arith.addf %331, %335 : vector<1x120xf32>
    %cst_411 = arith.constant 0.000000e+00 : f32
    %337 = vector.broadcast %cst_411 : f32 to vector<1x120xf32>
    %338 = arith.maximumf %336, %337 : vector<1x120xf32>
    %c0_412 = arith.constant 0 : index
    %c0_413 = arith.constant 0 : index
    %339 = vector.load %arg8[%c0_412, %c0_413] : memref<120x84xf32, #tpu.memory_space<vmem>>, vector<120x84xf32>
    %cst_414 = arith.constant dense<0.000000e+00> : vector<1x84xf32>
    %340 = tpu.matmul %338, %339, %cst_414 {dimension_numbers = #tpu.dot_dimension_numbers<[1], [0], [0], [1], [0, 0, 1, 1], [], []>} : vector<1x120xf32>, vector<120x84xf32>, vector<1x84xf32> -> vector<1x84xf32>
    %c0_415 = arith.constant 0 : index
    %c0_416 = arith.constant 0 : index
    %341 = vector.load %arg9[%c0_415, %c0_416] : memref<1x84xf32, #tpu.memory_space<vmem>>, vector<1x84xf32>
    %342 = arith.addf %340, %341 : vector<1x84xf32>
    %cst_417 = arith.constant 0.000000e+00 : f32
    %343 = vector.broadcast %cst_417 : f32 to vector<1x84xf32>
    %344 = arith.maximumf %342, %343 : vector<1x84xf32>
    %c0_418 = arith.constant 0 : index
    %c0_419 = arith.constant 0 : index
    %345 = vector.load %arg10[%c0_418, %c0_419] : memref<84x10xf32, #tpu.memory_space<vmem>>, vector<84x10xf32>
    %cst_420 = arith.constant dense<0.000000e+00> : vector<1x10xf32>
    %346 = tpu.matmul %344, %345, %cst_420 {dimension_numbers = #tpu.dot_dimension_numbers<[1], [0], [0], [1], [0, 0, 1, 1], [], []>} : vector<1x84xf32>, vector<84x10xf32>, vector<1x10xf32> -> vector<1x10xf32>
    %c0_421 = arith.constant 0 : index
    %c0_422 = arith.constant 0 : index
    %347 = vector.load %arg11[%c0_421, %c0_422] : memref<1x10xf32, #tpu.memory_space<vmem>>, vector<1x10xf32>
    %348 = arith.addf %346, %347 : vector<1x10xf32>
    %cst_423 = arith.constant dense<0xFF800000> : vector<1xf32>
    %349 = vector.multi_reduction <maximumf>, %348, %cst_423 [1] : vector<1x10xf32> to vector<1xf32>
    %350 = vector.shape_cast %349 : vector<1xf32> to vector<1x1xf32>
    %351 = vector.broadcast %350 : vector<1x1xf32> to vector<1x10xf32>
    %352 = arith.subf %348, %351 : vector<1x10xf32>
    %353 = math.exp %352 : vector<1x10xf32>
    %cst_424 = arith.constant dense<0.000000e+00> : vector<1xf32>
    %354 = vector.multi_reduction <add>, %353, %cst_424 [1] : vector<1x10xf32> to vector<1xf32>
    %355 = vector.shape_cast %354 : vector<1xf32> to vector<1x1xf32>
    %356 = math.log %355 : vector<1x1xf32>
    %357 = arith.addf %350, %356 : vector<1x1xf32>
    %358 = vector.broadcast %357 : vector<1x1xf32> to vector<1x10xf32>
    %359 = arith.subf %348, %358 : vector<1x10xf32>
    %c0_425 = arith.constant 0 : index
    %c0_426 = arith.constant 0 : index
    %c0_427 = arith.constant 0 : index
    %360 = vector.load %arg12[%c0_425, %c0_426, %c0_427] : memref<1x1x10xf32, #tpu.memory_space<vmem>>, vector<1x1x10xf32>
    %361 = vector.shape_cast %360 : vector<1x1x10xf32> to vector<1x10xf32>
    %362 = vector.shape_cast %359 : vector<1x10xf32> to vector<1x1x10xf32>
    tpu.vector_store %arg12[%c0_425, %c0_426, %c0_427], %362 {strides = array<i32>} : memref<1x1x10xf32, #tpu.memory_space<vmem>>, vector<1x1x10xf32>,
    return
  }
  func.func @transform_0(%arg0: i32) -> (i32, i32, i32, i32) {
    %c0_i32 = arith.constant 0 : i32
    %c0_i32_0 = arith.constant 0 : i32
    %c0_i32_1 = arith.constant 0 : i32
    %c0_i32_2 = arith.constant 0 : i32
    return %arg0, %c0_i32, %c0_i32_0, %c0_i32_1 : i32, i32, i32, i32
  }
  func.func @transform_1(%arg0: i32) -> (i32, i32, i32, i32) {
    %c0_i32 = arith.constant 0 : i32
    %c0_i32_0 = arith.constant 0 : i32
    %c0_i32_1 = arith.constant 0 : i32
    %c0_i32_2 = arith.constant 0 : i32
    %c0_i32_3 = arith.constant 0 : i32
    return %c0_i32, %c0_i32_0, %c0_i32_1, %c0_i32_2 : i32, i32, i32, i32
  }
  func.func @transform_2(%arg0: i32) -> (i32, i32, i32, i32) {
    %c0_i32 = arith.constant 0 : i32
    %c0_i32_0 = arith.constant 0 : i32
    %c0_i32_1 = arith.constant 0 : i32
    %c0_i32_2 = arith.constant 0 : i32
    %c0_i32_3 = arith.constant 0 : i32
    return %c0_i32, %c0_i32_0, %c0_i32_1, %c0_i32_2 : i32, i32, i32, i32
  }
  func.func @transform_3(%arg0: i32) -> (i32, i32) {
    %c0_i32 = arith.constant 0 : i32
    %c0_i32_0 = arith.constant 0 : i32
    %c0_i32_1 = arith.constant 0 : i32
    return %c0_i32, %c0_i32_0 : i32, i32
  }
  func.func @transform_4(%arg0: i32) -> (i32, i32) {
    %c0_i32 = arith.constant 0 : i32
    %c0_i32_0 = arith.constant 0 : i32
    %c0_i32_1 = arith.constant 0 : i32
    return %c0_i32, %c0_i32_0 : i32, i32
  }
  func.func @transform_5(%arg0: i32) -> (i32, i32, i32) {
    %c0_i32 = arith.constant 0 : i32
    %c0_i32_0 = arith.constant 0 : i32
    %c0_i32_1 = arith.constant 0 : i32
    %c0_i32_2 = arith.constant 0 : i32
    return %c0_i32, %c0_i32_0, %c0_i32_1 : i32, i32, i32
  }
  func.func @transform_6(%arg0: i32) -> (i32, i32) {
    %c0_i32 = arith.constant 0 : i32
    %c0_i32_0 = arith.constant 0 : i32
    %c0_i32_1 = arith.constant 0 : i32
    return %c0_i32, %c0_i32_0 : i32, i32
  }
  func.func @transform_7(%arg0: i32) -> (i32, i32) {
    %c0_i32 = arith.constant 0 : i32
    %c0_i32_0 = arith.constant 0 : i32
    %c0_i32_1 = arith.constant 0 : i32
    return %c0_i32, %c0_i32_0 : i32, i32
  }
  func.func @transform_8(%arg0: i32) -> (i32, i32) {
    %c0_i32 = arith.constant 0 : i32
    %c0_i32_0 = arith.constant 0 : i32
    %c0_i32_1 = arith.constant 0 : i32
    return %c0_i32, %c0_i32_0 : i32, i32
  }
  func.func @transform_9(%arg0: i32) -> (i32, i32) {
    %c0_i32 = arith.constant 0 : i32
    %c0_i32_0 = arith.constant 0 : i32
    %c0_i32_1 = arith.constant 0 : i32
    return %c0_i32, %c0_i32_0 : i32, i32
  }
  func.func @transform_10(%arg0: i32) -> (i32, i32) {
    %c0_i32 = arith.constant 0 : i32
    %c0_i32_0 = arith.constant 0 : i32
    %c0_i32_1 = arith.constant 0 : i32
    return %c0_i32, %c0_i32_0 : i32, i32
  }
  func.func @transform_11(%arg0: i32) -> (i32, i32, i32) {
    %c0_i32 = arith.constant 0 : i32
    %c0_i32_0 = arith.constant 0 : i32
    %c0_i32_1 = arith.constant 0 : i32
    return %arg0, %c0_i32, %c0_i32_0 : i32, i32, i32
  }
}

</mosaic_0001>

<bundles_post_ra>
// kernel: cnn_cifar_forward.1
= control target key start
LH: loop header
LB: loop body
LE: loop exit
PB: predicated region body
PF: predicated region fallthrough
CT: control target
= control target key end

     0   :  { %s6016_s0 = inlined_call_operand.vmem [shape: f32[2,4,8,128], index: 0, kind: input, shape index: {}]   ;;  %s6017_s1 = inlined_call_operand.vmem [shape: f32[5,2,128,84], index: 1, kind: input, shape index: {}]   ;;  %s6018_s2 = inlined_call_operand.vmem [shape: f32[5,2,84,80], index: 2, kind: input, shape index: {}]   ;;  %s6019_s3 = inlined_call_operand.vmem [shape: f32[1,84], index: 3, kind: input, shape index: {}]   ;;  %s6020_s4 = inlined_call_operand.vmem [shape: f32[1,80], index: 4, kind: input, shape index: {}]   ;;  %s6021_s5 = inlined_call_operand.vmem [shape: f32[5,80,120], index: 5, kind: input, shape index: {}]   ;;  %s6022_s6 = inlined_call_operand.vmem [shape: f32[1,120], index: 6, kind: input, shape index: {}]   ;;  %s6023_s7 = inlined_call_operand.vmem [shape: f32[120,84], index: 7, kind: input, shape index: {}]   ;;  %s6024_s8 = inlined_call_operand.vmem [shape: f32[1,84], index: 8, kind: input, shape index: {}]   ;;  %s6025_s9 = inlined_call_operand.vmem [shape: f32[84,10], index: 9, kind: input, shape index: {}]   ;;  %s6026_s10 = inlined_call_operand.vmem [shape: f32[1,10], index: 10, kind: input, shape index: {}]   ;;  %s6027_s11 = inlined_call_operand.hbm [shape: f32[2,1,10], index: 11, kind: output, shape index: {}]  }
   0x1   :  { %6307 = sst [smem:[#allocation155_spill]] %s6016_s0 }
   0x2   :  { %16 = vsyncpa [#allocation3], 0 }
   0x3   :  { %18 = vsyncpa [#allocation3 + $0x1], 0  ;;  %s2996_s17 = smov 0   ;;  %s2998_s18 = smov 0  }
   0x4   :  { %s3000_s19 = smov 0   ;;  %s3002_s20 = smov 0  }
   0x5 LB: > { %s3017_s21 = sadd.s32 4294967295, %s2934_s20   ;;  %s2334_s22 = sadd.s32 4294967294, %s2934_s20   ;;  %s2934_s20 = sphi %s3002_s20, %s6717_s20   ;;  %s2930_s19 = sphi %s3000_s19, %s6716_s19   ;;  %s2926_s18 = sphi %s2998_s18, %s6715_s18   ;;  %s2922_s17 = sphi %s2996_s17, %s6714_s17  }
   0x6   : > { %s3021_s23 = sadd.s32 1, %s2934_s20   ;;  %s267_s24 = sadd.s32 1, %s2930_s19 }
   0x7   : > { %s264_s25 = ssub.s32 %s2934_s20, %s3021_s23  ;;  %p277_p0 = scmp.ne.s32.totalorder %s2930_s19, %s2926_s18 }
   0x8   : > { %p265_p1 = scmp.eq.s32.totalorder %s264_s25, 0  ;;  %p278_p2 = scmp.eq.s32.totalorder %s3017_s21, 1 }
   0x9   : > { %p283_p3 = scmp.ne.s32.totalorder %s2926_s18, %s2922_s17  ;;  %p284_p4 = scmp.eq.s32.totalorder %s2334_s22, 1 }
   0xa   : > { %s3032_s26 = scalar_select %p265_p1, %s2930_s19, %s267_s24  }
   0xb   : > { %p3034_p5 = por %p278_p2, %p277_p0  ;;  %p3038_p6 = por %p284_p4, %p283_p3 }
   0xc   : > { %p2337_p7 = scmp.ge.s32.totalorder %s2934_s20, 1  ;;  %p340_p8 = scmp.lt.s32.totalorder %s2934_s20, 3 }
   0xe   : > { %p341_p9 = pnand %p2337_p7, %p340_p8 }
  0x10   : > { %344 = sbr.rel (%p341_p9) target bundleno = 1428 (0x594), region = 64 }
  0x15   : > { %v3047_v0 = vld [vmem:[%s6017_s1 + $0x178] sm:$0xff]  ;;  %v3069_v4 = vld [vmem:[%s6017_s1 + $0x170] sm:$0xff]  ;;  %v3091_v8 = vld [vmem:[%s6017_s1 + $0x168] sm:$0xff]  ;;  %p379_p10 = scmp.lt.s32.totalorder %s3017_s21, 1  ;;  %s6408_s0 = sld [smem:[#allocation155_spill]]  ;;  %vm1443_vm0 = vcmask 1043456  }
  0x16   : > { %v3052_v1 = vld [vmem:[%s6017_s1 + $0x1f8] sm:$0xff]  ;;  %437 = vmatpush.msra.mxu0 %v3047_v0  ;;  %6310 = vst [vmem:[#allocation5_spill] sm:$0xff] %v3069_v4  ;;  %v3074_v5 = vld [vmem:[%s6017_s1 + $0x1f0] sm:$0xff]  ;;  %v3098_v9 = vld [vmem:[%s6017_s1 + $0x1e8] sm:$0xff]  ;;  %vm1439_vm1 = vcmask 687104   ;;  %vm2006_vm2 = vcmask 654336   ;;  %s2275_s24 = scalar_lea.hbm %s6027_s11, %s3017_s21 }
  0x17   : > { %v3057_v2 = vld [vmem:[%s6017_s1 + $0x78] sm:$0xff]  ;;  %474 = vmatpush.msra.mxu1 %v3052_v1  ;;  %6311 = vst [vmem:[#allocation6_spill] sm:$0xff] %v3074_v5  ;;  %v3081_v6 = vld [vmem:[%s6017_s1 + $0x70] sm:$0xff]  ;;  %v3103_v10 = vld [vmem:[%s6017_s1 + $0x68] sm:$0xff]  ;;  %s3630_s16 = scalar_select %p379_p10, %s3017_s21, 1  ;;  %vm2188_vm3 = vcmask 982016  }
  0x18   : > { %v3064_v3 = vld [vmem:[%s6017_s1 + $0xf8] sm:$0xff]  ;;  %494 = vmatpush.msra.mxu2 %v3057_v2  ;;  %v3086_v7 = vld [vmem:[%s6017_s1 + $0xf0] sm:$0xff]  ;;  %6312 = vst [vmem:[#allocation7_spill] sm:$0xff] %v3091_v8  ;;  %438 = vmatpush.msra.mxu0 %v3069_v4  ;;  %v3108_v11 = vld [vmem:[%s6017_s1 + $0xe8] sm:$0xff]  ;;  %vm2251_vm4 = vcmask 73728   ;;  %s377_s15 = sand.u32 1, %s2926_s18  }
  0x19   : > { %514 = vmatpush.msra.mxu3 %v3064_v3  ;;  %475 = vmatpush.msra.mxu1 %v3074_v5  ;;  %6313 = vst [vmem:[#allocation8_spill] sm:$0xff] %v3098_v9  ;;  %v3115_v12 = vld [vmem:[%s6017_s1 + $0x160] sm:$0xff]  ;;  %v3139_v16 = vld [vmem:[%s6017_s1 + $0x158] sm:$0xff]  ;;  %v3163_v20 = vld [vmem:[%s6017_s1 + $0x150] sm:$0xff]  ;;  %s2679_s14 = sshll.u32 %s3630_s16, 5  ;;  %s378_s25 = scalar_lea.vmem [#allocation2], %s377_s15 }
  0x1a   : > { %495 = vmatpush.msra.mxu2 %v3081_v6  ;;  %6314 = vst [vmem:[#allocation9_spill] sm:$0xff] %v3115_v12  ;;  %v3120_v13 = vld [vmem:[%s6017_s1 + $0x1e0] sm:$0xff]  ;;  %439 = vmatpush.msra.mxu0 %v3091_v8  ;;  %v3144_v17 = vld [vmem:[%s6017_s1 + $0x1d8] sm:$0xff]  ;;  %v3168_v21 = vld [vmem:[%s6017_s1 + $0x1d0] sm:$0xff]  ;;  %s2279_s29 = sshll.u32 %s2275_s24, 4  ;;  %s2280_s29 = int_to_ptr.hbm [resolvable:$true] %s2279_s29 }
  0x1b   : > { %515 = vmatpush.msra.mxu3 %v3086_v7  ;;  %6315 = vst [vmem:[#allocation10_spill] sm:$0xff] %v3120_v13  ;;  %476 = vmatpush.msra.mxu1 %v3098_v9  ;;  %v3127_v14 = vld [vmem:[%s6017_s1 + $0x60] sm:$0xff]  ;;  %v3151_v18 = vld [vmem:[%s6017_s1 + $0x58] sm:$0xff]  ;;  %v3175_v22 = vld [vmem:[%s6017_s1 + $0x50] sm:$0xff]  ;;  %s3720_s16 = scalar_lea.vmem %s6408_s0, %s2679_s14  ;;  %s2277_s0 = sshll.u32 %s378_s25, 4  ;;  %s2278_s0 = int_to_ptr.vmem [resolvable:$true] %s2277_s0 }
  0x1c   : > { %v3132_v15 = vld [vmem:[%s6017_s1 + $0xe0] sm:$0xff]  ;;  %496 = vmatpush.msra.mxu2 %v3103_v10  ;;  %6316 = vst [vmem:[#allocation11_spill] sm:$0xff] %v3139_v16  ;;  %440 = vmatpush.msra.mxu0 %v3115_v12  ;;  %v3156_v19 = vld [vmem:[%s6017_s1 + $0xd8] sm:$0xff]  ;;  %v3180_v23 = vld [vmem:[%s6017_s1 + $0xd0] sm:$0xff]  ;;  %s2886_s30 = sshra.s32 %s2280_s29, 4  ;;  %s2892_s14 = scalar_lea.hbm %s6027_s11, 2  ;;  %s2887_s30 = int_to_ptr.hbm [resolvable:$true] %s2886_s30 }
  0x1d   : > { %516 = vmatpush.msra.mxu3 %v3108_v11  ;;  %6317 = vst [vmem:[#allocation12_spill] sm:$0xff] %v3144_v17  ;;  %477 = vmatpush.msra.mxu1 %v3120_v13  ;;  %v3187_v24 = vld [vmem:[%s6017_s1 + $0x148] sm:$0xff]  ;;  %v3211_v28 = vld [vmem:[%s6017_s1 + $0x140] sm:$0xff]  ;;  %v3235_v32 = vld [vmem:[%s6017_s1 + $0x138] sm:$0xff]  ;;  %s2888_s12 = scalar_lea.hbm %s2887_s30, 1  ;;  %p2893_p0 = scmp.lt.s32.totalorder %s2887_s30, %s6027_s11 }
  0x1e   : > { %497 = vmatpush.msra.mxu2 %v3127_v14  ;;  %6318 = vst [vmem:[#allocation13_spill] sm:$0xff] %v3163_v20  ;;  %441 = vmatpush.msra.mxu0 %v3139_v16  ;;  %v3192_v25 = vld [vmem:[%s6017_s1 + $0x1c8] sm:$0xff]  ;;  %v3216_v29 = vld [vmem:[%s6017_s1 + $0x1c0] sm:$0xff]  ;;  %v3240_v33 = vld [vmem:[%s6017_s1 + $0x1b8] sm:$0xff]  ;;  %p2889_p11 = scmp.ne.s32.totalorder %s2887_s30, %s2888_s12  ;;  %p2894_p1 = scmp.lt.s32.totalorder %s2892_s14, %s2888_s12 }
  0x1f   : > { %517 = vmatpush.msra.mxu3 %v3132_v15  ;;  %6319 = vst [vmem:[#allocation14_spill] sm:$0xff] %v3168_v21  ;;  %478 = vmatpush.msra.mxu1 %v3144_v17  ;;  %v3199_v26 = vld [vmem:[%s6017_s1 + $0x48] sm:$0xff]  ;;  %v3223_v30 = vld [vmem:[%s6017_s1 + $0x40] sm:$0xff]  ;;  %v3247_v34 = vld [vmem:[%s6017_s1 + $0x38] sm:$0xff] }
  0x20   : > { %498 = vmatpush.msra.mxu2 %v3151_v18  ;;  %6320 = vst [vmem:[#allocation15_spill] sm:$0xff] %v3187_v24  ;;  %442 = vmatpush.msra.mxu0 %v3163_v20  ;;  %v3204_v27 = vld [vmem:[%s6017_s1 + $0xc8] sm:$0xff]  ;;  %v3228_v31 = vld [vmem:[%s6017_s1 + $0xc0] sm:$0xff]  ;;  %v3252_v35 = vld [vmem:[%s6017_s1 + $0xb8] sm:$0xff]  ;;  %p2890_p12 = pnand %p2889_p11, %p3034_p5  ;;  %p2895_p2 = por %p2894_p1, %p2893_p0 }
  0x21   : > { %518 = vmatpush.msra.mxu3 %v3156_v19  ;;  %6321 = vst [vmem:[#allocation16_spill] sm:$0xff] %v3192_v25  ;;  %479 = vmatpush.msra.mxu1 %v3168_v21  ;;  %v3259_v36 = vld [vmem:[%s6017_s1 + $0x130] sm:$0xff]  ;;  %v3283_v40 = vld [vmem:[%s6017_s1 + $0x128] sm:$0xff]  ;;  %v3307_v44 = vld [vmem:[%s6017_s1 + $0x120] sm:$0xff] }
  0x22   : > { %6322 = vst [vmem:[#allocation17_spill] sm:$0xff] %v3199_v26  ;;  %499 = vmatpush.msra.mxu2 %v3175_v22  ;;  %443 = vmatpush.msra.mxu0 %v3187_v24  ;;  %v3264_v37 = vld [vmem:[%s6017_s1 + $0x1b0] sm:$0xff]  ;;  %v3288_v41 = vld [vmem:[%s6017_s1 + $0x1a8] sm:$0xff]  ;;  %v3312_v45 = vld [vmem:[%s6017_s1 + $0x1a0] sm:$0xff]  ;;  %p2891_p13 = pneg %p2890_p12 }
  0x23   : > { %6323 = vst [vmem:[#allocation18_spill] sm:$0xff] %v3204_v27  ;;  %519 = vmatpush.msra.mxu3 %v3180_v23  ;;  %480 = vmatpush.msra.mxu1 %v3192_v25  ;;  %v3271_v38 = vld [vmem:[%s6017_s1 + $0x30] sm:$0xff]  ;;  %v3295_v42 = vld [vmem:[%s6017_s1 + $0x28] sm:$0xff]  ;;  %v3319_v46 = vld [vmem:[%s6017_s1 + $0x20] sm:$0xff] }
  0x24   : > { %6324 = vst [vmem:[#allocation19_spill] sm:$0xff] %v3211_v28  ;;  %500 = vmatpush.msra.mxu2 %v3199_v26  ;;  %444 = vmatpush.msra.mxu0 %v3211_v28  ;;  %v3276_v39 = vld [vmem:[%s6017_s1 + $0xb0] sm:$0xff]  ;;  %v3300_v43 = vld [vmem:[%s6017_s1 + $0xa8] sm:$0xff]  ;;  %v3324_v47 = vld [vmem:[%s6017_s1 + $0xa0] sm:$0xff]  ;;  %p2896_p3 = pnand %p2895_p2, %p2891_p13 }
  0x25   : > { %6325 = vst [vmem:[#allocation20_spill] sm:$0xff] %v3216_v29  ;;  %520 = vmatpush.msra.mxu3 %v3204_v27  ;;  %481 = vmatpush.msra.mxu1 %v3216_v29  ;;  %v3331_v48 = vld [vmem:[%s6017_s1 + $0x118] sm:$0xff]  ;;  %v3355_v52 = vld [vmem:[%s6017_s1 + $0x110] sm:$0xff]  ;;  %v3379_v56 = vld [vmem:[%s6017_s1 + $0x108] sm:$0xff] }
  0x26   : > { %6326 = vst [vmem:[#allocation21_spill] sm:$0xff] %v3223_v30  ;;  %501 = vmatpush.msra.mxu2 %v3223_v30  ;;  %445 = vmatpush.msra.mxu0 %v3235_v32  ;;  %v3336_v49 = vld [vmem:[%s6017_s1 + $0x198] sm:$0xff]  ;;  %v3360_v53 = vld [vmem:[%s6017_s1 + $0x190] sm:$0xff]  ;;  %v3384_v57 = vld [vmem:[%s6017_s1 + $0x188] sm:$0xff] }
  0x27   : > { %6327 = vst [vmem:[#allocation22_spill] sm:$0xff] %v3228_v31  ;;  %521 = vmatpush.msra.mxu3 %v3228_v31  ;;  %482 = vmatpush.msra.mxu1 %v3240_v33  ;;  %v3343_v50 = vld [vmem:[%s6017_s1 + $0x18] sm:$0xff]  ;;  %v3367_v54 = vld [vmem:[%s6017_s1 + $0x10] sm:$0xff]  ;;  %v3391_v58 = vld [vmem:[%s6017_s1 + $0x8] sm:$0xff] }
  0x28   : > { %6328 = vst [vmem:[#allocation23_spill] sm:$0xff] %v3235_v32  ;;  %502 = vmatpush.msra.mxu2 %v3247_v34  ;;  %446 = vmatpush.msra.mxu0 %v3259_v36  ;;  %v3348_v51 = vld [vmem:[%s6017_s1 + $0x98] sm:$0xff]  ;;  %v3372_v55 = vld [vmem:[%s6017_s1 + $0x90] sm:$0xff]  ;;  %v3396_v59 = vld [vmem:[%s6017_s1 + $0x88] sm:$0xff] }
  0x29   : > { %6329 = vst [vmem:[#allocation24_spill] sm:$0xff] %v3240_v33  ;;  %522 = vmatpush.msra.mxu3 %v3252_v35  ;;  %483 = vmatpush.msra.mxu1 %v3264_v37  ;;  %v3403_v60 = vld [vmem:[%s6017_s1 + $0x100] sm:$0xff]  ;;  %v3571_v31 = vld [vmem:[%s6017_s1 + $0x248] sm:$0xff] }
  0x2a   : > { %6330 = vst [vmem:[#allocation25_spill] sm:$0xff] %v3247_v34  ;;  %503 = vmatpush.msra.mxu2 %v3271_v38  ;;  %447 = vmatpush.msra.mxu0 %v3283_v40  ;;  %v3408_v61 = vld [vmem:[%s6017_s1 + $0x180] sm:$0xff]  ;;  %v3552_v34 = vld [vmem:[%s6017_s1 + $0x2d0] sm:$0xff]  ;;  %v3576_v30 = vld [vmem:[%s6017_s1 + $0x2c8] sm:$0xff] }
  0x2b   : > { %6331 = vst [vmem:[#allocation26_spill] sm:$0xff] %v3252_v35  ;;  %523 = vmatpush.msra.mxu3 %v3276_v39  ;;  %484 = vmatpush.msra.mxu1 %v3288_v41  ;;  %v3415_v62 = vld [vmem:[%s6017_s1] sm:$0xff]  ;;  %v3547_v35 = vld [vmem:[%s6017_s1 + $0x250] sm:$0xff] }
  0x2c   : > { %6332 = vst [vmem:[#allocation27_spill] sm:$0xff] %v3259_v36  ;;  %504 = vmatpush.msra.mxu2 %v3295_v42  ;;  %448 = vmatpush.msra.mxu0 %v3307_v44  ;;  %v3420_v63 = vld [vmem:[%s6017_s1 + $0x80] sm:$0xff] }
  0x2d   : > { %6333 = vst [vmem:[#allocation28_spill] sm:$0xff] %v3264_v37  ;;  %524 = vmatpush.msra.mxu3 %v3300_v43  ;;  %485 = vmatpush.msra.mxu1 %v3312_v45  ;;  %v3596_v27 = vld [vmem:[%s6017_s1 + $0x240] sm:$0xff] }
  0x2e   : > { %6334 = vst [vmem:[#allocation29_spill] sm:$0xff] %v3271_v38  ;;  %505 = vmatpush.msra.mxu2 %v3319_v46  ;;  %449 = vmatpush.msra.mxu0 %v3331_v48  ;;  %v3528_v38 = vld [vmem:[%s6017_s1 + $0x2d8] sm:$0xff]  ;;  %v3601_v26 = vld [vmem:[%s6017_s1 + $0x2c0] sm:$0xff] }
  0x2f   : > { %6335 = vst [vmem:[#allocation30_spill] sm:$0xff] %v3276_v39  ;;  %525 = vmatpush.msra.mxu3 %v3324_v47  ;;  %486 = vmatpush.msra.mxu1 %v3336_v49  ;;  %v3523_v39 = vld [vmem:[%s6017_s1 + $0x258] sm:$0xff] }
  0x30   : > { %6336 = vst [vmem:[#allocation31_spill] sm:$0xff] %v3283_v40  ;;  %506 = vmatpush.msra.mxu2 %v3343_v50  ;;  %450 = vmatpush.msra.mxu0 %v3355_v52 }
  0x31   : > { %6337 = vst [vmem:[#allocation32_spill] sm:$0xff] %v3288_v41  ;;  %526 = vmatpush.msra.mxu3 %v3348_v51  ;;  %487 = vmatpush.msra.mxu1 %v3360_v53 }
  0x32   : > { %6338 = vst [vmem:[#allocation33_spill] sm:$0xff] %v3295_v42  ;;  %507 = vmatpush.msra.mxu2 %v3367_v54  ;;  %451 = vmatpush.msra.mxu0 %v3379_v56  ;;  %v3504_v42 = vld [vmem:[%s6017_s1 + $0x2e0] sm:$0xff] }
  0x33   : > { %6339 = vst [vmem:[#allocation34_spill] sm:$0xff] %v3300_v43  ;;  %527 = vmatpush.msra.mxu3 %v3372_v55  ;;  %488 = vmatpush.msra.mxu1 %v3384_v57  ;;  %v3499_v43 = vld [vmem:[%s6017_s1 + $0x260] sm:$0xff] }
  0x34   : > { %6340 = vst [vmem:[#allocation35_spill] sm:$0xff] %v3307_v44  ;;  %508 = vmatpush.msra.mxu2 %v3391_v58  ;;  %452 = vmatpush.msra.mxu0 %v3403_v60 }
  0x35   : > { %6341 = vst [vmem:[#allocation36_spill] sm:$0xff] %v3312_v45  ;;  %528 = vmatpush.msra.mxu3 %v3396_v59  ;;  %489 = vmatpush.msra.mxu1 %v3408_v61 }
  0x36   : > { %6342 = vst [vmem:[#allocation37_spill] sm:$0xff] %v3319_v46  ;;  %509 = vmatpush.msra.mxu2 %v3415_v62  ;;  %v3480_v46 = vld [vmem:[%s6017_s1 + $0x2e8] sm:$0xff] }
  0x37   : > { %6343 = vst [vmem:[#allocation38_spill] sm:$0xff] %v3324_v47  ;;  %529 = vmatpush.msra.mxu3 %v3420_v63  ;;  %v3475_v47 = vld [vmem:[%s6017_s1 + $0x268] sm:$0xff] }
  0x38   : > { %6344 = vst [vmem:[#allocation39_spill] sm:$0xff] %v3331_v48 }
  0x39   : > { %6345 = vst [vmem:[#allocation40_spill] sm:$0xff] %v3336_v49 }
  0x3a   : > { %6346 = vst [vmem:[#allocation41_spill] sm:$0xff] %v3343_v50  ;;  %v3456_v50 = vld [vmem:[%s6017_s1 + $0x2f0] sm:$0xff] }
  0x3b   : > { %6347 = vst [vmem:[#allocation42_spill] sm:$0xff] %v3348_v51  ;;  %v3451_v51 = vld [vmem:[%s6017_s1 + $0x270] sm:$0xff] }
  0x3c   : > { %6348 = vst [vmem:[#allocation43_spill] sm:$0xff] %v3355_v52 }
  0x3d   : > { %6349 = vst [vmem:[#allocation44_spill] sm:$0xff] %v3360_v53 }
  0x3e   : > { %6350 = vst [vmem:[#allocation45_spill] sm:$0xff] %v3367_v54  ;;  %v3432_v54 = vld [vmem:[%s6017_s1 + $0x2f8] sm:$0xff] }
  0x3f   : > { %6351 = vst [vmem:[#allocation46_spill] sm:$0xff] %v3372_v55  ;;  %v3427_v55 = vld [vmem:[%s6017_s1 + $0x278] sm:$0xff]  ;;  %590 = vmatpush.msrb.mxu1 %v3432_v54 }
  0x40   : > { %6352 = vst [vmem:[#allocation47_spill] sm:$0xff] %v3379_v56  ;;  %553 = vmatpush.msrb.mxu0 %v3427_v55 }
  0x41   : > { %6353 = vst [vmem:[#allocation48_spill] sm:$0xff] %v3384_v57  ;;  %591 = vmatpush.msrb.mxu1 %v3456_v50 }
  0x42   : > { %6354 = vst [vmem:[#allocation49_spill] sm:$0xff] %v3391_v58  ;;  %v3439_v58 = vld [vmem:[%s6017_s1 + $0x378] sm:$0xff]  ;;  %554 = vmatpush.msrb.mxu0 %v3451_v51 }
  0x43   : > { %6355 = vst [vmem:[#allocation50_spill] sm:$0xff] %v3396_v59  ;;  %v3444_v59 = vld [vmem:[%s6017_s1 + $0x3f8] sm:$0xff]  ;;  %631 = vmatpush.msrb.mxu2 %v3439_v58  ;;  %592 = vmatpush.msrb.mxu1 %v3480_v46 }
  0x44   : > { %6356 = vst [vmem:[#allocation51_spill] sm:$0xff] %v3403_v60  ;;  %668 = vmatpush.msrb.mxu3 %v3444_v59  ;;  %555 = vmatpush.msrb.mxu0 %v3475_v47 }
  0x45   : > { %6357 = vst [vmem:[#allocation52_spill] sm:$0xff] %v3408_v61  ;;  %593 = vmatpush.msrb.mxu1 %v3504_v42 }
  0x46   : > { %6358 = vst [vmem:[#allocation53_spill] sm:$0xff] %v3415_v62  ;;  %v3463_v62 = vld [vmem:[%s6017_s1 + $0x370] sm:$0xff]  ;;  %556 = vmatpush.msrb.mxu0 %v3499_v43 }
  0x47   : > { %6359 = vst [vmem:[#allocation54_spill] sm:$0xff] %v3420_v63  ;;  %v3468_v63 = vld [vmem:[%s6017_s1 + $0x3f0] sm:$0xff]  ;;  %632 = vmatpush.msrb.mxu2 %v3463_v62  ;;  %594 = vmatpush.msrb.mxu1 %v3528_v38 }
  0x48   : > { %6360 = vst [vmem:[#allocation55_spill] sm:$0xff] %v3427_v55  ;;  %669 = vmatpush.msrb.mxu3 %v3468_v63  ;;  %557 = vmatpush.msrb.mxu0 %v3523_v39 }
  0x49   : > { %6361 = vst [vmem:[#allocation56_spill] sm:$0xff] %v3432_v54  ;;  %595 = vmatpush.msrb.mxu1 %v3552_v34 }
  0x4a   : > { %6362 = vst [vmem:[#allocation57_spill] sm:$0xff] %v3439_v58  ;;  %v3487_v58 = vld [vmem:[%s6017_s1 + $0x368] sm:$0xff]  ;;  %558 = vmatpush.msrb.mxu0 %v3547_v35 }
  0x4b   : > { %6363 = vst [vmem:[#allocation58_spill] sm:$0xff] %v3444_v59  ;;  %v3492_v59 = vld [vmem:[%s6017_s1 + $0x3e8] sm:$0xff]  ;;  %633 = vmatpush.msrb.mxu2 %v3487_v58  ;;  %596 = vmatpush.msrb.mxu1 %v3576_v30 }
  0x4c   : > { %6364 = vst [vmem:[#allocation59_spill] sm:$0xff] %v3451_v51  ;;  %670 = vmatpush.msrb.mxu3 %v3492_v59  ;;  %559 = vmatpush.msrb.mxu0 %v3571_v31 }
  0x4d   : > { %6365 = vst [vmem:[#allocation60_spill] sm:$0xff] %v3456_v50  ;;  %597 = vmatpush.msrb.mxu1 %v3601_v26 }
  0x4e   : > { %6366 = vst [vmem:[#allocation61_spill] sm:$0xff] %v3463_v62  ;;  %v3511_v62 = vld [vmem:[%s6017_s1 + $0x360] sm:$0xff]  ;;  %560 = vmatpush.msrb.mxu0 %v3596_v27 }
  0x4f   : > { %6367 = vst [vmem:[#allocation62_spill] sm:$0xff] %v3468_v63  ;;  %v3516_v63 = vld [vmem:[%s6017_s1 + $0x3e0] sm:$0xff]  ;;  %634 = vmatpush.msrb.mxu2 %v3511_v62 }
  0x50   : > { %6368 = vst [vmem:[#allocation63_spill] sm:$0xff] %v3475_v47  ;;  %671 = vmatpush.msrb.mxu3 %v3516_v63 }
  0x51   : > { %6369 = vst [vmem:[#allocation64_spill] sm:$0xff] %v3480_v46 }
  0x52   : > { %6370 = vst [vmem:[#allocation65_spill] sm:$0xff] %v3487_v58  ;;  %v3535_v58 = vld [vmem:[%s6017_s1 + $0x358] sm:$0xff] }
  0x53   : > { %6371 = vst [vmem:[#allocation66_spill] sm:$0xff] %v3492_v59  ;;  %v3540_v59 = vld [vmem:[%s6017_s1 + $0x3d8] sm:$0xff]  ;;  %635 = vmatpush.msrb.mxu2 %v3535_v58 }
  0x54   : > { %6372 = vst [vmem:[#allocation67_spill] sm:$0xff] %v3499_v43  ;;  %672 = vmatpush.msrb.mxu3 %v3540_v59 }
  0x55   : > { %6373 = vst [vmem:[#allocation68_spill] sm:$0xff] %v3504_v42 }
  0x56   : > { %6374 = vst [vmem:[#allocation69_spill] sm:$0xff] %v3511_v62  ;;  %v3559_v62 = vld [vmem:[%s6017_s1 + $0x350] sm:$0xff] }
  0x57   : > { %6375 = vst [vmem:[#allocation70_spill] sm:$0xff] %v3516_v63  ;;  %v3564_v63 = vld [vmem:[%s6017_s1 + $0x3d0] sm:$0xff]  ;;  %636 = vmatpush.msrb.mxu2 %v3559_v62 }
  0x58   : > { %6376 = vst [vmem:[#allocation71_spill] sm:$0xff] %v3523_v39  ;;  %673 = vmatpush.msrb.mxu3 %v3564_v63 }
  0x59   : > { %6377 = vst [vmem:[#allocation72_spill] sm:$0xff] %v3528_v38 }
  0x5a   : > { %6378 = vst [vmem:[#allocation73_spill] sm:$0xff] %v3535_v58  ;;  %v3589_v58 = vld [vmem:[%s6017_s1 + $0x3c8] sm:$0xff] }
  0x5b   : > { %6379 = vst [vmem:[#allocation74_spill] sm:$0xff] %v3540_v59  ;;  %v3584_v59 = vld [vmem:[%s6017_s1 + $0x348] sm:$0xff]  ;;  %674 = vmatpush.msrb.mxu3 %v3589_v58 }
  0x5c   : > { %6380 = vst [vmem:[#allocation75_spill] sm:$0xff] %v3547_v35  ;;  %637 = vmatpush.msrb.mxu2 %v3584_v59 }
  0x5d   : > { %6381 = vst [vmem:[#allocation76_spill] sm:$0xff] %v3552_v34  ;;  %v3647_v34 = vld [vmem:[%s6017_s1 + $0x230] sm:$0xff] }
  0x5e   : > { %6382 = vst [vmem:[#allocation77_spill] sm:$0xff] %v3559_v62  ;;  %v3608_v62 = vld [vmem:[%s6017_s1 + $0x340] sm:$0xff] }
  0x5f   : > { %6383 = vst [vmem:[#allocation78_spill] sm:$0xff] %v3564_v63  ;;  %v3613_v63 = vld [vmem:[%s6017_s1 + $0x3c0] sm:$0xff]  ;;  %638 = vmatpush.msrb.mxu2 %v3608_v62 }
  0x60   : > { %6384 = vst [vmem:[#allocation79_spill] sm:$0xff] %v3571_v31  ;;  %v3620_v31 = vld [vmem:[%s6017_s1 + $0x238] sm:$0xff]  ;;  %675 = vmatpush.msrb.mxu3 %v3613_v63 }
  0x61   : > { %6385 = vst [vmem:[#allocation80_spill] sm:$0xff] %v3576_v30  ;;  %v3625_v30 = vld [vmem:[%s6017_s1 + $0x2b8] sm:$0xff]  ;;  %561 = vmatpush.msrb.mxu0 %v3620_v31 }
  0x62   : > { %6386 = vst [vmem:[#allocation81_spill] sm:$0xff] %v3584_v59  ;;  %v3642_v59 = vld [vmem:[%s6017_s1 + $0x3b8] sm:$0xff]  ;;  %598 = vmatpush.msrb.mxu1 %v3625_v30 }
  0x63   : > { %6387 = vst [vmem:[#allocation82_spill] sm:$0xff] %v3589_v58  ;;  %v3637_v58 = vld [vmem:[%s6017_s1 + $0x338] sm:$0xff]  ;;  %676 = vmatpush.msrb.mxu3 %v3642_v59  ;;  %562 = vmatpush.msrb.mxu0 %v3647_v34 }
  0x64   : > { %6388 = vst [vmem:[#allocation83_spill] sm:$0xff] %v3596_v27  ;;  %v3661_v27 = vld [vmem:[%s6017_s1 + $0x330] sm:$0xff]  ;;  %639 = vmatpush.msrb.mxu2 %v3637_v58 }
  0x65   : > { %6389 = vst [vmem:[#allocation84_spill] sm:$0xff] %v3601_v26  ;;  %v3654_v26 = vld [vmem:[%s6017_s1 + $0x2b0] sm:$0xff] }
  0x66   : > { %6390 = vst [vmem:[#allocation85_spill] sm:$0xff] %v3608_v62  ;;  %v3666_v62 = vld [vmem:[%s6017_s1 + $0x3b0] sm:$0xff]  ;;  %599 = vmatpush.msrb.mxu1 %v3654_v26  ;;  %640 = vmatpush.msrb.mxu2 %v3661_v27 }
  0x67   : > { %6391 = vst [vmem:[#allocation86_spill] sm:$0xff] %v3613_v63  ;;  %v3673_v63 = vld [vmem:[%s6017_s1 + $0x228] sm:$0xff]  ;;  %677 = vmatpush.msrb.mxu3 %v3666_v62 }
  0x68   : > { %6392 = vst [vmem:[#allocation87_spill] sm:$0xff] %v3620_v31  ;;  %563 = vmatpush.msrb.mxu0 %v3673_v63  ;;  %v384_v31 = vld [vmem:[%s3720_s16] sm:$0x7f] }
  0x69   : > { %6393 = vst [vmem:[#allocation88_spill] sm:$0xff] %v3625_v30  ;;  %v3678_v30 = vld [vmem:[%s6017_s1 + $0x2a8] sm:$0xff]  ;;  %510 = vmatmul.f32.vlgmr.msra.gmra.mxu2 %v384_v31  ;;  %530 = vmatmul.f32.vlgmr.msra.gmra.mxu3 %v384_v31 }
  0x6a   : > { %6394 = vst [vmem:[#allocation89_spill] sm:$0xff] %v3637_v58  ;;  %v3686_v58 = vld [vmem:[%s6017_s1 + $0x328] sm:$0xff]  ;;  %600 = vmatpush.msrb.mxu1 %v3678_v30 }
  0x6b   : > { %6395 = vst [vmem:[#allocation90_spill] sm:$0xff] %v3642_v59  ;;  %v3691_v59 = vld [vmem:[%s6017_s1 + $0x3a8] sm:$0xff]  ;;  %641 = vmatpush.msrb.mxu2 %v3686_v58 }
  0x6c   : > { %6396 = vst [vmem:[#allocation91_spill] sm:$0xff] %v3647_v34  ;;  %v3698_v34 = vld [vmem:[%s6017_s1 + $0x220] sm:$0xff]  ;;  %678 = vmatpush.msrb.mxu3 %v3691_v59  ;;  %v3793_v31 = vld [vmem:[%s6017_s1 + $0x388] sm:$0xff] }
  0x6d   : > { %6397 = vst [vmem:[#allocation92_spill] sm:$0xff] %v3654_v26  ;;  %v3703_v26 = vld [vmem:[%s6017_s1 + $0x2a0] sm:$0xff]  ;;  %564 = vmatpush.msrb.mxu0 %v3698_v34 }
  0x6e   : > { %6398 = vst [vmem:[#allocation93_spill] sm:$0xff] %v3661_v27  ;;  %v3710_v27 = vld [vmem:[%s6017_s1 + $0x320] sm:$0xff]  ;;  %601 = vmatpush.msrb.mxu1 %v3703_v26 }
  0x6f   : > { %6399 = vst [vmem:[#allocation94_spill] sm:$0xff] %v3666_v62  ;;  %v3715_v62 = vld [vmem:[%s6017_s1 + $0x3a0] sm:$0xff]  ;;  %642 = vmatpush.msrb.mxu2 %v3710_v27 }
  0x70   : > { %6400 = vst [vmem:[#allocation95_spill] sm:$0xff] %v3673_v63  ;;  %v3732_v63 = vld [vmem:[%s6017_s1 + $0x298] sm:$0xff]  ;;  %679 = vmatpush.msrb.mxu3 %v3715_v62 }
  0x71   : > { %6401 = vst [vmem:[#allocation96_spill] sm:$0xff] %v3678_v30  ;;  %v3727_v30 = vld [vmem:[%s6017_s1 + $0x218] sm:$0xff]  ;;  %602 = vmatpush.msrb.mxu1 %v3732_v63 }
  0x72   : > { %6402 = vst [vmem:[#allocation97_spill] sm:$0xff] %v3686_v58  ;;  %v3739_v58 = vld [vmem:[%s6017_s1 + $0x318] sm:$0xff]  ;;  %565 = vmatpush.msrb.mxu0 %v3727_v30 }
  0x73   : > { %6403 = vst [vmem:[#allocation98_spill] sm:$0xff] %v3691_v59  ;;  %v3744_v59 = vld [vmem:[%s6017_s1 + $0x398] sm:$0xff]  ;;  %643 = vmatpush.msrb.mxu2 %v3739_v58 }
  0x74   : > { %6404 = vst [vmem:[#allocation99_spill] sm:$0xff] %v3698_v34  ;;  %v3759_v34 = vld [vmem:[%s6017_s1 + $0x290] sm:$0xff]  ;;  %680 = vmatpush.msrb.mxu3 %v3744_v59 }
  0x75   : > { %6405 = vst [vmem:[#allocation100_spill] sm:$0xff] %v3703_v26  ;;  %v3754_v26 = vld [vmem:[%s6017_s1 + $0x210] sm:$0xff]  ;;  %603 = vmatpush.msrb.mxu1 %v3759_v34 }
  0x76   : > { %6406 = vst [vmem:[#allocation101_spill] sm:$0xff] %v3710_v27  ;;  %v3771_v27 = vld [vmem:[%s6017_s1 + $0x390] sm:$0xff]  ;;  %566 = vmatpush.msrb.mxu0 %v3754_v26 }
  0x77   : > { %6407 = vst [vmem:[#allocation102_spill] sm:$0xff] %v3715_v62  ;;  %v3766_v62 = vld [vmem:[%s6017_s1 + $0x310] sm:$0xff]  ;;  %681 = vmatpush.msrb.mxu3 %v3771_v27 }
  0x78   : > { %6409 = vst [vmem:[#allocation103_spill] sm:$0xff] %v3727_v30  ;;  %644 = vmatpush.msrb.mxu2 %v3766_v62  ;;  %v3798_v30 = vld [vmem:[%s3720_s16 + $0x8] sm:$0x7f] }
  0x79   : > { %6410 = vst [vmem:[#allocation104_spill] sm:$0xff] %v3732_v63  ;;  %v3776_v63 = vld [vmem:[%s6017_s1 + $0x208] sm:$0xff]  ;;  %682 = vmatpush.msrb.mxu3 %v3793_v31  ;;  %453 = vmatmul.f32.vlgmr.msra.gmra.mxu0 %v3798_v30 }
  0x7a   : > { %6411 = vst [vmem:[#allocation105_spill] sm:$0xff] %v3739_v58  ;;  %v3788_v58 = vld [vmem:[%s6017_s1 + $0x308] sm:$0xff]  ;;  %567 = vmatpush.msrb.mxu0 %v3776_v63  ;;  %490 = vmatmul.f32.vlgmr.msra.gmra.mxu1 %v3798_v30 }
  0x7b   : > { %6412 = vst [vmem:[#allocation106_spill] sm:$0xff] %v3744_v59  ;;  %v3781_v59 = vld [vmem:[%s6017_s1 + $0x288] sm:$0xff]  ;;  %645 = vmatpush.msrb.mxu2 %v3788_v58 }
  0x7c   : > { %6413 = vst [vmem:[#allocation107_spill] sm:$0xff] %v3754_v26  ;;  %604 = vmatpush.msrb.mxu1 %v3781_v59  ;;  %v3810_v26 = vld [vmem:[%s6017_s1 + $0x280] sm:$0xff] }
  0x7d   : > { %6414 = vst [vmem:[#allocation108_spill] sm:$0xff] %v3759_v34  ;;  %v3805_v34 = vld [vmem:[%s6017_s1 + $0x200] sm:$0xff] }
  0x7e   : > { %6415 = vst [vmem:[#allocation109_spill] sm:$0xff] %v3766_v62  ;;  %v3822_v62 = vld [vmem:[%s6017_s1 + $0x380] sm:$0xff]  ;;  %568 = vmatpush.msrb.mxu0 %v3805_v34  ;;  %605 = vmatpush.msrb.mxu1 %v3810_v26 }
  0x7f   : > { %6416 = vst [vmem:[#allocation110_spill] sm:$0xff] %v3771_v27  ;;  %v3817_v27 = vld [vmem:[%s6017_s1 + $0x300] sm:$0xff]  ;;  %683 = vmatpush.msrb.mxu3 %v3822_v62 }
  0x80   : > { %6417 = vst [vmem:[#allocation111_spill] sm:$0xff] %v3776_v63  ;;  %646 = vmatpush.msrb.mxu2 %v3817_v27 }
  0x81   : > { %6418 = vst [vmem:[#allocation112_spill] sm:$0xff] %v3781_v59  ;;  %v3848_v59 = vld [vmem:[%s6017_s1 + $0x470] sm:$0xff]  ;;  %793 = vmatpush.msra.mxu3 %v3052_v1  ;;  %v3881_v1 = vld [vmem:[%s6017_s1 + $0x460] sm:$0xff] }
  0x82   : > { %6419 = vst [vmem:[#allocation113_spill] sm:$0xff] %v3788_v58  ;;  %v3829_v58 = vld [vmem:[%s6017_s1 + $0x478] sm:$0xff]  ;;  %773 = vmatpush.msra.mxu2 %v3047_v0  ;;  %v3874_v0 = vld [vmem:[%s3720_s16 + $0x10] sm:$0x7f] }
  0x83   : > { %6420 = vst [vmem:[#allocation114_spill] sm:$0xff] %v3793_v31  ;;  %v3834_v31 = vld [vmem:[%s6017_s1 + $0x4f8] sm:$0xff]  ;;  %708 = vmatpush.msra.mxu0 %v3829_v58  ;;  %794 = vmatpush.msra.mxu3 %v3074_v5 }
  0x84   : > { %6421 = vst [vmem:[#allocation115_spill] sm:$0xff] %v3798_v30  ;;  %v3841_v30 = vld [vmem:[%s3720_s16 + $0x18] sm:$0x7f]  ;;  %745 = vmatpush.msra.mxu1 %v3834_v31  ;;  %774 = vmatpush.msra.mxu2 %v3069_v4 }
  0x85   : > { %6422 = vst [vmem:[#allocation116_spill] sm:$0xff] %v3805_v34  ;;  %647 = vmatmul.f32.vlgmr.msrb.gmra.mxu2 %v3841_v30  ;;  %684 = vmatmul.f32.vlgmr.msrb.gmra.mxu3 %v3841_v30  ;;  %v3895_v5 = vld [vmem:[%s6017_s1 + $0x458] sm:$0xff] }
  0x86   : > { %6423 = vst [vmem:[#allocation117_spill] sm:$0xff] %v3810_v26  ;;  %v3853_v26 = vld [vmem:[%s6017_s1 + $0x4f0] sm:$0xff]  ;;  %709 = vmatpush.msra.mxu0 %v3848_v59  ;;  %775 = vmatpush.msra.mxu2 %v3091_v8  ;;  %v3900_v4 = vld [vmem:[%s6017_s1 + $0x4d8] sm:$0xff] }
  0x87   : > { %6424 = vst [vmem:[#allocation118_spill] sm:$0xff] %v3817_v27  ;;  %v3867_v27 = vld [vmem:[%s6017_s1 + $0x4e8] sm:$0xff]  ;;  %746 = vmatpush.msra.mxu1 %v3853_v26  ;;  %795 = vmatpush.msra.mxu3 %v3098_v9  ;;  %v3909_v9 = vld [vmem:[%s6017_s1 + $0x450] sm:$0xff] }
  0x88   : > { %6425 = vst [vmem:[#allocation119_spill] sm:$0xff] %v3822_v62  ;;  %v3862_v62 = vld [vmem:[%s6017_s1 + $0x468] sm:$0xff]  ;;  %569 = vmatmul.f32.vlgmr.msrb.gmra.mxu0 %v3874_v0  ;;  %606 = vmatmul.f32.vlgmr.msrb.gmra.mxu1 %v3874_v0  ;;  %v3914_v8 = vld [vmem:[%s6017_s1 + $0x4d0] sm:$0xff] }
  0x89   : > { %6426 = vst [vmem:[#allocation120_spill] sm:$0xff] %v3829_v58  ;;  %710 = vmatpush.msra.mxu0 %v3862_v62  ;;  %747 = vmatpush.msra.mxu1 %v3867_v27 }
  0x8a   : > { %6427 = vst [vmem:[#allocation121_spill] sm:$0xff] %v3834_v31  ;;  %776 = vmatpush.msra.mxu2 %v3115_v12  ;;  %796 = vmatpush.msra.mxu3 %v3120_v13  ;;  %v3923_v13 = vld [vmem:[%s6017_s1 + $0x448] sm:$0xff] }
  0x8b   : > { %6428 = vst [vmem:[#allocation122_spill] sm:$0xff] %v3841_v30  ;;  %711 = vmatpush.msra.mxu0 %v3881_v1  ;;  %v3928_v12 = vld [vmem:[%s6017_s1 + $0x4c8] sm:$0xff] }
  0x8c   : > { %6429 = vst [vmem:[#allocation123_spill] sm:$0xff] %v3848_v59  ;;  %v3886_v59 = vld [vmem:[%s6017_s1 + $0x4e0] sm:$0xff]  ;;  %777 = vmatpush.msra.mxu2 %v3139_v16  ;;  %797 = vmatpush.msra.mxu3 %v3144_v17 }
  0x8d   : > { %6430 = vst [vmem:[#allocation124_spill] sm:$0xff] %v3853_v26  ;;  %748 = vmatpush.msra.mxu1 %v3886_v59  ;;  %712 = vmatpush.msra.mxu0 %v3895_v5  ;;  %v3937_v17 = vld [vmem:[%s6017_s1 + $0x440] sm:$0xff] }
  0x8e   : > { %6431 = vst [vmem:[#allocation125_spill] sm:$0xff] %v3862_v62  ;;  %778 = vmatpush.msra.mxu2 %v3163_v20  ;;  %798 = vmatpush.msra.mxu3 %v3168_v21  ;;  %v3942_v16 = vld [vmem:[%s6017_s1 + $0x4c0] sm:$0xff]  ;;  %v3951_v21 = vld [vmem:[%s6017_s1 + $0x438] sm:$0xff] }
  0x8f   : > { %6432 = vst [vmem:[#allocation126_spill] sm:$0xff] %v3867_v27  ;;  %749 = vmatpush.msra.mxu1 %v3900_v4  ;;  %713 = vmatpush.msra.mxu0 %v3909_v9  ;;  %v3956_v20 = vld [vmem:[%s6017_s1 + $0x4b8] sm:$0xff] }
  0x90   : > { %6433 = vst [vmem:[#allocation127_spill] sm:$0xff] %v3874_v0  ;;  %779 = vmatpush.msra.mxu2 %v3187_v24  ;;  %799 = vmatpush.msra.mxu3 %v3192_v25  ;;  %v3965_v25 = vld [vmem:[%s6017_s1 + $0x430] sm:$0xff] }
  0x91   : > { %6434 = vst [vmem:[#allocation128_spill] sm:$0xff] %v3881_v1  ;;  %750 = vmatpush.msra.mxu1 %v3914_v8  ;;  %714 = vmatpush.msra.mxu0 %v3923_v13  ;;  %v3970_v24 = vld [vmem:[%s6017_s1 + $0x4b0] sm:$0xff] }
  0x92   : > { %6435 = vst [vmem:[#allocation129_spill] sm:$0xff] %v3886_v59  ;;  %780 = vmatpush.msra.mxu2 %v3211_v28  ;;  %800 = vmatpush.msra.mxu3 %v3216_v29  ;;  %v3979_v29 = vld [vmem:[%s6017_s1 + $0x428] sm:$0xff] }
  0x93   : > { %6436 = vst [vmem:[#allocation130_spill] sm:$0xff] %v3895_v5  ;;  %751 = vmatpush.msra.mxu1 %v3928_v12  ;;  %715 = vmatpush.msra.mxu0 %v3937_v17  ;;  %v3984_v28 = vld [vmem:[%s6017_s1 + $0x4a8] sm:$0xff] }
  0x94   : > { %6437 = vst [vmem:[#allocation131_spill] sm:$0xff] %v3900_v4  ;;  %781 = vmatpush.msra.mxu2 %v3235_v32  ;;  %801 = vmatpush.msra.mxu3 %v3240_v33  ;;  %v3993_v33 = vld [vmem:[%s6017_s1 + $0x420] sm:$0xff] }
  0x95   : > { %6438 = vst [vmem:[#allocation132_spill] sm:$0xff] %v3909_v9  ;;  %752 = vmatpush.msra.mxu1 %v3942_v16  ;;  %716 = vmatpush.msra.mxu0 %v3951_v21  ;;  %v3998_v32 = vld [vmem:[%s6017_s1 + $0x4a0] sm:$0xff] }
  0x96   : > { %6439 = vst [vmem:[#allocation133_spill] sm:$0xff] %v3914_v8  ;;  %782 = vmatpush.msra.mxu2 %v3259_v36  ;;  %802 = vmatpush.msra.mxu3 %v3264_v37  ;;  %v4007_v37 = vld [vmem:[%s6017_s1 + $0x418] sm:$0xff] }
  0x97   : > { %6440 = vst [vmem:[#allocation134_spill] sm:$0xff] %v3923_v13  ;;  %753 = vmatpush.msra.mxu1 %v3956_v20  ;;  %717 = vmatpush.msra.mxu0 %v3965_v25  ;;  %v4012_v36 = vld [vmem:[%s6017_s1 + $0x498] sm:$0xff] }
  0x98   : > { %6441 = vst [vmem:[#allocation135_spill] sm:$0xff] %v3928_v12  ;;  %783 = vmatpush.msra.mxu2 %v3283_v40  ;;  %803 = vmatpush.msra.mxu3 %v3288_v41  ;;  %v4021_v41 = vld [vmem:[%s6017_s1 + $0x410] sm:$0xff] }
  0x99   : > { %6442 = vst [vmem:[#allocation136_spill] sm:$0xff] %v3937_v17  ;;  %754 = vmatpush.msra.mxu1 %v3970_v24  ;;  %718 = vmatpush.msra.mxu0 %v3979_v29  ;;  %v4026_v40 = vld [vmem:[%s6017_s1 + $0x490] sm:$0xff] }
  0x9a   : > { %6443 = vst [vmem:[#allocation137_spill] sm:$0xff] %v3942_v16  ;;  %784 = vmatpush.msra.mxu2 %v3307_v44  ;;  %804 = vmatpush.msra.mxu3 %v3312_v45  ;;  %v4035_v45 = vld [vmem:[%s6017_s1 + $0x408] sm:$0xff] }
  0x9b   : > { %6444 = vst [vmem:[#allocation138_spill] sm:$0xff] %v3951_v21  ;;  %755 = vmatpush.msra.mxu1 %v3984_v28  ;;  %719 = vmatpush.msra.mxu0 %v3993_v33  ;;  %v4040_v44 = vld [vmem:[%s6017_s1 + $0x488] sm:$0xff] }
  0x9c   : > { %6445 = vst [vmem:[#allocation139_spill] sm:$0xff] %v3956_v20  ;;  %785 = vmatpush.msra.mxu2 %v3331_v48  ;;  %805 = vmatpush.msra.mxu3 %v3336_v49  ;;  %v4049_v49 = vld [vmem:[%s6017_s1 + $0x400] sm:$0xff] }
  0x9d   : > { %6446 = vst [vmem:[#allocation140_spill] sm:$0xff] %v3965_v25  ;;  %756 = vmatpush.msra.mxu1 %v3998_v32  ;;  %720 = vmatpush.msra.mxu0 %v4007_v37  ;;  %v4054_v48 = vld [vmem:[%s6017_s1 + $0x480] sm:$0xff] }
  0x9e   : > { %6447 = vst [vmem:[#allocation141_spill] sm:$0xff] %v3970_v24  ;;  %786 = vmatpush.msra.mxu2 %v3355_v52  ;;  %806 = vmatpush.msra.mxu3 %v3360_v53  ;;  %v4061_v52 = vld [vmem:[%s3720_s16 + $0x1] sm:$0x7f] }
  0x9f   : > { %6448 = vst [vmem:[#allocation142_spill] sm:$0xff] %v3979_v29  ;;  %757 = vmatpush.msra.mxu1 %v4012_v36  ;;  %721 = vmatpush.msra.mxu0 %v4021_v41  ;;  %v6482_v53 = vld [vmem:[#allocation37_spill] sm:$0xff] }
  0xa0   : > { %6449 = vst [vmem:[#allocation143_spill] sm:$0xff] %v3984_v28  ;;  %787 = vmatpush.msra.mxu2 %v3379_v56  ;;  %807 = vmatpush.msra.mxu3 %v3384_v57  ;;  %v6478_v57 = vld [vmem:[#allocation33_spill] sm:$0xff]  ;;  %v6481_v56 = vld [vmem:[#allocation96_spill] sm:$0xff] }
  0xa1   : > { %6450 = vst [vmem:[#allocation144_spill] sm:$0xff] %v3993_v33  ;;  %758 = vmatpush.msra.mxu1 %v4026_v40  ;;  %722 = vmatpush.msra.mxu0 %v4035_v45 }
  0xa2   : > { %6451 = vst [vmem:[#allocation145_spill] sm:$0xff] %v3998_v32  ;;  %788 = vmatpush.msra.mxu2 %v3403_v60  ;;  %808 = vmatpush.msra.mxu3 %v3408_v61  ;;  %v6474_v61 = vld [vmem:[#allocation29_spill] sm:$0xff]  ;;  %v6477_v60 = vld [vmem:[#allocation92_spill] sm:$0xff] }
  0xa3   : > { %6452 = vst [vmem:[#allocation146_spill] sm:$0xff] %v4007_v37  ;;  %759 = vmatpush.msra.mxu1 %v4040_v44  ;;  %723 = vmatpush.msra.mxu0 %v4049_v49 }
  0xa4   : > { %6453 = vst [vmem:[#allocation147_spill] sm:$0xff] %v4012_v36  ;;  %724 = vmatmul.f32.vlgmr.msra.gmra.mxu0 %v4061_v52  ;;  %853 = vmatpush.msrb.mxu2 %v3427_v55  ;;  %v6473_v55 = vld [vmem:[#allocation88_spill] sm:$0xff] }
  0xa5   : > { %6454 = vst [vmem:[#allocation148_spill] sm:$0xff] %v4021_v41  ;;  %760 = vmatpush.msra.mxu1 %v4054_v48  ;;  %813 = vmatpush.msrb.mxu0 %v3057_v2  ;;  %v6461_v2 = vld [vmem:[#allocation76_spill] sm:$0xff] }
  0xa6   : > { %6455 = vst [vmem:[#allocation149_spill] sm:$0xff] %v4026_v40  ;;  %761 = vmatmul.f32.vlgmr.msra.gmra.mxu1 %v4061_v52  ;;  %873 = vmatpush.msrb.mxu3 %v3432_v54  ;;  %v6470_v54 = vld [vmem:[#allocation25_spill] sm:$0xff] }
  0xa7   : > { %6456 = vst [vmem:[#allocation150_spill] sm:$0xff] %v4035_v45  ;;  %833 = vmatpush.msrb.mxu1 %v3064_v3  ;;  %814 = vmatpush.msrb.mxu0 %v3081_v6 }
  0xa8   : > { %6457 = vst [vmem:[#allocation151_spill] sm:$0xff] %v4040_v44  ;;  %854 = vmatpush.msrb.mxu2 %v3451_v51  ;;  %874 = vmatpush.msrb.mxu3 %v3456_v50  ;;  %v6466_v50 = vld [vmem:[#allocation21_spill] sm:$0xff]  ;;  %v6469_v51 = vld [vmem:[#allocation84_spill] sm:$0xff] }
  0xa9   : > { %6458 = vst [vmem:[#allocation152_spill] sm:$0xff] %v4049_v49  ;;  %834 = vmatpush.msrb.mxu1 %v3086_v7  ;;  %815 = vmatpush.msrb.mxu0 %v3103_v10 }
  0xaa   : > { %6459 = vst [vmem:[#allocation153_spill] sm:$0xff] %v4054_v48  ;;  %855 = vmatpush.msrb.mxu2 %v3475_v47  ;;  %875 = vmatpush.msrb.mxu3 %v3480_v46  ;;  %v6462_v46 = vld [vmem:[#allocation17_spill] sm:$0xff]  ;;  %v6465_v47 = vld [vmem:[#allocation80_spill] sm:$0xff] }
  0xab   : > { %6460 = vst [vmem:[#allocation154_spill] sm:$0xff] %v4061_v52  ;;  %835 = vmatpush.msrb.mxu1 %v3108_v11  ;;  %816 = vmatpush.msrb.mxu0 %v3127_v14 }
  0xac   : > { %856 = vmatpush.msrb.mxu2 %v3499_v43  ;;  %876 = vmatpush.msrb.mxu3 %v3504_v42  ;;  %v6463_v43 = vld [vmem:[#allocation18_spill] sm:$0xff]  ;;  %v6464_v42 = vld [vmem:[#allocation79_spill] sm:$0xff] }
  0xad   : > { %836 = vmatpush.msrb.mxu1 %v3132_v15  ;;  %817 = vmatpush.msrb.mxu0 %v3151_v18 }
  0xae   : > { %857 = vmatpush.msrb.mxu2 %v3523_v39  ;;  %877 = vmatpush.msrb.mxu3 %v3528_v38  ;;  %v6467_v39 = vld [vmem:[#allocation22_spill] sm:$0xff]  ;;  %v6468_v38 = vld [vmem:[#allocation83_spill] sm:$0xff] }
  0xaf   : > { %837 = vmatpush.msrb.mxu1 %v3156_v19  ;;  %818 = vmatpush.msrb.mxu0 %v3175_v22 }
  0xb0   : > { %858 = vmatpush.msrb.mxu2 %v3547_v35  ;;  %878 = vmatpush.msrb.mxu3 %v6461_v2  ;;  %v6471_v35 = vld [vmem:[#allocation26_spill] sm:$0xff]  ;;  %v6472_v2 = vld [vmem:[#allocation87_spill] sm:$0xff] }
  0xb1   : > { %838 = vmatpush.msrb.mxu1 %v3180_v23  ;;  %819 = vmatpush.msrb.mxu0 %v6462_v46 }
  0xb2   : > { %859 = vmatpush.msrb.mxu2 %v6464_v42  ;;  %879 = vmatpush.msrb.mxu3 %v6465_v47  ;;  %v6475_v42 = vld [vmem:[#allocation30_spill] sm:$0xff]  ;;  %v6476_v47 = vld [vmem:[#allocation91_spill] sm:$0xff] }
  0xb3   : > { %839 = vmatpush.msrb.mxu1 %v6463_v43  ;;  %820 = vmatpush.msrb.mxu0 %v6466_v50 }
  0xb4   : > { %860 = vmatpush.msrb.mxu2 %v6468_v38  ;;  %880 = vmatpush.msrb.mxu3 %v6469_v51  ;;  %v6479_v38 = vld [vmem:[#allocation34_spill] sm:$0xff]  ;;  %v6480_v51 = vld [vmem:[#allocation95_spill] sm:$0xff] }
  0xb5   : > { %840 = vmatpush.msrb.mxu1 %v6467_v39  ;;  %821 = vmatpush.msrb.mxu0 %v6470_v54 }
  0xb6   : > { %861 = vmatpush.msrb.mxu2 %v6472_v2  ;;  %881 = vmatpush.msrb.mxu3 %v6473_v55  ;;  %v6483_v2 = vld [vmem:[#allocation38_spill] sm:$0xff]  ;;  %v6484_v55 = vld [vmem:[#allocation99_spill] sm:$0xff] }
  0xb7   : > { %841 = vmatpush.msrb.mxu1 %v6471_v35  ;;  %822 = vmatpush.msrb.mxu0 %v6474_v61  ;;  %v6485_v61 = vld [vmem:[#allocation100_spill] sm:$0xff] }
  0xb8   : > { %862 = vmatpush.msrb.mxu2 %v6476_v47  ;;  %882 = vmatpush.msrb.mxu3 %v6477_v60  ;;  %v6487_v47 = vld [vmem:[#allocation42_spill] sm:$0xff]  ;;  %v6488_v60 = vld [vmem:[#allocation103_spill] sm:$0xff] }
  0xb9   : > { %842 = vmatpush.msrb.mxu1 %v6475_v42  ;;  %823 = vmatpush.msrb.mxu0 %v6478_v57  ;;  %v6486_v42 = vld [vmem:[#allocation41_spill] sm:$0xff]  ;;  %v6489_v57 = vld [vmem:[#allocation104_spill] sm:$0xff] }
  0xba   : > { %863 = vmatpush.msrb.mxu2 %v6480_v51  ;;  %883 = vmatpush.msrb.mxu3 %v6481_v56  ;;  %v6490_v56 = vld [vmem:[#allocation45_spill] sm:$0xff]  ;;  %v6491_v51 = vld [vmem:[#allocation46_spill] sm:$0xff] }
  0xbb   : > { %843 = vmatpush.msrb.mxu1 %v6479_v38  ;;  %824 = vmatpush.msrb.mxu0 %v6482_v53 }
  0xbc   : > { %864 = vmatpush.msrb.mxu2 %v6484_v55  ;;  %884 = vmatpush.msrb.mxu3 %v6485_v61  ;;  %v6493_v55 = vld [vmem:[#allocation108_spill] sm:$0xff]  ;;  %v6494_v61 = vld [vmem:[#allocation49_spill] sm:$0xff] }
  0xbd   : > { %844 = vmatpush.msrb.mxu1 %v6483_v2  ;;  %825 = vmatpush.msrb.mxu0 %v6486_v42  ;;  %v6492_v2 = vld [vmem:[#allocation107_spill] sm:$0xff]  ;;  %v6495_v42 = vld [vmem:[#allocation50_spill] sm:$0xff] }
  0xbe   : > { %865 = vmatpush.msrb.mxu2 %v6488_v60  ;;  %885 = vmatpush.msrb.mxu3 %v6489_v57  ;;  %v6496_v60 = vld [vmem:[#allocation112_spill] sm:$0xff]  ;;  %v6497_v57 = vld [vmem:[#allocation53_spill] sm:$0xff] }
  0xbf   : > { %845 = vmatpush.msrb.mxu1 %v6487_v47  ;;  %789 = vmatmul.f32.vlgmr.msra.gmra.mxu2 %v3874_v0  ;;  %v6498_v47 = vld [vmem:[#allocation54_spill] sm:$0xff] }
  0xc0   : > { %809 = vmatmul.f32.vlgmr.msra.gmra.mxu3 %v3874_v0  ;;  %826 = vmatpush.msrb.mxu0 %v6490_v56  ;;  %v6499_v0 = vld [vmem:[#allocation117_spill] sm:$0xff] }
  0xc1   : > { %846 = vmatpush.msrb.mxu1 %v6491_v51  ;;  %866 = vmatpush.msrb.mxu2 %v6492_v2  ;;  %v6500_v51 = vld [vmem:[#allocation57_spill] sm:$0xff]  ;;  %v6501_v2 = vld [vmem:[#allocation58_spill] sm:$0xff] }
  0xc2   : > { %886 = vmatpush.msrb.mxu3 %v6493_v55  ;;  %827 = vmatpush.msrb.mxu0 %v6494_v61  ;;  %v6504_v55 = vld [vmem:[#allocation123_spill] sm:$0xff] }
  0xc3   : > { %847 = vmatpush.msrb.mxu1 %v6495_v42  ;;  %867 = vmatpush.msrb.mxu2 %v3776_v63  ;;  %v6503_v63 = vld [vmem:[#allocation62_spill] sm:$0xff] }
  0xc4   : > { %887 = vmatpush.msrb.mxu3 %v6496_v60  ;;  %828 = vmatpush.msrb.mxu0 %v6497_v57  ;;  %v6502_v60 = vld [vmem:[#allocation61_spill] sm:$0xff] }
  0xc5   : > { %848 = vmatpush.msrb.mxu1 %v6498_v47  ;;  %868 = vmatpush.msrb.mxu2 %v3805_v34  ;;  %v6506_v34 = vld [vmem:[#allocation66_spill] sm:$0xff] }
  0xc6   : > { %888 = vmatpush.msrb.mxu3 %v6499_v0  ;;  %895 = vmatpush.msra.mxu0 %v6500_v51  ;;  %v6505_v0 = vld [vmem:[#allocation65_spill] sm:$0xff] }
  0xc7   : > { %915 = vmatpush.msra.mxu1 %v6501_v2  ;;  %938 = vmatpush.msra.mxu2 %v3829_v58  ;;  %v6508_v58 = vld [vmem:[#allocation69_spill] sm:$0xff] }
  0xc8   : > { %958 = vmatpush.msra.mxu3 %v3834_v31  ;;  %869 = vmatmul.f32.vlgmr.msrb.gmra.mxu2 %v3841_v30  ;;  %v6507_v31 = vld [vmem:[#allocation115_spill] sm:$0xff] }
  0xc9   : > { %889 = vmatmul.f32.vlgmr.msrb.gmra.mxu3 %v3841_v30  ;;  %896 = vmatpush.msra.mxu0 %v6502_v60  ;;  %v6509_v30 = vld [vmem:[#allocation70_spill] sm:$0xff] }
  0xca   : > { %916 = vmatpush.msra.mxu1 %v6503_v63  ;;  %939 = vmatpush.msra.mxu2 %v6504_v55  ;;  %v6511_v55 = vld [vmem:[#allocation74_spill] sm:$0xff] }
  0xcb   : > { %959 = vmatpush.msra.mxu3 %v3853_v26  ;;  %897 = vmatpush.msra.mxu0 %v6505_v0  ;;  %v6510_v26 = vld [vmem:[#allocation73_spill] sm:$0xff] }
  0xcc   : > { %917 = vmatpush.msra.mxu1 %v6506_v34  ;;  %940 = vmatpush.msra.mxu2 %v3862_v62  ;;  %v6513_v62 = vld [vmem:[#allocation78_spill] sm:$0xff] }
  0xcd   : > { %960 = vmatpush.msra.mxu3 %v3867_v27  ;;  %829 = vmatmul.f32.vlgmr.msrb.gmra.mxu0 %v6507_v31  ;;  %v6512_v27 = vld [vmem:[#allocation77_spill] sm:$0xff] }
  0xce   : > { %849 = vmatmul.f32.vlgmr.msrb.gmra.mxu1 %v6507_v31  ;;  %898 = vmatpush.msra.mxu0 %v6508_v58  ;;  %v6514_v31 = vld [vmem:[#allocation81_spill] sm:$0xff] }
  0xcf   : > { %918 = vmatpush.msra.mxu1 %v6509_v30  ;;  %941 = vmatpush.msra.mxu2 %v3881_v1  ;;  %v6515_v1 = vld [vmem:[#allocation82_spill] sm:$0xff] }
  0xd0   : > { %961 = vmatpush.msra.mxu3 %v3886_v59  ;;  %899 = vmatpush.msra.mxu0 %v6510_v26  ;;  %v6516_v59 = vld [vmem:[#allocation85_spill] sm:$0xff] }
  0xd1   : > { %919 = vmatpush.msra.mxu1 %v6511_v55  ;;  %942 = vmatpush.msra.mxu2 %v3895_v5  ;;  %v6517_v5 = vld [vmem:[#allocation86_spill] sm:$0xff] }
  0xd2   : > { %962 = vmatpush.msra.mxu3 %v3900_v4  ;;  %900 = vmatpush.msra.mxu0 %v6512_v27  ;;  %v6518_v4 = vld [vmem:[#allocation89_spill] sm:$0xff] }
  0xd3   : > { %920 = vmatpush.msra.mxu1 %v6513_v62  ;;  %943 = vmatpush.msra.mxu2 %v3909_v9  ;;  %v6519_v9 = vld [vmem:[#allocation90_spill] sm:$0xff] }
  0xd4   : > { %963 = vmatpush.msra.mxu3 %v3914_v8  ;;  %901 = vmatpush.msra.mxu0 %v6514_v31  ;;  %v6520_v8 = vld [vmem:[#allocation93_spill] sm:$0xff] }
  0xd5   : > { %921 = vmatpush.msra.mxu1 %v6515_v1  ;;  %944 = vmatpush.msra.mxu2 %v3923_v13  ;;  %v6521_v13 = vld [vmem:[#allocation94_spill] sm:$0xff] }
  0xd6   : > { %964 = vmatpush.msra.mxu3 %v3928_v12  ;;  %902 = vmatpush.msra.mxu0 %v6516_v59  ;;  %v6522_v12 = vld [vmem:[#allocation97_spill] sm:$0xff] }
  0xd7   : > { %922 = vmatpush.msra.mxu1 %v6517_v5  ;;  %945 = vmatpush.msra.mxu2 %v3937_v17  ;;  %v6523_v17 = vld [vmem:[#allocation98_spill] sm:$0xff] }
  0xd8   : > { %965 = vmatpush.msra.mxu3 %v3942_v16  ;;  %903 = vmatpush.msra.mxu0 %v6518_v4  ;;  %v6524_v16 = vld [vmem:[#allocation101_spill] sm:$0xff] }
  0xd9   : > { %923 = vmatpush.msra.mxu1 %v6519_v9  ;;  %946 = vmatpush.msra.mxu2 %v3951_v21  ;;  %v6525_v21 = vld [vmem:[#allocation102_spill] sm:$0xff] }
  0xda   : > { %966 = vmatpush.msra.mxu3 %v3956_v20  ;;  %904 = vmatpush.msra.mxu0 %v6520_v8  ;;  %v6531_v20 = vld [vmem:[#allocation114_spill] sm:$0xff] }
  0xdb   : > { %924 = vmatpush.msra.mxu1 %v6521_v13  ;;  %947 = vmatpush.msra.mxu2 %v3965_v25  ;;  %v6526_v25 = vld [vmem:[#allocation105_spill] sm:$0xff] }
  0xdc   : > { %967 = vmatpush.msra.mxu3 %v3970_v24  ;;  %905 = vmatpush.msra.mxu0 %v6522_v12  ;;  %v6527_v24 = vld [vmem:[#allocation106_spill] sm:$0xff] }
  0xdd   : > { %925 = vmatpush.msra.mxu1 %v6523_v17  ;;  %948 = vmatpush.msra.mxu2 %v3979_v29  ;;  %v6528_v29 = vld [vmem:[#allocation109_spill] sm:$0xff] }
  0xde   : > { %968 = vmatpush.msra.mxu3 %v3984_v28  ;;  %906 = vmatpush.msra.mxu0 %v6524_v16  ;;  %v6529_v28 = vld [vmem:[#allocation110_spill] sm:$0xff] }
  0xdf   : > { %926 = vmatpush.msra.mxu1 %v6525_v21  ;;  %949 = vmatpush.msra.mxu2 %v3993_v33  ;;  %v6530_v33 = vld [vmem:[#allocation113_spill] sm:$0xff] }
  0xe0   : > { %969 = vmatpush.msra.mxu3 %v3998_v32  ;;  %907 = vmatpush.msra.mxu0 %v6526_v25  ;;  %v6532_v32 = vld [vmem:[#allocation118_spill] sm:$0xff] }
  0xe1   : > { %927 = vmatpush.msra.mxu1 %v6527_v24  ;;  %950 = vmatpush.msra.mxu2 %v4007_v37  ;;  %v6533_v37 = vld [vmem:[#allocation119_spill] sm:$0xff] }
  0xe2   : > { %970 = vmatpush.msra.mxu3 %v4012_v36  ;;  %908 = vmatpush.msra.mxu0 %v6528_v29  ;;  %v4202_v36 = vld [vmem:[%s3720_s16 + $0x9] sm:$0x7f] }
  0xe3   : > { %928 = vmatpush.msra.mxu1 %v6529_v28  ;;  %951 = vmatpush.msra.mxu2 %v4021_v41  ;;  %6534 = vst [vmem:[#allocation17_spill] sm:$0xff] %v4202_v36  ;;  %v6538_v41 = vld [vmem:[#allocation7_spill] sm:$0xff] }
  0xe4   : > { %971 = vmatpush.msra.mxu3 %v4026_v40  ;;  %909 = vmatpush.msra.mxu0 %v6530_v33  ;;  %v6537_v40 = vld [vmem:[#allocation6_spill] sm:$0xff] }
  0xe5   : > { %929 = vmatpush.msra.mxu1 %v6531_v20  ;;  %952 = vmatpush.msra.mxu2 %v4035_v45  ;;  %v6536_v45 = vld [vmem:[#allocation5_spill] sm:$0xff] }
  0xe6   : > { %972 = vmatpush.msra.mxu3 %v4040_v44  ;;  %910 = vmatpush.msra.mxu0 %v6532_v32  ;;  %v4213_v44 = vld [vmem:[%s6017_s1 + $0x178] sm:$0xff] }
  0xe7   : > { %930 = vmatpush.msra.mxu1 %v6533_v37  ;;  %953 = vmatpush.msra.mxu2 %v4049_v49  ;;  %v4219_v49 = vld [vmem:[%s6017_s1 + $0x1f8] sm:$0xff] }
  0xe8   : > { %973 = vmatpush.msra.mxu3 %v4054_v48  ;;  %911 = vmatmul.f32.vlgmr.msra.gmra.mxu0 %v4061_v52  ;;  %v4225_v48 = vld [vmem:[%s6017_s1 + $0x78] sm:$0xff] }
  0xe9   : > { %931 = vmatmul.f32.vlgmr.msra.gmra.mxu1 %v4061_v52  ;;  %954 = vmatmul.f32.vlgmr.msra.gmra.mxu2 %v4202_v36  ;;  %6535 = vst [vmem:[#allocation18_spill] sm:$0xff] %v4225_v48  ;;  %v6539_v52 = vld [vmem:[#allocation8_spill] sm:$0xff] }
  0xea   : > { %974 = vmatmul.f32.vlgmr.msra.gmra.mxu3 %v4202_v36  ;;  %982 = vmatpush.msrb.mxu0 %v4213_v44  ;;  %v6540_v36 = vld [vmem:[#allocation9_spill] sm:$0xff] }
  0xeb   : > { %1002 = vmatpush.msrb.mxu1 %v4219_v49  ;;  %1022 = vmatpush.msrb.mxu2 %v4225_v48  ;;  %v6541_v48 = vld [vmem:[#allocation10_spill] sm:$0xff] }
  0xec   : > { %1042 = vmatpush.msrb.mxu3 %v3064_v3  ;;  %983 = vmatpush.msrb.mxu0 %v6536_v45  ;;  %v6542_v3 = vld [vmem:[#allocation11_spill] sm:$0xff]  ;;  %v6557_v45 = vld [vmem:[#allocation32_spill] sm:$0xff] }
  0xed   : > { %1003 = vmatpush.msrb.mxu1 %v6537_v40  ;;  %1023 = vmatpush.msrb.mxu2 %v3081_v6  ;;  %v6543_v6 = vld [vmem:[#allocation12_spill] sm:$0xff]  ;;  %v6554_v40 = vld [vmem:[#allocation29_spill] sm:$0xff] }
  0xee   : > { %1043 = vmatpush.msrb.mxu3 %v3086_v7  ;;  %984 = vmatpush.msrb.mxu0 %v6538_v41  ;;  %v6544_v7 = vld [vmem:[#allocation13_spill] sm:$0xff]  ;;  %v6555_v41 = vld [vmem:[#allocation30_spill] sm:$0xff] }
  0xef   : > { %1004 = vmatpush.msrb.mxu1 %v6539_v52  ;;  %1024 = vmatpush.msrb.mxu2 %v3103_v10  ;;  %v6545_v10 = vld [vmem:[#allocation14_spill] sm:$0xff]  ;;  %v6563_v52 = vld [vmem:[#allocation40_spill] sm:$0xff] }
  0xf0   : > { %1044 = vmatpush.msrb.mxu3 %v3108_v11  ;;  %985 = vmatpush.msrb.mxu0 %v6540_v36  ;;  %v6546_v11 = vld [vmem:[#allocation15_spill] sm:$0xff]  ;;  %v6553_v36 = vld [vmem:[#allocation28_spill] sm:$0xff] }
  0xf1   : > { %1005 = vmatpush.msrb.mxu1 %v6541_v48  ;;  %1025 = vmatpush.msrb.mxu2 %v3127_v14  ;;  %v6547_v14 = vld [vmem:[#allocation16_spill] sm:$0xff] }
  0xf2   : > { %1045 = vmatpush.msrb.mxu3 %v3132_v15  ;;  %986 = vmatpush.msrb.mxu0 %v6542_v3  ;;  %v6548_v15 = vld [vmem:[#allocation19_spill] sm:$0xff]  ;;  %v6560_v48 = vld [vmem:[#allocation36_spill] sm:$0xff]  ;;  %v6565_v3 = vld [vmem:[#allocation42_spill] sm:$0xff] }
  0xf3   : > { %1006 = vmatpush.msrb.mxu1 %v6543_v6  ;;  %1026 = vmatpush.msrb.mxu2 %v3151_v18  ;;  %v6549_v18 = vld [vmem:[#allocation20_spill] sm:$0xff]  ;;  %v6566_v6 = vld [vmem:[#allocation43_spill] sm:$0xff] }
  0xf4   : > { %1046 = vmatpush.msrb.mxu3 %v3156_v19  ;;  %987 = vmatpush.msrb.mxu0 %v6544_v7  ;;  %v6550_v19 = vld [vmem:[#allocation23_spill] sm:$0xff]  ;;  %v6567_v7 = vld [vmem:[#allocation44_spill] sm:$0xff] }
  0xf5   : > { %1007 = vmatpush.msrb.mxu1 %v6545_v10  ;;  %1027 = vmatpush.msrb.mxu2 %v3175_v22  ;;  %v6551_v22 = vld [vmem:[#allocation24_spill] sm:$0xff]  ;;  %v6569_v10 = vld [vmem:[#allocation47_spill] sm:$0xff] }
  0xf6   : > { %1047 = vmatpush.msrb.mxu3 %v3180_v23  ;;  %988 = vmatpush.msrb.mxu0 %v6546_v11  ;;  %v6552_v23 = vld [vmem:[#allocation27_spill] sm:$0xff] }
  0xf7   : > { %1008 = vmatpush.msrb.mxu1 %v6547_v14  ;;  %1028 = vmatpush.msrb.mxu2 %v6462_v46  ;;  %v6559_v46 = vld [vmem:[#allocation35_spill] sm:$0xff]  ;;  %v6572_v14 = vld [vmem:[#allocation52_spill] sm:$0xff] }
  0xf8   : > { %1048 = vmatpush.msrb.mxu3 %v6463_v43  ;;  %989 = vmatpush.msrb.mxu0 %v6548_v15  ;;  %v6556_v43 = vld [vmem:[#allocation31_spill] sm:$0xff] }
  0xf9   : > { %1009 = vmatpush.msrb.mxu1 %v6549_v18  ;;  %1029 = vmatpush.msrb.mxu2 %v6466_v50  ;;  %v6562_v50 = vld [vmem:[#allocation39_spill] sm:$0xff] }
  0xfa   : > { %1049 = vmatpush.msrb.mxu3 %v6467_v39  ;;  %990 = vmatpush.msrb.mxu0 %v6550_v19  ;;  %v6558_v39 = vld [vmem:[#allocation33_spill] sm:$0xff]  ;;  %v6571_v11 = vld [vmem:[#allocation51_spill] sm:$0xff] }
  0xfb   : > { %1010 = vmatpush.msrb.mxu1 %v6551_v22  ;;  %1030 = vmatpush.msrb.mxu2 %v6470_v54  ;;  %v6564_v54 = vld [vmem:[#allocation41_spill] sm:$0xff]  ;;  %v6573_v15 = vld [vmem:[#allocation55_spill] sm:$0xff]  ;;  %v6611_v22 = vld [vmem:[#allocation124_spill] sm:$0xff] }
  0xfc   : > { %1050 = vmatpush.msrb.mxu3 %v6471_v35  ;;  %991 = vmatpush.msrb.mxu0 %v6552_v23  ;;  %v6561_v35 = vld [vmem:[#allocation38_spill] sm:$0xff]  ;;  %v6575_v18 = vld [vmem:[#allocation59_spill] sm:$0xff]  ;;  %v6606_v19 = vld [vmem:[#allocation117_spill] sm:$0xff] }
  0xfd   : > { %1011 = vmatpush.msrb.mxu1 %v6553_v36  ;;  %1031 = vmatpush.msrb.mxu2 %v6554_v40  ;;  %v2730_v23 = vld [vmem:[%s6017_s1 + $0x168] sm:$0xff] }
  0xfe   : > { %1051 = vmatpush.msrb.mxu3 %v6555_v41  ;;  %992 = vmatpush.msrb.mxu0 %v6556_v43  ;;  %v2731_v36 = vld [vmem:[%s6017_s1 + $0x1e8] sm:$0xff]  ;;  %v6615_v41 = vld [vmem:[#allocation128_spill] sm:$0xff] }
  0xff   : > { %1012 = vmatpush.msrb.mxu1 %v6557_v45  ;;  %1032 = vmatpush.msrb.mxu2 %v6558_v39  ;;  %v6614_v40 = vld [vmem:[#allocation154_spill] sm:$0xff]  ;;  %v6616_v43 = vld [vmem:[#allocation129_spill] sm:$0xff] }
 0x100   : > { %1052 = vmatpush.msrb.mxu3 %v6479_v38  ;;  %993 = vmatpush.msrb.mxu0 %v6559_v46  ;;  %v6568_v38 = vld [vmem:[#allocation46_spill] sm:$0xff]  ;;  %v2732_v45 = vld [vmem:[%s6017_s1 + $0x160] sm:$0xff] }
 0x101   : > { %1013 = vmatpush.msrb.mxu1 %v6560_v48  ;;  %1033 = vmatpush.msrb.mxu2 %v6482_v53  ;;  %v6570_v53 = vld [vmem:[#allocation48_spill] sm:$0xff]  ;;  %v6617_v46 = vld [vmem:[#allocation130_spill] sm:$0xff]  ;;  %v6618_v48 = vld [vmem:[#allocation131_spill] sm:$0xff] }
 0x102   : > { %1053 = vmatpush.msrb.mxu3 %v6561_v35  ;;  %994 = vmatpush.msrb.mxu0 %v6562_v50  ;;  %v2733_v39 = vld [vmem:[%s6017_s1 + $0x1e0] sm:$0xff]  ;;  %v2734_v35 = vld [vmem:[%s6017_s1 + $0x158] sm:$0xff] }
 0x103   : > { %1014 = vmatpush.msrb.mxu1 %v6563_v52  ;;  %1034 = vmatpush.msrb.mxu2 %v6564_v54  ;;  %v2735_v50 = vld [vmem:[%s6017_s1 + $0x1d8] sm:$0xff]  ;;  %v6620_v54 = vld [vmem:[#allocation133_spill] sm:$0xff] }
 0x104   : > { %1054 = vmatpush.msrb.mxu3 %v6565_v3  ;;  %995 = vmatpush.msrb.mxu0 %v6566_v6  ;;  %v6619_v52 = vld [vmem:[#allocation132_spill] sm:$0xff]  ;;  %v2736_v3 = vld [vmem:[%s6017_s1 + $0x150] sm:$0xff] }
 0x105   : > { %1015 = vmatpush.msrb.mxu1 %v6567_v7  ;;  %1035 = vmatpush.msrb.mxu2 %v6490_v56  ;;  %v6574_v56 = vld [vmem:[#allocation56_spill] sm:$0xff]  ;;  %v2737_v6 = vld [vmem:[%s6017_s1 + $0x1d0] sm:$0xff] }
 0x106   : > { %1055 = vmatpush.msrb.mxu3 %v6568_v38  ;;  %996 = vmatpush.msrb.mxu0 %v6569_v10  ;;  %v6621_v7 = vld [vmem:[#allocation134_spill] sm:$0xff]  ;;  %v6622_v38 = vld [vmem:[#allocation135_spill] sm:$0xff] }
 0x107   : > { %1016 = vmatpush.msrb.mxu1 %v6570_v53  ;;  %1036 = vmatpush.msrb.mxu2 %v6494_v61  ;;  %v6576_v61 = vld [vmem:[#allocation60_spill] sm:$0xff]  ;;  %v2738_v10 = vld [vmem:[%s6017_s1 + $0x148] sm:$0xff] }
 0x108   : > { %1056 = vmatpush.msrb.mxu3 %v6495_v42  ;;  %997 = vmatpush.msrb.mxu0 %v6571_v11  ;;  %v6577_v42 = vld [vmem:[#allocation63_spill] sm:$0xff]  ;;  %v2739_v53 = vld [vmem:[%s6017_s1 + $0x1c8] sm:$0xff]  ;;  %v6623_v11 = vld [vmem:[#allocation136_spill] sm:$0xff] }
 0x109   : > { %1017 = vmatpush.msrb.mxu1 %v6572_v14  ;;  %1037 = vmatpush.msrb.mxu2 %v6497_v57  ;;  %v6578_v57 = vld [vmem:[#allocation64_spill] sm:$0xff]  ;;  %v6624_v14 = vld [vmem:[#allocation137_spill] sm:$0xff] }
 0x10a   : > { %1057 = vmatpush.msrb.mxu3 %v6498_v47  ;;  %1062 = vmatpush.msra.mxu0 %v6573_v15  ;;  %v6579_v47 = vld [vmem:[#allocation67_spill] sm:$0xff]  ;;  %v2740_v15 = vld [vmem:[%s6017_s1 + $0x140] sm:$0xff] }
 0x10b   : > { %1082 = vmatpush.msra.mxu1 %v6574_v56  ;;  %1104 = vmatpush.msra.mxu2 %v6500_v51  ;;  %v6580_v51 = vld [vmem:[#allocation68_spill] sm:$0xff] }
 0x10c   : > { %1124 = vmatpush.msra.mxu3 %v6501_v2  ;;  %1063 = vmatpush.msra.mxu0 %v6575_v18  ;;  %v6581_v2 = vld [vmem:[#allocation71_spill] sm:$0xff]  ;;  %v2741_v56 = vld [vmem:[%s6017_s1 + $0x1c0] sm:$0xff]  ;;  %v6625_v18 = vld [vmem:[#allocation138_spill] sm:$0xff] }
 0x10d   : > { %1083 = vmatpush.msra.mxu1 %v6576_v61  ;;  %1105 = vmatpush.msra.mxu2 %v6502_v60  ;;  %v6582_v60 = vld [vmem:[#allocation72_spill] sm:$0xff]  ;;  %v6626_v61 = vld [vmem:[#allocation139_spill] sm:$0xff] }
 0x10e   : > { %1125 = vmatpush.msra.mxu3 %v6503_v63  ;;  %1064 = vmatpush.msra.mxu0 %v6577_v42  ;;  %v6583_v63 = vld [vmem:[#allocation75_spill] sm:$0xff] }
 0x10f   : > { %1084 = vmatpush.msra.mxu1 %v6578_v57  ;;  %1106 = vmatpush.msra.mxu2 %v6505_v0  ;;  %v6584_v0 = vld [vmem:[#allocation76_spill] sm:$0xff] }
 0x110   : > { %1126 = vmatpush.msra.mxu3 %v6506_v34  ;;  %1065 = vmatpush.msra.mxu0 %v6579_v47  ;;  %v6585_v34 = vld [vmem:[#allocation79_spill] sm:$0xff]  ;;  %v6627_v47 = vld [vmem:[#allocation140_spill] sm:$0xff] }
 0x111   : > { %1085 = vmatpush.msra.mxu1 %v6580_v51  ;;  %1107 = vmatpush.msra.mxu2 %v6508_v58  ;;  %v6586_v58 = vld [vmem:[#allocation80_spill] sm:$0xff]  ;;  %v6628_v51 = vld [vmem:[#allocation141_spill] sm:$0xff] }
 0x112   : > { %1127 = vmatpush.msra.mxu3 %v6509_v30  ;;  %1066 = vmatpush.msra.mxu0 %v6581_v2  ;;  %v6587_v30 = vld [vmem:[#allocation83_spill] sm:$0xff] }
 0x113   : > { %1086 = vmatpush.msra.mxu1 %v6582_v60  ;;  %1108 = vmatpush.msra.mxu2 %v6510_v26  ;;  %v6588_v26 = vld [vmem:[#allocation84_spill] sm:$0xff]  ;;  %v2744_v2 = vld [vmem:[%s6017_s1 + $0x130] sm:$0xff] }
 0x114   : > { %1128 = vmatpush.msra.mxu3 %v6511_v55  ;;  %1067 = vmatpush.msra.mxu0 %v6583_v63  ;;  %v6589_v55 = vld [vmem:[#allocation87_spill] sm:$0xff]  ;;  %v6629_v63 = vld [vmem:[#allocation142_spill] sm:$0xff] }
 0x115   : > { %1087 = vmatpush.msra.mxu1 %v6584_v0  ;;  %1109 = vmatpush.msra.mxu2 %v6512_v27  ;;  %v6590_v27 = vld [vmem:[#allocation88_spill] sm:$0xff]  ;;  %v2745_v60 = vld [vmem:[%s6017_s1 + $0x1b0] sm:$0xff] }
 0x116   : > { %1129 = vmatpush.msra.mxu3 %v6513_v62  ;;  %1068 = vmatpush.msra.mxu0 %v6585_v34  ;;  %v6591_v62 = vld [vmem:[#allocation91_spill] sm:$0xff]  ;;  %v2746_v34 = vld [vmem:[%s6017_s1 + $0x128] sm:$0xff] }
 0x117   : > { %1088 = vmatpush.msra.mxu1 %v6586_v58  ;;  %1110 = vmatpush.msra.mxu2 %v6514_v31  ;;  %v6592_v31 = vld [vmem:[#allocation92_spill] sm:$0xff]  ;;  %v6630_v0 = vld [vmem:[#allocation143_spill] sm:$0xff]  ;;  %v2747_v58 = vld [vmem:[%s6017_s1 + $0x1a8] sm:$0xff] }
 0x118   : > { %1130 = vmatpush.msra.mxu3 %v6515_v1  ;;  %1069 = vmatpush.msra.mxu0 %v6587_v30  ;;  %v6593_v1 = vld [vmem:[#allocation95_spill] sm:$0xff]  ;;  %v6631_v30 = vld [vmem:[#allocation144_spill] sm:$0xff] }
 0x119   : > { %1089 = vmatpush.msra.mxu1 %v6588_v26  ;;  %1111 = vmatpush.msra.mxu2 %v6516_v59  ;;  %v6594_v59 = vld [vmem:[#allocation96_spill] sm:$0xff]  ;;  %v6632_v26 = vld [vmem:[#allocation145_spill] sm:$0xff] }
 0x11a   : > { %1131 = vmatpush.msra.mxu3 %v6517_v5  ;;  %1070 = vmatpush.msra.mxu0 %v6589_v55  ;;  %v6595_v5 = vld [vmem:[#allocation99_spill] sm:$0xff]  ;;  %v2748_v55 = vld [vmem:[%s6017_s1 + $0x120] sm:$0xff] }
 0x11b   : > { %1090 = vmatpush.msra.mxu1 %v6590_v27  ;;  %1112 = vmatpush.msra.mxu2 %v6518_v4  ;;  %v6596_v4 = vld [vmem:[#allocation100_spill] sm:$0xff] }
 0x11c   : > { %1132 = vmatpush.msra.mxu3 %v6519_v9  ;;  %1071 = vmatpush.msra.mxu0 %v6591_v62  ;;  %v6597_v9 = vld [vmem:[#allocation103_spill] sm:$0xff]  ;;  %v2749_v27 = vld [vmem:[%s6017_s1 + $0x1a0] sm:$0xff]  ;;  %v6633_v62 = vld [vmem:[#allocation146_spill] sm:$0xff] }
 0x11d   : > { %1091 = vmatpush.msra.mxu1 %v6592_v31  ;;  %1113 = vmatpush.msra.mxu2 %v6520_v8  ;;  %v6598_v8 = vld [vmem:[#allocation104_spill] sm:$0xff]  ;;  %v6634_v31 = vld [vmem:[#allocation147_spill] sm:$0xff] }
 0x11e   : > { %1133 = vmatpush.msra.mxu3 %v6521_v13  ;;  %1072 = vmatpush.msra.mxu0 %v6593_v1  ;;  %v6599_v13 = vld [vmem:[#allocation127_spill] sm:$0xff] }
 0x11f   : > { %1092 = vmatpush.msra.mxu1 %v6594_v59  ;;  %1114 = vmatpush.msra.mxu2 %v6522_v12  ;;  %v6600_v12 = vld [vmem:[#allocation107_spill] sm:$0xff] }
 0x120   : > { %1134 = vmatpush.msra.mxu3 %v6523_v17  ;;  %1073 = vmatpush.msra.mxu0 %v6595_v5  ;;  %v6601_v17 = vld [vmem:[#allocation108_spill] sm:$0xff] }
 0x121   : > { %1093 = vmatpush.msra.mxu1 %v6596_v4  ;;  %1115 = vmatpush.msra.mxu2 %v6524_v16  ;;  %v6602_v16 = vld [vmem:[#allocation111_spill] sm:$0xff]  ;;  %v6635_v5 = vld [vmem:[#allocation148_spill] sm:$0xff]  ;;  %v6636_v4 = vld [vmem:[#allocation149_spill] sm:$0xff] }
 0x122   : > { %1135 = vmatpush.msra.mxu3 %v6525_v21  ;;  %1074 = vmatpush.msra.mxu0 %v6597_v9  ;;  %v6603_v21 = vld [vmem:[#allocation112_spill] sm:$0xff]  ;;  %v2752_v9 = vld [vmem:[%s6017_s1 + $0x110] sm:$0xff] }
 0x123   : > { %1094 = vmatpush.msra.mxu1 %v6598_v8  ;;  %1116 = vmatpush.msra.mxu2 %v6526_v25  ;;  %v6605_v25 = vld [vmem:[#allocation116_spill] sm:$0xff]  ;;  %v2753_v8 = vld [vmem:[%s6017_s1 + $0x190] sm:$0xff] }
 0x124   : > { %1136 = vmatpush.msra.mxu3 %v6527_v24  ;;  %1038 = vmatmul.f32.vlgmr.msrb.gmra.mxu2 %v6599_v13  ;;  %v6604_v24 = vld [vmem:[#allocation122_spill] sm:$0xff]  ;;  %v2742_v42 = vld [vmem:[%s6017_s1 + $0x138] sm:$0xff] }
 0x125   : > { %1058 = vmatmul.f32.vlgmr.msrb.gmra.mxu3 %v6599_v13  ;;  %1075 = vmatpush.msra.mxu0 %v6600_v12  ;;  %v2743_v57 = vld [vmem:[%s6017_s1 + $0x1b8] sm:$0xff]  ;;  %v6637_v13 = vld [vmem:[#allocation150_spill] sm:$0xff] }
 0x126   : > { %1095 = vmatpush.msra.mxu1 %v6601_v17  ;;  %1117 = vmatpush.msra.mxu2 %v6528_v29  ;;  %v6608_v29 = vld [vmem:[#allocation121_spill] sm:$0xff]  ;;  %v2750_v1 = vld [vmem:[%s6017_s1 + $0x118] sm:$0xff] }
 0x127   : > { %1137 = vmatpush.msra.mxu3 %v6529_v28  ;;  %1076 = vmatpush.msra.mxu0 %v6602_v16  ;;  %v6607_v28 = vld [vmem:[#allocation120_spill] sm:$0xff]  ;;  %v6638_v12 = vld [vmem:[#allocation151_spill] sm:$0xff]  ;;  %v2754_v17 = vld [vmem:[%s6017_s1 + $0x108] sm:$0xff] }
 0x128   : > { %1096 = vmatpush.msra.mxu1 %v6603_v21  ;;  %1118 = vmatpush.msra.mxu2 %v6530_v33  ;;  %v6610_v33 = vld [vmem:[#allocation123_spill] sm:$0xff]  ;;  %v2755_v16 = vld [vmem:[%s6017_s1 + $0x188] sm:$0xff] }
 0x129   : > { %1138 = vmatpush.msra.mxu3 %v6531_v20  ;;  %998 = vmatmul.f32.vlgmr.msrb.gmra.mxu0 %v6604_v24  ;;  %v6609_v20 = vld [vmem:[#allocation17_spill] sm:$0xff]  ;;  %v2751_v59 = vld [vmem:[%s6017_s1 + $0x198] sm:$0xff]  ;;  %v4478_v21 = vld [vmem:[%s3720_s16 + $0x11] sm:$0x7f] }
 0x12a   : > { %1018 = vmatmul.f32.vlgmr.msrb.gmra.mxu1 %v6604_v24  ;;  %1077 = vmatpush.msra.mxu0 %v6605_v25  ;;  %v6639_v24 = vld [vmem:[#allocation152_spill] sm:$0xff]  ;;  %v6640_v25 = vld [vmem:[#allocation153_spill] sm:$0xff] }
 0x12b   : > { %1097 = vmatpush.msra.mxu1 %v6606_v19  ;;  %1119 = vmatpush.msra.mxu2 %v6532_v32  ;;  %v2728_v32 = vld [vmem:[%s6017_s1 + $0x170] sm:$0xff]  ;;  %v2756_v19 = vld [vmem:[%s6017_s1 + $0x100] sm:$0xff] }
 0x12c   : > { %1139 = vmatpush.msra.mxu3 %v6533_v37  ;;  %1147 = vmatpush.msrb.mxu0 %v6607_v28  ;;  %v2729_v37 = vld [vmem:[%s6017_s1 + $0x1f0] sm:$0xff]  ;;  %v2757_v28 = vld [vmem:[%s6017_s1 + $0x180] sm:$0xff] }
 0x12d   : > { %1167 = vmatpush.msrb.mxu1 %v6608_v29  ;;  %1191 = vmatpush.msrb.mxu2 %v4213_v44  ;;  %v6612_v44 = vld [vmem:[#allocation125_spill] sm:$0xff]  ;;  %v6641_v29 = vld [vmem:[#allocation18_spill] sm:$0xff] }
 0x12e   : > { %1211 = vmatpush.msrb.mxu3 %v4219_v49  ;;  %1120 = vmatmul.f32.vlgmr.msra.gmra.mxu2 %v6609_v20  ;;  %v6613_v49 = vld [vmem:[#allocation126_spill] sm:$0xff] }
 0x12f   : > { %1140 = vmatmul.f32.vlgmr.msra.gmra.mxu3 %v6609_v20  ;;  %1148 = vmatpush.msrb.mxu0 %v6610_v33  ;;  %v2758_v33 = vld [vmem:[%s6017_s1 + $0xf8] sm:$0xff] }
 0x130   : > { %1168 = vmatpush.msrb.mxu1 %v6611_v22  ;;  %1192 = vmatpush.msrb.mxu2 %v2728_v32  ;;  %v2759_v22 = vld [vmem:[%s6017_s1 + $0x278] sm:$0xff] }
 0x131   : > { %1212 = vmatpush.msrb.mxu3 %v2729_v37  ;;  %1149 = vmatpush.msrb.mxu0 %v6612_v44  ;;  %v2760_v32 = vld [vmem:[%s6017_s1 + $0x2f8] sm:$0xff]  ;;  %v2761_v37 = vld [vmem:[%s6017_s1 + $0x70] sm:$0xff] }
 0x132   : > { %1169 = vmatpush.msrb.mxu1 %v6613_v49  ;;  %1193 = vmatpush.msrb.mxu2 %v2730_v23  ;;  %v2762_v44 = vld [vmem:[%s6017_s1 + $0xf0] sm:$0xff] }
 0x133   : > { %1213 = vmatpush.msrb.mxu3 %v2731_v36  ;;  %1078 = vmatmul.f32.vlgmr.msra.gmra.mxu0 %v6614_v40  ;;  %v2763_v49 = vld [vmem:[%s6017_s1 + $0x270] sm:$0xff]  ;;  %v2765_v36 = vld [vmem:[%s6017_s1 + $0x68] sm:$0xff] }
 0x134   : > { %1098 = vmatmul.f32.vlgmr.msra.gmra.mxu1 %v6614_v40  ;;  %1150 = vmatpush.msrb.mxu0 %v6615_v41  ;;  %v2764_v23 = vld [vmem:[%s6017_s1 + $0x2f0] sm:$0xff]  ;;  %v2766_v41 = vld [vmem:[%s6017_s1 + $0xe8] sm:$0xff] }
 0x135   : > { %1170 = vmatpush.msrb.mxu1 %v6616_v43  ;;  %1194 = vmatpush.msrb.mxu2 %v2732_v45  ;;  %v2767_v43 = vld [vmem:[%s6017_s1 + $0x268] sm:$0xff] }
 0x136   : > { %1214 = vmatpush.msrb.mxu3 %v2733_v39  ;;  %1151 = vmatpush.msrb.mxu0 %v6617_v46  ;;  %v2768_v45 = vld [vmem:[%s6017_s1 + $0x2e8] sm:$0xff]  ;;  %v2769_v39 = vld [vmem:[%s6017_s1 + $0x60] sm:$0xff] }
 0x137   : > { %1171 = vmatpush.msrb.mxu1 %v6618_v48  ;;  %1195 = vmatpush.msrb.mxu2 %v2734_v35  ;;  %v2770_v46 = vld [vmem:[%s6017_s1 + $0xe0] sm:$0xff] }
 0x138   : > { %1215 = vmatpush.msrb.mxu3 %v2735_v50  ;;  %1152 = vmatpush.msrb.mxu0 %v6619_v52  ;;  %v2771_v48 = vld [vmem:[%s6017_s1 + $0x260] sm:$0xff]  ;;  %v2773_v50 = vld [vmem:[%s6017_s1 + $0x58] sm:$0xff] }
 0x139   : > { %1172 = vmatpush.msrb.mxu1 %v6620_v54  ;;  %1196 = vmatpush.msrb.mxu2 %v2736_v3  ;;  %v2772_v35 = vld [vmem:[%s6017_s1 + $0x2e0] sm:$0xff]  ;;  %v2774_v52 = vld [vmem:[%s6017_s1 + $0xd8] sm:$0xff] }
 0x13a   : > { %1216 = vmatpush.msrb.mxu3 %v2737_v6  ;;  %1153 = vmatpush.msrb.mxu0 %v6621_v7  ;;  %v2775_v54 = vld [vmem:[%s6017_s1 + $0x258] sm:$0xff]  ;;  %v2777_v6 = vld [vmem:[%s6017_s1 + $0x50] sm:$0xff] }
 0x13b   : > { %1173 = vmatpush.msrb.mxu1 %v6622_v38  ;;  %1197 = vmatpush.msrb.mxu2 %v2738_v10  ;;  %v2776_v3 = vld [vmem:[%s6017_s1 + $0x2d8] sm:$0xff]  ;;  %v2778_v7 = vld [vmem:[%s6017_s1 + $0xd0] sm:$0xff] }
 0x13c   : > { %1217 = vmatpush.msrb.mxu3 %v2739_v53  ;;  %1154 = vmatpush.msrb.mxu0 %v6623_v11  ;;  %v2779_v38 = vld [vmem:[%s6017_s1 + $0x250] sm:$0xff]  ;;  %v2781_v53 = vld [vmem:[%s6017_s1 + $0x48] sm:$0xff] }
 0x13d   : > { %1174 = vmatpush.msrb.mxu1 %v6624_v14  ;;  %1198 = vmatpush.msrb.mxu2 %v2740_v15  ;;  %v2780_v10 = vld [vmem:[%s6017_s1 + $0x2d0] sm:$0xff]  ;;  %v2782_v11 = vld [vmem:[%s6017_s1 + $0xc8] sm:$0xff] }
 0x13e   : > { %1218 = vmatpush.msrb.mxu3 %v2741_v56  ;;  %1155 = vmatpush.msrb.mxu0 %v6625_v18  ;;  %v2783_v14 = vld [vmem:[%s6017_s1 + $0x248] sm:$0xff]  ;;  %v2785_v56 = vld [vmem:[%s6017_s1 + $0x40] sm:$0xff] }
 0x13f   : > { %1175 = vmatpush.msrb.mxu1 %v6626_v61  ;;  %1199 = vmatpush.msrb.mxu2 %v2742_v42  ;;  %v2784_v15 = vld [vmem:[%s6017_s1 + $0x2c8] sm:$0xff]  ;;  %v2786_v18 = vld [vmem:[%s6017_s1 + $0xc0] sm:$0xff] }
 0x140   : > { %1219 = vmatpush.msrb.mxu3 %v2743_v57  ;;  %1156 = vmatpush.msrb.mxu0 %v6627_v47  ;;  %v2787_v61 = vld [vmem:[%s6017_s1 + $0x240] sm:$0xff]  ;;  %v2789_v57 = vld [vmem:[%s6017_s1 + $0x38] sm:$0xff] }
 0x141   : > { %1176 = vmatpush.msrb.mxu1 %v6628_v51  ;;  %1200 = vmatpush.msrb.mxu2 %v2744_v2  ;;  %v2788_v42 = vld [vmem:[%s6017_s1 + $0x2c0] sm:$0xff]  ;;  %v2790_v2 = vld [vmem:[%s6017_s1 + $0xb8] sm:$0xff] }
 0x142   : > { %1220 = vmatpush.msrb.mxu3 %v2745_v60  ;;  %1157 = vmatpush.msrb.mxu0 %v6629_v63  ;;  %v2791_v60 = vld [vmem:[%s6017_s1 + $0x238] sm:$0xff] }
 0x143   : > { %1177 = vmatpush.msrb.mxu1 %v6630_v0  ;;  %1201 = vmatpush.msrb.mxu2 %v2746_v34  ;;  %v2792_v34 = vld [vmem:[%s6017_s1 + $0x2b8] sm:$0xff] }
 0x144   : > { %1221 = vmatpush.msrb.mxu3 %v2747_v58  ;;  %1158 = vmatpush.msrb.mxu0 %v6631_v30  ;;  %v2793_v58 = vld [vmem:[%s6017_s1 + $0x30] sm:$0xff] }
 0x145   : > { %1178 = vmatpush.msrb.mxu1 %v6632_v26  ;;  %1202 = vmatpush.msrb.mxu2 %v2748_v55  ;;  %v2794_v55 = vld [vmem:[%s6017_s1 + $0xb0] sm:$0xff] }
 0x146   : > { %1222 = vmatpush.msrb.mxu3 %v2749_v27  ;;  %1159 = vmatpush.msrb.mxu0 %v6633_v62  ;;  %v2795_v27 = vld [vmem:[%s6017_s1 + $0x230] sm:$0xff] }
 0x147   : > { %1179 = vmatpush.msrb.mxu1 %v6634_v31  ;;  %1203 = vmatpush.msrb.mxu2 %v2750_v1  ;;  %v2796_v1 = vld [vmem:[%s6017_s1 + $0x2b0] sm:$0xff] }
 0x148   : > { %1223 = vmatpush.msrb.mxu3 %v2751_v59  ;;  %1160 = vmatpush.msrb.mxu0 %v6635_v5  ;;  %v2797_v59 = vld [vmem:[%s6017_s1 + $0x28] sm:$0xff] }
 0x149   : > { %1180 = vmatpush.msrb.mxu1 %v6636_v4  ;;  %1204 = vmatpush.msrb.mxu2 %v2752_v9  ;;  %v2798_v9 = vld [vmem:[%s6017_s1 + $0xa8] sm:$0xff] }
 0x14a   : > { %1224 = vmatpush.msrb.mxu3 %v2753_v8  ;;  %1161 = vmatpush.msrb.mxu0 %v6637_v13  ;;  %v2799_v8 = vld [vmem:[%s6017_s1 + $0x228] sm:$0xff] }
 0x14b   : > { %1181 = vmatpush.msrb.mxu1 %v6638_v12  ;;  %1205 = vmatpush.msrb.mxu2 %v2754_v17  ;;  %v2800_v17 = vld [vmem:[%s6017_s1 + $0x2a8] sm:$0xff] }
 0x14c   : > { %1225 = vmatpush.msrb.mxu3 %v2755_v16  ;;  %1162 = vmatpush.msrb.mxu0 %v6639_v24  ;;  %v2801_v16 = vld [vmem:[%s6017_s1 + $0x20] sm:$0xff] }
 0x14d   : > { %1182 = vmatpush.msrb.mxu1 %v6640_v25  ;;  %1206 = vmatpush.msrb.mxu2 %v2756_v19  ;;  %v2802_v19 = vld [vmem:[%s6017_s1 + $0xa0] sm:$0xff] }
 0x14e   : > { %1226 = vmatpush.msrb.mxu3 %v2757_v28  ;;  %1163 = vmatmul.f32.vlgmr.msrb.gmra.mxu0 %v4478_v21  ;;  %v2803_v28 = vld [vmem:[%s6017_s1 + $0x220] sm:$0xff] }
 0x14f   : > { %1183 = vmatmul.f32.vlgmr.msrb.gmra.mxu1 %v4478_v21  ;;  %1231 = vmatpush.msra.mxu0 %v6641_v29  ;;  %v2804_v29 = vld [vmem:[%s6017_s1 + $0x2a0] sm:$0xff] }
 0x150   : > { %1251 = vmatpush.msra.mxu1 %v2758_v33  ;;  %1271 = vmatpush.msra.mxu2 %v2759_v22  ;;  %v2805_v33 = vld [vmem:[%s6017_s1 + $0x18] sm:$0xff] }
 0x151   : > { %1291 = vmatpush.msra.mxu3 %v2760_v32  ;;  %1232 = vmatpush.msra.mxu0 %v2761_v37  ;;  %v2806_v22 = vld [vmem:[%s6017_s1 + $0x98] sm:$0xff] }
 0x152   : > { %1252 = vmatpush.msra.mxu1 %v2762_v44  ;;  %1272 = vmatpush.msra.mxu2 %v2763_v49  ;;  %v2807_v32 = vld [vmem:[%s6017_s1 + $0x218] sm:$0xff]  ;;  %v2809_v44 = vld [vmem:[%s6017_s1 + $0x10] sm:$0xff] }
 0x153   : > { %1292 = vmatpush.msra.mxu3 %v2764_v23  ;;  %1233 = vmatpush.msra.mxu0 %v2765_v36  ;;  %v2808_v37 = vld [vmem:[%s6017_s1 + $0x298] sm:$0xff]  ;;  %v2810_v49 = vld [vmem:[%s6017_s1 + $0x90] sm:$0xff] }
 0x154   : > { %1253 = vmatpush.msra.mxu1 %v2766_v41  ;;  %1273 = vmatpush.msra.mxu2 %v2767_v43  ;;  %v2811_v23 = vld [vmem:[%s6017_s1 + $0x210] sm:$0xff]  ;;  %v2814_v41 = vld [vmem:[%s6017_s1 + $0x88] sm:$0xff] }
 0x155   : > { %1293 = vmatpush.msra.mxu3 %v2768_v45  ;;  %1234 = vmatpush.msra.mxu0 %v2769_v39  ;;  %v2812_v36 = vld [vmem:[%s6017_s1 + $0x290] sm:$0xff]  ;;  %v2815_v43 = vld [vmem:[%s6017_s1 + $0x208] sm:$0xff]  ;;  %v2817_v39 = vld [vmem:[%s6017_s1] sm:$0xff] }
 0x156   : > { %1254 = vmatpush.msra.mxu1 %v2770_v46  ;;  %1274 = vmatpush.msra.mxu2 %v2771_v48  ;;  %v2816_v45 = vld [vmem:[%s6017_s1 + $0x288] sm:$0xff]  ;;  %v2818_v46 = vld [vmem:[%s6017_s1 + $0x80] sm:$0xff]  ;;  %v4676_v48 = vpop.f32.mrf.mxu0 }
 0x157   : > { %1294 = vmatpush.msra.mxu3 %v2772_v35  ;;  %1235 = vmatpush.msra.mxu0 %v2773_v50  ;;  %v4678_v35 = vpop.f32.mrf.mxu1  ;;  %v2819_v50 = vld [vmem:[%s6017_s1 + $0x200] sm:$0xff] }
 0x158   : > { %1255 = vmatpush.msra.mxu1 %v2774_v52  ;;  %1275 = vmatpush.msra.mxu2 %v2775_v54  ;;  %v2820_v52 = vld [vmem:[%s6017_s1 + $0x280] sm:$0xff]  ;;  %v4686_v54 = vpop.f32.mrf.mxu2 }
 0x159   : > { %1295 = vmatpush.msra.mxu3 %v2776_v3  ;;  %1236 = vmatpush.msra.mxu0 %v2777_v6  ;;  %v4688_v3 = vpop.f32.mrf.mxu3  ;;  %v2821_v6 = vld [vmem:[%s6017_s1 + $0x378] sm:$0xff] }
 0x15a   : > { %1256 = vmatpush.msra.mxu1 %v2778_v7  ;;  %1276 = vmatpush.msra.mxu2 %v2779_v38  ;;  %v2822_v7 = vld [vmem:[%s6017_s1 + $0x3f8] sm:$0xff] }
 0x15b   : > { %1296 = vmatpush.msra.mxu3 %v2780_v10  ;;  %1237 = vmatpush.msra.mxu0 %v2781_v53  ;;  %v2823_v38 = vld [vmem:[%s6017_s1 + $0x478] sm:$0xff]  ;;  %v2825_v53 = vld [vmem:[%s6017_s1 + $0x370] sm:$0xff] }
 0x15c   : > { %1257 = vmatpush.msra.mxu1 %v2782_v11  ;;  %1277 = vmatpush.msra.mxu2 %v2783_v14  ;;  %v2824_v10 = vld [vmem:[%s6017_s1 + $0x4f8] sm:$0xff]  ;;  %v2826_v11 = vld [vmem:[%s6017_s1 + $0x3f0] sm:$0xff] }
 0x15d   : > { %1297 = vmatpush.msra.mxu3 %v2784_v15  ;;  %1238 = vmatpush.msra.mxu0 %v2785_v56  ;;  %v2827_v14 = vld [vmem:[%s6017_s1 + $0x470] sm:$0xff]  ;;  %v2829_v15 = vld [vmem:[%s6017_s1 + $0x368] sm:$0xff] }
 0x15e   : > { %1258 = vmatpush.msra.mxu1 %v2786_v18  ;;  %1278 = vmatpush.msra.mxu2 %v2787_v61  ;;  %v2830_v56 = vld [vmem:[%s6017_s1 + $0x3e8] sm:$0xff] }
 0x15f   : > { %1298 = vmatpush.msra.mxu3 %v2788_v42  ;;  %1239 = vmatpush.msra.mxu0 %v2789_v57  ;;  %v2831_v18 = vld [vmem:[%s6017_s1 + $0x468] sm:$0xff]  ;;  %v2833_v42 = vld [vmem:[%s3720_s16 + $0x18] sm:$0x7f]  ;;  %v2834_v57 = vld [vmem:[%s6017_s1 + $0x360] sm:$0xff] }
 0x160   : > { %1259 = vmatpush.msra.mxu1 %v2790_v2  ;;  %1279 = vmatpush.msra.mxu2 %v2791_v60  ;;  %v2832_v61 = vld [vmem:[%s6017_s1 + $0x4e8] sm:$0xff]  ;;  %v2835_v2 = vld [vmem:[%s6017_s1 + $0x3e0] sm:$0xff]  ;;  %v4735_v60 = vpop.f32.mrf.mxu0 }
 0x161   : > { %1299 = vmatpush.msra.mxu3 %v2792_v34  ;;  %1240 = vmatpush.msra.mxu0 %v2793_v58  ;;  %v4737_v34 = vpop.f32.mrf.mxu1  ;;  %v2836_v58 = vld [vmem:[%s6017_s1 + $0x460] sm:$0xff] }
 0x162   : > { %1260 = vmatpush.msra.mxu1 %v2794_v55  ;;  %1280 = vmatpush.msra.mxu2 %v2795_v27  ;;  %v2837_v55 = vld [vmem:[%s6017_s1 + $0x4e0] sm:$0xff]  ;;  %v4745_v27 = vpop.f32.mrf.mxu2 }
 0x163   : > { %1300 = vmatpush.msra.mxu3 %v2796_v1  ;;  %1241 = vmatpush.msra.mxu0 %v2797_v59  ;;  %v4747_v1 = vpop.f32.mrf.mxu3  ;;  %v2838_v59 = vld [vmem:[%s6017_s1 + $0x358] sm:$0xff] }
 0x164   : > { %1261 = vmatpush.msra.mxu1 %v2798_v9  ;;  %1281 = vmatpush.msra.mxu2 %v2799_v8  ;;  %v2839_v9 = vld [vmem:[%s6017_s1 + $0x3d8] sm:$0xff] }
 0x165   : > { %1301 = vmatpush.msra.mxu3 %v2800_v17  ;;  %1242 = vmatpush.msra.mxu0 %v2801_v16  ;;  %v2840_v8 = vld [vmem:[%s6017_s1 + $0x458] sm:$0xff]  ;;  %v2842_v16 = vld [vmem:[%s6017_s1 + $0x350] sm:$0xff] }
 0x166   : > { %1262 = vmatpush.msra.mxu1 %v2802_v19  ;;  %1282 = vmatpush.msra.mxu2 %v2803_v28  ;;  %v2841_v17 = vld [vmem:[%s6017_s1 + $0x4d8] sm:$0xff]  ;;  %v2843_v19 = vld [vmem:[%s6017_s1 + $0x3d0] sm:$0xff] }
 0x167   : > { %1302 = vmatpush.msra.mxu3 %v2804_v29  ;;  %1243 = vmatpush.msra.mxu0 %v2805_v33  ;;  %v2844_v28 = vld [vmem:[%s6017_s1 + $0x450] sm:$0xff]  ;;  %v2846_v33 = vld [vmem:[%s6017_s1 + $0x348] sm:$0xff] }
 0x168   : > { %1263 = vmatpush.msra.mxu1 %v2806_v22  ;;  %1283 = vmatpush.msra.mxu2 %v2807_v32  ;;  %v2845_v29 = vld [vmem:[%s6017_s1 + $0x4d0] sm:$0xff]  ;;  %v2847_v22 = vld [vmem:[%s6017_s1 + $0x3c8] sm:$0xff] }
 0x169   : > { %1303 = vmatpush.msra.mxu3 %v2808_v37  ;;  %1207 = vmatmul.f32.vlgmr.msrb.gmra.mxu2 %v6614_v40  ;;  %v2848_v32 = vld [vmem:[%s6017_s1 + $0x448] sm:$0xff] }
 0x16a   : > { %1227 = vmatmul.f32.vlgmr.msrb.gmra.mxu3 %v6614_v40  ;;  %1244 = vmatpush.msra.mxu0 %v2809_v44  ;;  %v2813_v40 = vld [vmem:[%s6017_s1 + $0x8] sm:$0xff]  ;;  %v2850_v44 = vld [vmem:[%s6017_s1 + $0x340] sm:$0xff] }
 0x16b   : > { %1264 = vmatpush.msra.mxu1 %v2810_v49  ;;  %1284 = vmatpush.msra.mxu2 %v2811_v23  ;;  %v2849_v37 = vld [vmem:[%s6017_s1 + $0x4c8] sm:$0xff]  ;;  %v2851_v49 = vld [vmem:[%s6017_s1 + $0x3c0] sm:$0xff]  ;;  %v4791_v23 = vpop.f32.mrf.mxu0 }
 0x16c   : > { %1304 = vmatpush.msra.mxu3 %v2812_v36  ;;  %1245 = vmatpush.msra.mxu0 %v2813_v40  ;;  %v4793_v36 = vpop.f32.mrf.mxu1  ;;  %v2852_v40 = vld [vmem:[%s6017_s1 + $0x440] sm:$0xff] }
 0x16d   : > { %1265 = vmatpush.msra.mxu1 %v2814_v41  ;;  %1285 = vmatpush.msra.mxu2 %v2815_v43  ;;  %v2853_v41 = vld [vmem:[%s6017_s1 + $0x4c0] sm:$0xff]  ;;  %v790_v43 = vpop.f32.mrf.mxu2 }
 0x16e   : > { %1305 = vmatpush.msra.mxu3 %v2816_v45  ;;  %1246 = vmatpush.msra.mxu0 %v2817_v39  ;;  %v810_v45 = vpop.f32.mrf.mxu3  ;;  %v2854_v39 = vld [vmem:[%s6017_s1 + $0x338] sm:$0xff] }
 0x16f   : > { %1266 = vmatpush.msra.mxu1 %v2818_v46  ;;  %1286 = vmatpush.msra.mxu2 %v2819_v50  ;;  %v2855_v46 = vld [vmem:[%s6017_s1 + $0x3b8] sm:$0xff] }
 0x170   : > { %1306 = vmatpush.msra.mxu3 %v2820_v52  ;;  %1313 = vmatpush.msrb.mxu0 %v2821_v6  ;;  %v2856_v50 = vld [vmem:[%s6017_s1 + $0x438] sm:$0xff]  ;;  %v2858_v6 = vld [vmem:[%s6017_s1 + $0x330] sm:$0xff] }
 0x171   : > { %1333 = vmatpush.msrb.mxu1 %v2822_v7  ;;  %1356 = vmatpush.msrb.mxu2 %v2823_v38  ;;  %v2857_v52 = vld [vmem:[%s6017_s1 + $0x4b8] sm:$0xff]  ;;  %v2859_v7 = vld [vmem:[%s6017_s1 + $0x3b0] sm:$0xff]  ;;  %v2860_v38 = vld [vmem:[%s6017_s1 + $0x328] sm:$0xff] }
 0x172   : > { %1376 = vmatpush.msrb.mxu3 %v2824_v10  ;;  %1287 = vmatmul.f32.vlgmr.msra.gmra.mxu2 %v6609_v20  ;;  %v2861_v10 = vld [vmem:[%s6017_s1 + $0x3a8] sm:$0xff] }
 0x173   : > { %1307 = vmatmul.f32.vlgmr.msra.gmra.mxu3 %v6609_v20  ;;  %1314 = vmatpush.msrb.mxu0 %v2825_v53  ;;  %v2828_v20 = vld [vmem:[%s6017_s1 + $0x4f0] sm:$0xff]  ;;  %v830_v53 = vpop.f32.mrf.mxu0 }
 0x174   : > { %1334 = vmatpush.msrb.mxu1 %v2826_v11  ;;  %1357 = vmatpush.msrb.mxu2 %v2827_v14  ;;  %v850_v11 = vpop.f32.mrf.mxu1 }
 0x175   : > { %1377 = vmatpush.msrb.mxu3 %v2828_v20  ;;  %1315 = vmatpush.msrb.mxu0 %v2829_v15  ;;  %v870_v14 = vpop.f32.mrf.mxu2  ;;  %v2867_v20 = vld [vmem:[%s6017_s1 + $0x390] sm:$0xff]  ;;  %v2869_v15 = vld [vmem:[%s6017_s1 + $0x388] sm:$0xff] }
 0x176   : > { %1335 = vmatpush.msrb.mxu1 %v2830_v56  ;;  %1358 = vmatpush.msrb.mxu2 %v2831_v18  ;;  %v532_v56 = vadd.f32 %v4688_v3, %v4678_v35  ;;  %v851_v18 = vadd.f32 %v850_v11, %v810_v45  ;;  %v5051_v11 = vld [vmem:[%s6018_s2 + $0x150] sm:$0xff] }
 0x177   : > { %1378 = vmatpush.msrb.mxu3 %v2832_v61  ;;  %1247 = vmatmul.f32.vlgmr.msra.gmra.mxu0 %v2833_v42 }
 0x178   : > { %1267 = vmatmul.f32.vlgmr.msra.gmra.mxu1 %v2833_v42  ;;  %1316 = vmatpush.msrb.mxu0 %v2834_v57  ;;  %v4891_v57 = vld [vmem:[%s6018_s2 + $0x48] sm:$0xff] }
 0x179   : > { %1336 = vmatpush.msrb.mxu1 %v2835_v2  ;;  %1359 = vmatpush.msrb.mxu2 %v2836_v58  ;;  %v4896_v2 = vld [vmem:[%s6018_s2 + $0xa0] sm:$0xff] }
 0x17a   : > { %1379 = vmatpush.msrb.mxu3 %v2837_v55  ;;  %1317 = vmatpush.msrb.mxu0 %v2838_v59  ;;  %v4905_v55 = vld [vmem:[%s6018_s2 + $0x40] sm:$0xff]  ;;  %v4910_v59 = vld [vmem:[%s6018_s2 + $0x98] sm:$0xff] }
 0x17b   : > { %1337 = vmatpush.msrb.mxu1 %v2839_v9  ;;  %1360 = vmatpush.msrb.mxu2 %v2840_v8  ;;  %v912_v3 = vpop.f32.mrf.mxu0 }
 0x17c   : > { %1380 = vmatpush.msrb.mxu3 %v2841_v17  ;;  %1318 = vmatpush.msrb.mxu0 %v2842_v16  ;;  %v932_v61 = vpop.f32.mrf.mxu1 }
 0x17d   : > { %1338 = vmatpush.msrb.mxu1 %v2843_v19  ;;  %1361 = vmatpush.msrb.mxu2 %v2844_v28  ;;  %v4919_v19 = vld [vmem:[%s6018_s2 + $0x38] sm:$0xff]  ;;  %v4924_v28 = vld [vmem:[%s6018_s2 + $0x90] sm:$0xff] }
 0x17e   : > { %1381 = vmatpush.msrb.mxu3 %v2845_v29  ;;  %1319 = vmatpush.msrb.mxu0 %v2846_v33  ;;  %v4933_v29 = vld [vmem:[%s6018_s2 + $0x30] sm:$0xff]  ;;  %v4938_v33 = vld [vmem:[%s6018_s2 + $0x88] sm:$0xff] }
 0x17f   : > { %1339 = vmatpush.msrb.mxu1 %v2847_v22  ;;  %1362 = vmatpush.msrb.mxu2 %v2848_v32  ;;  %6642 = vst [vmem:[#allocation21_spill] sm:$0xff] %v4933_v29  ;;  %v4945_v32 = vld [vmem:[%s6018_s2 + $0x28] sm:$0xff] }
 0x180   : > { %1382 = vmatpush.msrb.mxu3 %v2849_v37  ;;  %1320 = vmatpush.msrb.mxu0 %v2850_v44  ;;  %6643 = vst [vmem:[#allocation22_spill] sm:$0xff] %v4938_v33  ;;  %v4950_v37 = vld [vmem:[%s6018_s2 + $0x80] sm:$0xff] }
 0x181   : > { %1340 = vmatpush.msrb.mxu1 %v2851_v49  ;;  %1363 = vmatpush.msrb.mxu2 %v2852_v40  ;;  %6644 = vst [vmem:[#allocation25_spill] sm:$0xff] %v4945_v32  ;;  %v4957_v49 = vld [vmem:[%s6019_s3] ss:$0 sm:$0xff] }
 0x182   : > { %1383 = vmatpush.msrb.mxu3 %v2853_v41  ;;  %1321 = vmatpush.msrb.mxu0 %v2854_v39  ;;  %6645 = vst [vmem:[#allocation26_spill] sm:$0xff] %v4950_v37  ;;  %v4975_v41 = vld [vmem:[%s6018_s2 + $0x18] sm:$0xff]  ;;  %v4988_v39 = vld [vmem:[%s6018_s2 + $0x10] sm:$0xff] }
 0x183   : > { %1341 = vmatpush.msrb.mxu1 %v2855_v46  ;;  %1364 = vmatpush.msrb.mxu2 %v2856_v50  ;;  %6648 = vst [vmem:[#allocation45_spill] sm:$0xff] %v4975_v41  ;;  %v4993_v46 = vld [vmem:[%s6018_s2 + $0x68] sm:$0xff] }
 0x184   : > { %1384 = vmatpush.msrb.mxu3 %v2857_v52  ;;  %1322 = vmatpush.msrb.mxu0 %v2858_v6  ;;  %6650 = vst [vmem:[#allocation50_spill] sm:$0xff] %v4988_v39  ;;  %v5000_v52 = vld [vmem:[%s6018_s2 + $0x8] sm:$0xff]  ;;  %v5005_v6 = vld [vmem:[%s6018_s2 + $0x60] sm:$0xff] }
 0x185   : > { %1342 = vmatpush.msrb.mxu1 %v2859_v7  ;;  %1365 = vmatpush.msrb.mxu2 %v6627_v47  ;;  %v2862_v47 = vld [vmem:[%s6017_s1 + $0x320] sm:$0xff]  ;;  %6651 = vst [vmem:[#allocation53_spill] sm:$0xff] %v4993_v46 }
 0x186   : > { %1385 = vmatpush.msrb.mxu3 %v6628_v51  ;;  %1323 = vmatpush.msrb.mxu0 %v2860_v38  ;;  %v2863_v51 = vld [vmem:[%s6017_s1 + $0x3a0] sm:$0xff]  ;;  %6652 = vst [vmem:[#allocation54_spill] sm:$0xff] %v5000_v52  ;;  %v5017_v38 = vld [vmem:[%s6018_s2 + $0x58] sm:$0xff] }
 0x187   : > { %1343 = vmatpush.msrb.mxu1 %v2861_v10  ;;  %1366 = vmatpush.msrb.mxu2 %v6629_v63  ;;  %v2864_v63 = vld [vmem:[%s6017_s1 + $0x318] sm:$0xff]  ;;  %6653 = vst [vmem:[#allocation57_spill] sm:$0xff] %v5005_v6  ;;  %v5012_v7 = vld [vmem:[%s6018_s2] sm:$0xff] }
 0x188   : > { %1386 = vmatpush.msrb.mxu3 %v6630_v0  ;;  %1324 = vmatpush.msrb.mxu0 %v2862_v47  ;;  %v2865_v0 = vld [vmem:[%s6017_s1 + $0x398] sm:$0xff]  ;;  %6654 = vst [vmem:[#allocation58_spill] sm:$0xff] %v5012_v7  ;;  %v5032_v47 = vld [vmem:[%s6018_s2 + $0x100] sm:$0xf] }
 0x189   : > { %1344 = vmatpush.msrb.mxu1 %v2863_v51  ;;  %1367 = vmatpush.msrb.mxu2 %v6631_v30  ;;  %v890_v30 = vpop.f32.mrf.mxu3  ;;  %6655 = vst [vmem:[#allocation61_spill] sm:$0xff] %v5017_v38  ;;  %v5037_v51 = vld [vmem:[%s6018_s2 + $0x158] sm:$0xf] }
 0x18a   : > { %1387 = vmatpush.msrb.mxu3 %v6632_v26  ;;  %1325 = vmatpush.msrb.mxu0 %v2864_v63  ;;  %v2866_v26 = vld [vmem:[%s6017_s1 + $0x310] sm:$0xff]  ;;  %v894_v42 = vadd.f32 %v890_v30, %v851_v18  ;;  %v5056_v63 = vld [vmem:[%s6018_s2 + $0x260] sm:$0xf]  ;;  %v5073_v30 = vld [vmem:[%s6018_s2 + $0x148] sm:$0xff] }
 0x18b   : > { %1345 = vmatpush.msrb.mxu1 %v2865_v0  ;;  %1368 = vmatpush.msrb.mxu2 %v6633_v62  ;;  %v512_v62 = vadd.f32 %v4686_v54, %v4676_v48  ;;  %v2871_v48 = vld [vmem:[%s6017_s1 + $0x380] sm:$0xff]  ;;  %v2489_v54 = vld [vmem:[%s3720_s16 + $0x19] sm:$0x7f]  ;;  %6656 = vst [vmem:[#allocation62_spill] sm:$0xff] %v5056_v63  ;;  %s2267_s16 = scalar_lea.sflag [#allocation3], %s377_s15 }
 0x18c   : > { %1388 = vmatpush.msrb.mxu3 %v6634_v31  ;;  %1326 = vmatpush.msrb.mxu0 %v2866_v26  ;;  %v2868_v31 = vld [vmem:[%s6017_s1 + $0x308] sm:$0xff]  ;;  %v5063_v0 = vld [vmem:[%s6018_s2 + $0x2b8] sm:$0xf] }
 0x18d   : > { %1346 = vmatpush.msrb.mxu1 %v2867_v20  ;;  %1369 = vmatpush.msrb.mxu2 %v6635_v5  ;;  %v831_v5 = vadd.f32 %v830_v53, %v790_v43  ;;  %v610_v35 = vadd.f32 %v4735_v60, %v512_v62  ;;  %v955_v60 = vpop.f32.mrf.mxu2  ;;  %v4980_v43 = vld [vmem:[%s6018_s2 + $0x70] sm:$0xff]  ;;  %v5046_v53 = vld [vmem:[%s6018_s2 + $0xf8] sm:$0xff]  ;;  %6657 = vst [vmem:[#allocation65_spill] sm:$0xff] %v5063_v0  ;;  %v5092_v62 = vld [vmem:[%s6018_s2 + $0xe8] sm:$0xff] }
 0x18e   : > { %1389 = vmatpush.msrb.mxu3 %v6636_v4  ;;  %1327 = vmatpush.msrb.mxu0 %v2868_v31  ;;  %v2870_v4 = vld [vmem:[%s6017_s1 + $0x300] sm:$0xff]  ;;  %6649 = vst [vmem:[#allocation49_spill] sm:$0xff] %v4980_v43  ;;  %v5082_v26 = vld [vmem:[%s6018_s2 + $0x258] sm:$0xff]  ;;  %v5087_v20 = vld [vmem:[%s6018_s2 + $0x2b0] sm:$0xff] }
 0x18f   : > { %1347 = vmatpush.msrb.mxu1 %v2869_v15  ;;  %1370 = vmatpush.msrb.mxu2 %v6637_v13  ;;  %v4877_v13 = vld [vmem:[%s6018_s2 + $0x50] sm:$0xf]  ;;  %v688_v9 = vadd.f32 %v4745_v27, %v610_v35  ;;  %6658 = vst [vmem:[#allocation66_spill] sm:$0xff] %v5082_v26  ;;  %v5099_v31 = vld [vmem:[%s6018_s2 + $0x140] sm:$0xff]  ;;  %v5121_v18 = vld [vmem:[%s6018_s2 + $0x138] sm:$0xff] }
 0x190   : > { %1390 = vmatpush.msrb.mxu3 %v6638_v12  ;;  %1328 = vmatpush.msrb.mxu0 %v2870_v4  ;;  %v4882_v12 = vld [vmem:[%s6018_s2 + $0xa8] sm:$0xf]  ;;  %6659 = vst [vmem:[#allocation115_spill] sm:$0xff] %v5087_v20  ;;  %v5104_v15 = vld [vmem:[%s6018_s2 + $0x250] sm:$0xff] }
 0x191   : > { %1348 = vmatpush.msrb.mxu1 %v2871_v48  ;;  %1371 = vmatpush.msrb.mxu2 %v6639_v24  ;;  %v611_v24 = vadd.f32 %v4737_v34, %v532_v56  ;;  %v975_v58 = vpop.f32.mrf.mxu3  ;;  %v936_v34 = vadd.f32 %v932_v61, %v894_v42  ;;  %v765_v27 = vadd.f32 %v4791_v23, %v688_v9  ;;  %v4962_v23 = vld [vmem:[%s6018_s2 + $0x20] sm:$0xff]  ;;  %v5109_v56 = vld [vmem:[%s6018_s2 + $0x2a8] sm:$0xff]  ;;  %v5145_v35 = vld [vmem:[%s6018_s2 + $0x130] sm:$0xff] }
 0x192   : > { %1391 = vmatpush.msrb.mxu3 %v6640_v25  ;;  %1329 = vmatmul.f32.vlgmr.msrb.gmra.mxu0 %v4478_v21  ;;  %v893_v25 = vadd.f32 %v870_v14, %v831_v5  ;;  %6646 = vst [vmem:[#allocation34_spill] sm:$0xff] %v4962_v23  ;;  %v5068_v14 = vld [vmem:[%s6018_s2 + $0xf0] sm:$0xff]  ;;  %v5116_v5 = vld [vmem:[%s6018_s2 + $0xe0] sm:$0xff]  ;;  %v5128_v4 = vld [vmem:[%s6018_s2 + $0x248] sm:$0xff] }
 0x193   : > { %1349 = vmatmul.f32.vlgmr.msrb.gmra.mxu1 %v4478_v21  ;;  %1372 = vmatmul.f32.vlgmr.msrb.gmra.mxu2 %v2489_v54  ;;  %v689_v8 = vadd.f32 %v4747_v1, %v611_v24  ;;  %v979_v16 = vadd.f32 %v975_v58, %v936_v34  ;;  %6660 = vst [vmem:[#allocation69_spill] sm:$0xff] %v5104_v15  ;;  %v5133_v48 = vld [vmem:[%s6018_s2 + $0x2a0] sm:$0xff]  ;;  %v5157_v61 = vld [vmem:[%s6018_s2 + $0x298] sm:$0xff]  ;;  %v5164_v24 = vld [vmem:[%s6018_s2 + $0xd0] sm:$0xff] }
 0x194   : > { %1392 = vmatmul.f32.vlgmr.msrb.gmra.mxu3 %v2489_v54  ;;  %2527 = vmatpush.msk.msra.mxu2 %vm1443_vm0, %v4877_v13  ;;  %v935_v21 = vadd.f32 %v912_v3, %v893_v25  ;;  %6661 = vst [vmem:[#allocation70_spill] sm:$0xff] %v5109_v56  ;;  %v5140_v54 = vld [vmem:[%s6018_s2 + $0xd8] sm:$0xff]  ;;  %v5152_v3 = vld [vmem:[%s6018_s2 + $0x240] sm:$0xff]  ;;  %v5169_v25 = vld [vmem:[%s6018_s2 + $0x128] sm:$0xff] }
 0x195   : > { %2529 = vmatpush.msk.msra.mxu3 %vm1443_vm0, %v4882_v12  ;;  %v766_v1 = vadd.f32 %v4793_v36, %v689_v8  ;;  %v4967_v36 = vld [vmem:[%s6018_s2 + $0x78] sm:$0xff]  ;;  %2512 = vmatpush.msk.msra.mxu0 %vm1443_vm0, %v5032_v47  ;;  %6662 = vst [vmem:[#allocation73_spill] sm:$0xff] %v5128_v4  ;;  %v5188_v58 = vld [vmem:[%s6018_s2 + $0xc8] sm:$0xff]  ;;  %v5200_v34 = vld [vmem:[%s6018_s2 + $0x230] sm:$0xff] }
 0x196   : > { %1514 = vmatpush.msra.mxu2 %v4891_v57  ;;  %v978_v17 = vadd.f32 %v955_v60, %v935_v21  ;;  %6647 = vst [vmem:[#allocation37_spill] sm:$0xff] %v4967_v36  ;;  %2525 = vmatpush.msk.msra.mxu1 %vm1443_vm0, %v5037_v51  ;;  %v5176_v42 = vld [vmem:[%s6018_s2 + $0x238] sm:$0xff]  ;;  %v5181_v60 = vld [vmem:[%s6018_s2 + $0x290] sm:$0xff]  ;;  %v5193_v21 = vld [vmem:[%s6018_s2 + $0x120] sm:$0xff] }
 0x197   : > { %1537 = vmatpush.msra.mxu3 %v4896_v2  ;;  %v767_v44 = vmax.f32 %v765_v27, %v766_v1  ;;  %1453 = vmatpush.msra.mxu0 %v5046_v53  ;;  %6663 = vst [vmem:[#allocation74_spill] sm:$0xff] %v5133_v48  ;;  %v5205_v9 = vld [vmem:[%s6018_s2 + $0x288] sm:$0xff]  ;;  %v5212_v8 = vld [vmem:[%s6018_s2 + $0xc0] sm:$0xff]  ;;  %v5236_v1 = vld [vmem:[%s6018_s2 + $0xb8] sm:$0xff] }
 0x198   : > { %1515 = vmatpush.msra.mxu2 %v4905_v55  ;;  %v980_v22 = vmax.f32 %v978_v17, %v979_v16  ;;  %1488 = vmatpush.msra.mxu1 %v5051_v11  ;;  %6664 = vst [vmem:[#allocation77_spill] sm:$0xff] %v5152_v3  ;;  %v5217_v17 = vld [vmem:[%s6018_s2 + $0x118] sm:$0xff]  ;;  %v5224_v16 = vld [vmem:[%s6018_s2 + $0x228] sm:$0xff]  ;;  %v5229_v27 = vld [vmem:[%s6018_s2 + $0x280] sm:$0xff] }
 0x199   : > { %1538 = vmatpush.msra.mxu3 %v4910_v59  ;;  %v772_v45 = vadd.f32 %v4957_v49, %v767_v44  ;;  %1454 = vmatpush.msra.mxu0 %v5068_v14  ;;  %6665 = vst [vmem:[#allocation78_spill] sm:$0xff] %v5157_v61  ;;  %v5248_v44 = vld [vmem:[%s6018_s2 + $0x220] sm:$0xff] }
 0x19a   : > { %1516 = vmatpush.msra.mxu2 %v4919_v19  ;;  %v981_v40 = vadd.f32 %v4957_v49, %v980_v22  ;;  %1489 = vmatpush.msra.mxu1 %v5073_v30  ;;  %6666 = vst [vmem:[#allocation81_spill] sm:$0xff] %v5176_v42  ;;  %v5241_v22 = vld [vmem:[%s6018_s2 + $0x110] sm:$0xff] }
 0x19b   : > { %1539 = vmatpush.msra.mxu3 %v4924_v28  ;;  %1455 = vmatpush.msra.mxu0 %v5092_v62  ;;  %6667 = vst [vmem:[#allocation82_spill] sm:$0xff] %v5181_v60 }
 0x19c   : > { %1517 = vmatpush.msra.mxu2 %v4933_v29  ;;  %v1400_v50 = vmax.f32 %v772_v45, %v981_v40  ;;  %1490 = vmatpush.msra.mxu1 %v5099_v31  ;;  %6668 = vst [vmem:[#allocation85_spill] sm:$0xff] %v5200_v34  ;;  %v5253_v40 = vld [vmem:[%s6018_s2 + $0x278] sm:$0xff]  ;;  %v5260_v45 = vld [vmem:[%s6018_s2 + $0xb0] sm:$0xff] }
 0x19d   : > { %1540 = vmatpush.msra.mxu3 %v4938_v33  ;;  %1456 = vmatpush.msra.mxu0 %v5116_v5  ;;  %6669 = vst [vmem:[#allocation86_spill] sm:$0xff] %v5205_v9 }
 0x19e   : > { %1518 = vmatpush.msra.mxu2 %v4945_v32  ;;  %v5021_v10 = vmax.f32 %v1400_v50, 0.0  ;;  %1491 = vmatpush.msra.mxu1 %v5121_v18  ;;  %6670 = vst [vmem:[#allocation89_spill] sm:$0xff] %v5224_v16  ;;  %v5265_v50 = vld [vmem:[%s6018_s2 + $0x108] sm:$0xff] }
 0x19f   : > { %1541 = vmatpush.msra.mxu3 %v4950_v37  ;;  %1457 = vmatpush.msra.mxu0 %v5140_v54  ;;  %6671 = vst [vmem:[#allocation90_spill] sm:$0xff] %v5229_v27 }
 0x1a0   : > { %1519 = vmatpush.msra.mxu2 %v4962_v23  ;;  %1492 = vmatpush.msra.mxu1 %v5145_v35  ;;  %6672 = vst [vmem:[#allocation93_spill] sm:$0xff] %v5248_v44 }
 0x1a1   : > { %1542 = vmatpush.msra.mxu3 %v4967_v36  ;;  %1458 = vmatpush.msra.mxu0 %v5164_v24  ;;  %6673 = vst [vmem:[#allocation94_spill] sm:$0xff] %v5253_v40 }
 0x1a2   : > { %1520 = vmatpush.msra.mxu2 %v4975_v41  ;;  %1493 = vmatpush.msra.mxu1 %v5169_v25 }
 0x1a3   : > { %1543 = vmatpush.msra.mxu3 %v4980_v43  ;;  %1459 = vmatpush.msra.mxu0 %v5188_v58 }
 0x1a4   : > { %1521 = vmatpush.msra.mxu2 %v4988_v39  ;;  %1494 = vmatpush.msra.mxu1 %v5193_v21 }
 0x1a5   : > { %1544 = vmatpush.msra.mxu3 %v4993_v46  ;;  %1460 = vmatpush.msra.mxu0 %v5212_v8 }
 0x1a6   : > { %1522 = vmatpush.msra.mxu2 %v5000_v52  ;;  %1495 = vmatpush.msra.mxu1 %v5217_v17 }
 0x1a7   : > { %1545 = vmatpush.msra.mxu3 %v5005_v6  ;;  %1461 = vmatpush.msra.mxu0 %v5236_v1 }
 0x1a8   : > { %1523 = vmatpush.msra.mxu2 %v5012_v7  ;;  %1496 = vmatpush.msra.mxu1 %v5241_v22 }
 0x1a9   : > { %1546 = vmatpush.msra.mxu3 %v5017_v38  ;;  %2528 = vmatmul.msk.f32.vlgmr.msra.gmra.mxu2 %vm1439_vm1, %v5021_v10 }
 0x1aa   : > { %2530 = vmatmul.msk.f32.vlgmr.msra.gmra.mxu3 %vm1439_vm1, %v5021_v10  ;;  %2568 = vmatpush.msk.msrb.mxu2 %vm1443_vm0, %v5056_v63 }
 0x1ab   : > { %2581 = vmatpush.msk.msrb.mxu3 %vm1443_vm0, %v5063_v0  ;;  %1462 = vmatpush.msra.mxu0 %v5260_v45 }
 0x1ac   : > { %1650 = vmatpush.msrb.mxu2 %v5082_v26  ;;  %1497 = vmatpush.msra.mxu1 %v5265_v50 }
 0x1ad   : > { %1685 = vmatpush.msrb.mxu3 %v5087_v20 }
 0x1ae   : > { %1651 = vmatpush.msrb.mxu2 %v5104_v15 }
 0x1af   : > { %1686 = vmatpush.msrb.mxu3 %v5109_v56 }
 0x1b0   : > { %1652 = vmatpush.msrb.mxu2 %v5128_v4  ;;  %v5363_v4 = vld [vmem:[%s6018_s2 + $0x1e8] sm:$0xff] }
 0x1b1   : > { %1687 = vmatpush.msrb.mxu3 %v5133_v48  ;;  %v5358_v48 = vld [vmem:[%s6018_s2 + $0x190] sm:$0xff] }
 0x1b2   : > { %1653 = vmatpush.msrb.mxu2 %v5152_v3  ;;  %v1059_v3 = vpop.f32.mrf.mxu3 }
 0x1b3   : > { %1688 = vmatpush.msrb.mxu3 %v5157_v61  ;;  %v1039_v61 = vpop.f32.mrf.mxu2 }
 0x1b4   : > { %1654 = vmatpush.msrb.mxu2 %v5176_v42  ;;  %v5313_v42 = vld [vmem:[%s6018_s2 + $0x200] sm:$0xff] }
 0x1b5   : > { %1689 = vmatpush.msrb.mxu3 %v5181_v60  ;;  %v5308_v60 = vld [vmem:[%s6018_s2 + $0x1a8] sm:$0xff] }
 0x1b6   : > { %1655 = vmatpush.msrb.mxu2 %v5200_v34  ;;  %v5289_v34 = vld [vmem:[%s6018_s2 + $0x208] sm:$0xf] }
 0x1b7   : > { %1690 = vmatpush.msrb.mxu3 %v5205_v9  ;;  %v5284_v9 = vld [vmem:[%s6018_s2 + $0x1b0] sm:$0xf]  ;;  %2555 = vmatpush.msk.msrb.mxu1 %vm1443_vm0, %v5289_v34 }
 0x1b8   : > { %1656 = vmatpush.msrb.mxu2 %v5224_v16  ;;  %v5272_v16 = vld [vmem:[%s6018_s2 + $0x218] sm:$0xff]  ;;  %2542 = vmatpush.msk.msrb.mxu0 %vm1443_vm0, %v5284_v9 }
 0x1b9   : > { %1691 = vmatpush.msrb.mxu3 %v5229_v27  ;;  %6674 = vst [vmem:[#allocation97_spill] sm:$0xff] %v5272_v16  ;;  %v5277_v27 = vld [vmem:[%s6018_s2 + $0x270] sm:$0xff]  ;;  %1610 = vmatpush.msrb.mxu1 %v5313_v42 }
 0x1ba   : > { %6675 = vst [vmem:[#allocation98_spill] sm:$0xff] %v5277_v27  ;;  %1657 = vmatpush.msrb.mxu2 %v5248_v44  ;;  %v5296_v44 = vld [vmem:[%s6018_s2 + $0x210] sm:$0xff]  ;;  %1575 = vmatpush.msrb.mxu0 %v5308_v60  ;;  %v1141_v15 = vpop.f32.mrf.mxu3 }
 0x1bb   : > { %1692 = vmatpush.msrb.mxu3 %v5253_v40  ;;  %6676 = vst [vmem:[#allocation101_spill] sm:$0xff] %v5296_v44  ;;  %v5301_v40 = vld [vmem:[%s6018_s2 + $0x268] sm:$0xff]  ;;  %v1121_v56 = vpop.f32.mrf.mxu2 }
 0x1bc   : > { %6677 = vst [vmem:[#allocation102_spill] sm:$0xff] %v5301_v40  ;;  %1658 = vmatpush.msrb.mxu2 %v5272_v16  ;;  %v5329_v16 = vpop.f32.mrf.mxu1 }
 0x1bd   : > { %1693 = vmatpush.msrb.mxu3 %v5277_v27  ;;  %v5327_v27 = vpop.f32.mrf.mxu0 }
 0x1be   : > { %1659 = vmatpush.msrb.mxu2 %v5296_v44  ;;  %v5334_v44 = vld [vmem:[%s6018_s2 + $0x1a0] sm:$0xff] }
 0x1bf   : > { %1694 = vmatpush.msrb.mxu3 %v5301_v40  ;;  %v5339_v40 = vld [vmem:[%s6018_s2 + $0x1f8] sm:$0xff]  ;;  %1576 = vmatpush.msrb.mxu0 %v5334_v44 }
 0x1c0   : > { %2609 = vmatpush.msk.msra.mxu2 %vm1443_vm0, %v5032_v47  ;;  %v5344_v47 = vld [vmem:[%s6018_s2 + $0x198] sm:$0xff]  ;;  %1611 = vmatpush.msrb.mxu1 %v5339_v40 }
 0x1c1   : > { %2611 = vmatpush.msk.msra.mxu3 %vm1443_vm0, %v5037_v51  ;;  %v5351_v51 = vld [vmem:[%s6018_s2 + $0x1f0] sm:$0xff]  ;;  %1577 = vmatpush.msrb.mxu0 %v5344_v47 }
 0x1c2   : > { %1788 = vmatpush.msra.mxu2 %v5046_v53  ;;  %1612 = vmatpush.msrb.mxu1 %v5351_v51  ;;  %v5376_v53 = vld [vmem:[%s6018_s2 + $0x188] sm:$0xff] }
 0x1c3   : > { %1808 = vmatpush.msra.mxu3 %v5051_v11  ;;  %1578 = vmatpush.msrb.mxu0 %v5358_v48  ;;  %v5381_v11 = vld [vmem:[%s6018_s2 + $0x1e0] sm:$0xff] }
 0x1c4   : > { %1789 = vmatpush.msra.mxu2 %v5068_v14  ;;  %1613 = vmatpush.msrb.mxu1 %v5363_v4  ;;  %v5390_v14 = vld [vmem:[%s6018_s2 + $0x180] sm:$0xff] }
 0x1c5   : > { %1809 = vmatpush.msra.mxu3 %v5073_v30  ;;  %1579 = vmatpush.msrb.mxu0 %v5376_v53  ;;  %v5395_v30 = vld [vmem:[%s6018_s2 + $0x1d8] sm:$0xff] }
 0x1c6   : > { %1790 = vmatpush.msra.mxu2 %v5092_v62  ;;  %1614 = vmatpush.msrb.mxu1 %v5381_v11  ;;  %v1079_v62 = vpop.f32.mrf.mxu0 }
 0x1c7   : > { %1810 = vmatpush.msra.mxu3 %v5099_v31  ;;  %1580 = vmatpush.msrb.mxu0 %v5390_v14  ;;  %v1099_v31 = vpop.f32.mrf.mxu1 }
 0x1c8   : > { %1791 = vmatpush.msra.mxu2 %v5116_v5  ;;  %1615 = vmatpush.msrb.mxu1 %v5395_v30  ;;  %v5404_v5 = vld [vmem:[%s6018_s2 + $0x178] sm:$0xff] }
 0x1c9   : > { %1811 = vmatpush.msra.mxu3 %v5121_v18  ;;  %v5409_v18 = vld [vmem:[%s6018_s2 + $0x1d0] sm:$0xff]  ;;  %1581 = vmatpush.msrb.mxu0 %v5404_v5 }
 0x1ca   : > { %1792 = vmatpush.msra.mxu2 %v5140_v54  ;;  %1616 = vmatpush.msrb.mxu1 %v5409_v18  ;;  %v5418_v54 = vld [vmem:[%s6018_s2 + $0x170] sm:$0xff] }
 0x1cb   : > { %1812 = vmatpush.msra.mxu3 %v5145_v35  ;;  %v5423_v35 = vld [vmem:[%s6018_s2 + $0x1c8] sm:$0xff]  ;;  %1582 = vmatpush.msrb.mxu0 %v5418_v54 }
 0x1cc   : > { %1793 = vmatpush.msra.mxu2 %v5164_v24  ;;  %1617 = vmatpush.msrb.mxu1 %v5423_v35  ;;  %v5432_v24 = vld [vmem:[%s6018_s2 + $0x168] sm:$0xff] }
 0x1cd   : > { %1813 = vmatpush.msra.mxu3 %v5169_v25  ;;  %v5437_v25 = vld [vmem:[%s6018_s2 + $0x1c0] sm:$0xff]  ;;  %1583 = vmatpush.msrb.mxu0 %v5432_v24 }
 0x1ce   : > { %1794 = vmatpush.msra.mxu2 %v5188_v58  ;;  %1618 = vmatpush.msrb.mxu1 %v5437_v25  ;;  %v5444_v58 = vld [vmem:[%s6018_s2 + $0x160] sm:$0xff]  ;;  %v1164_v20 = vpop.f32.mrf.mxu0 }
 0x1cf   : > { %1814 = vmatpush.msra.mxu3 %v5193_v21  ;;  %v5449_v21 = vld [vmem:[%s6018_s2 + $0x1b8] sm:$0xff]  ;;  %1584 = vmatpush.msrb.mxu0 %v5444_v58  ;;  %v1184_v26 = vpop.f32.mrf.mxu1 }
 0x1d0   : > { %1795 = vmatpush.msra.mxu2 %v5212_v8  ;;  %1619 = vmatpush.msrb.mxu1 %v5449_v21  ;;  %v1040_v8 = vadd.f32 %v1039_v61, %v5327_v27 }
 0x1d1   : > { %1815 = vmatpush.msra.mxu3 %v5217_v17  ;;  %v1060_v17 = vadd.f32 %v1059_v3, %v5329_v16 }
 0x1d2   : > { %1796 = vmatpush.msra.mxu2 %v5236_v1  ;;  %v1102_v6 = vadd.f32 %v1079_v62, %v1040_v8 }
 0x1d3   : > { %1816 = vmatpush.msra.mxu3 %v5241_v22  ;;  %v1103_v52 = vadd.f32 %v1099_v31, %v1060_v17  ;;  %v6701_v17 = vld [vmem:[#allocation78_spill] sm:$0xff] }
 0x1d4   : > { %1797 = vmatpush.msra.mxu2 %v5260_v45  ;;  %v1144_v41 = vadd.f32 %v1121_v56, %v1102_v6  ;;  %v5585_v56 = vld [vmem:[%s6018_s2 + $0x330] sm:$0xff] }
 0x1d5   : > { %1817 = vmatpush.msra.mxu3 %v5265_v50  ;;  %v1145_v22 = vadd.f32 %v1141_v15, %v1103_v52  ;;  %v5580_v15 = vld [vmem:[%s6018_s2 + $0x2d8] sm:$0xff] }
 0x1d6   : > { %v1187_v37 = vadd.f32 %v1164_v20, %v1144_v41  ;;  %v5468_v41 = vld [vmem:[%s6018_s2 + $0x310] sm:$0xf]  ;;  %v5571_v20 = vld [vmem:[%s6018_s2 + $0x338] sm:$0xff] }
 0x1d7   : > { %v1188_v45 = vadd.f32 %v1184_v26, %v1145_v22  ;;  %v5566_v26 = vld [vmem:[%s6018_s2 + $0x2e0] sm:$0xff]  ;;  %v6703_v22 = vld [vmem:[#allocation82_spill] sm:$0xff] }
 0x1d9   : > { %v1189_v16 = vmax.f32 %v1187_v37, %v1188_v45  ;;  %v5490_v37 = vld [vmem:[%s6018_s2 + $0x360] sm:$0xff] }
 0x1da   : > { %v6704_v45 = vld [vmem:[#allocation85_spill] sm:$0xff] }
 0x1db   : > { %v1190_v8 = vadd.f32 %v4957_v49, %v1189_v16  ;;  %v6709_v16 = vld [vmem:[#allocation94_spill] sm:$0xff] }
 0x1ec   : > { %v1208_v0 = vpop.f32.mrf.mxu2 }
 0x1ed   : > { %v1228_v63 = vpop.f32.mrf.mxu3 }
 0x1f4   : > { %v1248_v38 = vpop.f32.mrf.mxu0 }
 0x1f5   : > { %v1268_v7 = vpop.f32.mrf.mxu1  ;;  %v1288_v46 = vpop.f32.mrf.mxu2  ;;  %v1249_v43 = vadd.f32 %v1248_v38, %v1208_v0  ;;  %v5541_v38 = vld [vmem:[%s6018_s2 + $0x348] sm:$0xff]  ;;  %v5555_v0 = vld [vmem:[%s6018_s2 + $0x340] sm:$0xff] }
 0x1f6   : > { %v1308_v39 = vpop.f32.mrf.mxu3  ;;  %v1269_v1 = vadd.f32 %v1268_v7, %v1228_v63  ;;  %v5550_v63 = vld [vmem:[%s6018_s2 + $0x2e8] sm:$0xff] }
 0x1f7   : > { %v1311_v32 = vadd.f32 %v1288_v46, %v1249_v43  ;;  %v5524_v43 = vld [vmem:[%s6018_s2 + $0x350] sm:$0xff] }
 0x1f8   : > { %v1312_v50 = vadd.f32 %v1308_v39, %v1269_v1  ;;  %v1563_v39 = vrot.slane %v5021_v10, 1  ;;  %v5536_v46 = vld [vmem:[%s6018_s2 + $0x2f0] sm:$0xff]  ;;  %v6702_v1 = vld [vmem:[#allocation81_spill] sm:$0xff] }
 0x20f   : > { %v1330_v36 = vpop.f32.mrf.mxu0 }
 0x210   : > { %v1350_v23 = vpop.f32.mrf.mxu1  ;;  %v1353_v33 = vadd.f32 %v1330_v36, %v1311_v32  ;;  %v5473_v32 = vld [vmem:[%s6018_s2 + $0x368] sm:$0xf]  ;;  %v5519_v36 = vld [vmem:[%s6018_s2 + $0x2f8] sm:$0xff] }
 0x211   : > { %v1354_v61 = vadd.f32 %v1350_v23, %v1312_v50  ;;  %v5508_v23 = vld [vmem:[%s6018_s2 + $0x358] sm:$0xff]  ;;  %v6705_v50 = vld [vmem:[#allocation86_spill] sm:$0xff] }
 0x216   : > { %v1373_v27 = vpop.f32.mrf.mxu2 }
 0x217   : > { %v1393_v3 = vpop.f32.mrf.mxu3  ;;  %v1396_v29 = vadd.f32 %v1373_v27, %v1353_v33  ;;  %v5485_v33 = vld [vmem:[%s6018_s2 + $0x308] sm:$0xff] }
 0x218   : > { %v1397_v62 = vadd.f32 %v1393_v3, %v1354_v61  ;;  %v6706_v61 = vld [vmem:[#allocation89_spill] sm:$0xff]  ;;  %v6707_v27 = vld [vmem:[#allocation90_spill] sm:$0xff] }
 0x219   : > { %v6708_v3 = vld [vmem:[#allocation93_spill] sm:$0xff] }
 0x21a   : > { %v1398_v31 = vmax.f32 %v1396_v29, %v1397_v62  ;;  %v6710_v62 = vld [vmem:[#allocation97_spill] sm:$0xff] }
 0x21c   : > { %v1399_v7 = vadd.f32 %v4957_v49, %v1398_v31  ;;  %v5503_v49 = vld [vmem:[%s6018_s2 + $0x300] sm:$0xff]  ;;  %v6711_v31 = vld [vmem:[#allocation98_spill] sm:$0xff] }
 0x21e   : > { %v1402_v6 = vmax.f32 %v1190_v8, %v1399_v7  ;;  %v6712_v8 = vld [vmem:[#allocation101_spill] sm:$0xff]  ;;  %v6713_v7 = vld [vmem:[#allocation102_spill] sm:$0xff] }
 0x220   : > { %v5463_v52 = vmax.f32 %v1402_v6, 0.0  ;;  %v2005_v6 = vld [vmem:[%s6021_s5 + $0x48] sm:$0xff] }
 0x222   : > { %2513 = vmatmul.msk.f32.vlgmr.msra.gmra.mxu0 %vm1439_vm1, %v5463_v52  ;;  %2526 = vmatmul.msk.f32.vlgmr.msra.gmra.mxu1 %vm1439_vm1, %v5463_v52  ;;  %v5480_v29 = vrot.slane %v5463_v52, 1 }
 0x223   : > { %2594 = vmatpush.msk.msra.mxu0 %vm1443_vm0, %v5468_v41  ;;  %2607 = vmatpush.msk.msra.mxu1 %vm1443_vm0, %v5473_v32 }
 0x224   : > { %2569 = vmatmul.msk.f32.vlgmr.msrb.gmra.mxu2 %vm1439_vm1, %v5480_v29  ;;  %2582 = vmatmul.msk.f32.vlgmr.msrb.gmra.mxu3 %vm1439_vm1, %v5480_v29 }
 0x225   : > { %1725 = vmatpush.msra.mxu0 %v5485_v33  ;;  %1760 = vmatpush.msra.mxu1 %v5490_v37 }
 0x226   : > { %2617 = vmatpush.msk.msrb.mxu2 %vm1443_vm0, %v5284_v9  ;;  %2619 = vmatpush.msk.msrb.mxu3 %vm1443_vm0, %v5289_v34  ;;  %v5618_v34 = vld [vmem:[%s6018_s2 + $0x2c0] sm:$0xff]  ;;  %v2596_v9 = vld [vmem:[%s6018_s2 + $0x318] sm:$0xff] }
 0x227   : > { %1726 = vmatpush.msra.mxu0 %v5503_v49  ;;  %1761 = vmatpush.msra.mxu1 %v5508_v23 }
 0x228   : > { %1868 = vmatpush.msrb.mxu2 %v5308_v60  ;;  %1888 = vmatpush.msrb.mxu3 %v5313_v42  ;;  %v2584_v42 = vld [vmem:[%s6018_s2 + $0x2c8] sm:$0xff]  ;;  %v2597_v60 = vld [vmem:[%s6018_s2 + $0x320] sm:$0xff] }
 0x229   : > { %1727 = vmatpush.msra.mxu0 %v5519_v36  ;;  %1762 = vmatpush.msra.mxu1 %v5524_v43 }
 0x22a   : > { %1869 = vmatpush.msrb.mxu2 %v5334_v44  ;;  %1889 = vmatpush.msrb.mxu3 %v5339_v40  ;;  %v5627_v44 = vrot.slane %v5021_v10, 2  ;;  %v6686_v10 = vld [vmem:[#allocation50_spill] sm:$0xff]  ;;  %v6687_v40 = vld [vmem:[#allocation53_spill] sm:$0xff] }
 0x22b   : > { %2543 = vmatmul.msk.f32.vlgmr.msrb.gmra.mxu0 %vm1439_vm1, %v1563_v39  ;;  %2556 = vmatmul.msk.f32.vlgmr.msrb.gmra.mxu1 %vm1439_vm1, %v1563_v39 }
 0x22c   : > { %1728 = vmatpush.msra.mxu0 %v5536_v46  ;;  %1763 = vmatpush.msra.mxu1 %v5541_v38 }
 0x22d   : > { %1870 = vmatpush.msrb.mxu2 %v5344_v47  ;;  %1890 = vmatpush.msrb.mxu3 %v5351_v51  ;;  %v6688_v47 = vld [vmem:[#allocation54_spill] sm:$0xff]  ;;  %v6689_v51 = vld [vmem:[#allocation57_spill] sm:$0xff] }
 0x22e   : > { %1729 = vmatpush.msra.mxu0 %v5550_v63  ;;  %1764 = vmatpush.msra.mxu1 %v5555_v0 }
 0x22f   : > { %2610 = vmatmul.msk.f32.vlgmr.msra.gmra.mxu2 %vm1439_vm1, %v1563_v39  ;;  %2612 = vmatmul.msk.f32.vlgmr.msra.gmra.mxu3 %vm1439_vm1, %v1563_v39  ;;  %v2635_v39 = vld [vmem:[%s6021_s5 + $0x78] sm:$0xff] }
 0x230   : > { %1871 = vmatpush.msrb.mxu2 %v5358_v48  ;;  %1891 = vmatpush.msrb.mxu3 %v5363_v4  ;;  %v5594_v4 = vld [vmem:[%s6018_s2 + $0x2d0] sm:$0xff]  ;;  %v5599_v48 = vld [vmem:[%s6018_s2 + $0x328] sm:$0xff] }
 0x231   : > { %1730 = vmatpush.msra.mxu0 %v5566_v26  ;;  %1765 = vmatpush.msra.mxu1 %v5571_v20 }
 0x232   : > { %1872 = vmatpush.msrb.mxu2 %v5376_v53  ;;  %1892 = vmatpush.msrb.mxu3 %v5381_v11  ;;  %v6690_v53 = vld [vmem:[#allocation58_spill] sm:$0xff]  ;;  %v6691_v11 = vld [vmem:[#allocation61_spill] sm:$0xff] }
 0x233   : > { %1731 = vmatpush.msra.mxu0 %v5580_v15  ;;  %1766 = vmatpush.msra.mxu1 %v5585_v56 }
 0x234   : > { %1873 = vmatpush.msrb.mxu2 %v5390_v14  ;;  %1893 = vmatpush.msrb.mxu3 %v5395_v30  ;;  %v6692_v14 = vld [vmem:[#allocation62_spill] sm:$0xff]  ;;  %v6693_v30 = vld [vmem:[#allocation65_spill] sm:$0xff] }
 0x235   : > { %1732 = vmatpush.msra.mxu0 %v5594_v4  ;;  %1767 = vmatpush.msra.mxu1 %v5599_v48 }
 0x236   : > { %1874 = vmatpush.msrb.mxu2 %v5404_v5  ;;  %1894 = vmatpush.msrb.mxu3 %v5409_v18  ;;  %v1946_v5 = vrot.slane %v5463_v52, 2  ;;  %v6694_v18 = vld [vmem:[#allocation66_spill] sm:$0xff] }
 0x237   : > { %1733 = vmatpush.msra.mxu0 %v2584_v42  ;;  %1768 = vmatpush.msra.mxu1 %v2597_v60 }
 0x238   : > { %1875 = vmatpush.msrb.mxu2 %v5418_v54  ;;  %1895 = vmatpush.msrb.mxu3 %v5423_v35  ;;  %v6695_v54 = vld [vmem:[#allocation115_spill] sm:$0xff]  ;;  %v6696_v35 = vld [vmem:[#allocation69_spill] sm:$0xff] }
 0x239   : > { %1734 = vmatpush.msra.mxu0 %v5618_v34  ;;  %1769 = vmatpush.msra.mxu1 %v2596_v9 }
 0x23a   : > { %1876 = vmatpush.msrb.mxu2 %v5432_v24  ;;  %1896 = vmatpush.msrb.mxu3 %v5437_v25  ;;  %v6697_v24 = vld [vmem:[#allocation70_spill] sm:$0xff]  ;;  %v6698_v25 = vld [vmem:[#allocation73_spill] sm:$0xff] }
 0x23b   : > { %2595 = vmatmul.msk.f32.vlgmr.msra.gmra.mxu0 %vm1439_vm1, %v5627_v44  ;;  %2608 = vmatmul.msk.f32.vlgmr.msra.gmra.mxu1 %vm1439_vm1, %v5627_v44 }
 0x23c   : > { %2613 = vmatpush.msk.msrb.mxu0 %vm1443_vm0, %v4877_v13  ;;  %2615 = vmatpush.msk.msrb.mxu1 %vm1443_vm0, %v4882_v12  ;;  %v6678_v13 = vld [vmem:[#allocation21_spill] sm:$0xff]  ;;  %v6679_v12 = vld [vmem:[#allocation22_spill] sm:$0xff] }
 0x23d   : > { %1877 = vmatpush.msrb.mxu2 %v5444_v58  ;;  %1897 = vmatpush.msrb.mxu3 %v5449_v21  ;;  %v6699_v58 = vld [vmem:[#allocation74_spill] sm:$0xff]  ;;  %v6700_v21 = vld [vmem:[#allocation77_spill] sm:$0xff] }
 0x23e   : > { %1828 = vmatpush.msrb.mxu0 %v4891_v57  ;;  %1848 = vmatpush.msrb.mxu1 %v4896_v2  ;;  %v6680_v57 = vld [vmem:[#allocation25_spill] sm:$0xff]  ;;  %v6681_v2 = vld [vmem:[#allocation26_spill] sm:$0xff] }
 0x23f   : > { %2618 = vmatmul.msk.f32.vlgmr.msrb.gmra.mxu2 %vm1439_vm1, %v5480_v29  ;;  %2620 = vmatmul.msk.f32.vlgmr.msrb.gmra.mxu3 %vm1439_vm1, %v5480_v29  ;;  %v2638_v29 = vld [vmem:[%s6021_s5 + $0x90] sm:$0xff] }
 0x240   : > { %2625 = vmatpush.msk.msra.mxu2 %vm1443_vm0, %v5468_v41  ;;  %2627 = vmatpush.msk.msra.mxu3 %vm1443_vm0, %v5473_v32  ;;  %v2639_v41 = vld [vmem:[%s6021_s5 + $0x98] sm:$0xff] }
 0x241   : > { %1829 = vmatpush.msrb.mxu0 %v4905_v55  ;;  %1849 = vmatpush.msrb.mxu1 %v4910_v59  ;;  %v6682_v55 = vld [vmem:[#allocation34_spill] sm:$0xff]  ;;  %v6683_v59 = vld [vmem:[#allocation37_spill] sm:$0xff]  ;;  %v2003_v32 = vld [vmem:[%s6021_s5 + $0x38] sm:$0xff] }
 0x242   : > { %1955 = vmatpush.msra.mxu2 %v5485_v33  ;;  %1975 = vmatpush.msra.mxu3 %v5490_v37  ;;  %v2002_v33 = vld [vmem:[%s6021_s5 + $0x30] sm:$0xff]  ;;  %v2637_v37 = vld [vmem:[%s6021_s5 + $0x88] sm:$0xff] }
 0x243   : > { %1830 = vmatpush.msrb.mxu0 %v4919_v19  ;;  %1850 = vmatpush.msrb.mxu1 %v4924_v28  ;;  %v6684_v19 = vld [vmem:[#allocation45_spill] sm:$0xff] }
 0x244   : > { %1956 = vmatpush.msra.mxu2 %v5503_v49  ;;  %1976 = vmatpush.msra.mxu3 %v5508_v23  ;;  %v6685_v28 = vld [vmem:[#allocation49_spill] sm:$0xff] }
 0x245   : > { %1831 = vmatpush.msrb.mxu0 %v6678_v13  ;;  %1851 = vmatpush.msrb.mxu1 %v6679_v12  ;;  %v2001_v49 = vld [vmem:[%s6021_s5 + $0x28] sm:$0xff]  ;;  %v2636_v23 = vld [vmem:[%s6021_s5 + $0x80] sm:$0xff]  ;;  %v2630_v12 = vld [vmem:[%s6021_s5 + $0x50] sm:$0xff] }
 0x246   : > { %1957 = vmatpush.msra.mxu2 %v5519_v36  ;;  %1977 = vmatpush.msra.mxu3 %v5524_v43  ;;  %v2650_v36 = vld [vmem:[%s6021_s5 + $0xe8] sm:$0xff]  ;;  %v2000_v43 = vld [vmem:[%s6021_s5 + $0x20] sm:$0xff] }
 0x247   : > { %1832 = vmatpush.msrb.mxu0 %v6680_v57  ;;  %1852 = vmatpush.msrb.mxu1 %v6681_v2  ;;  %v2672_v13 = vld [vmem:[%s6021_s5 + $0x188] sm:$0xff]  ;;  %v2661_v2 = vld [vmem:[%s6021_s5 + $0x138] sm:$0xff] }
 0x248   : > { %1958 = vmatpush.msra.mxu2 %v5536_v46  ;;  %1978 = vmatpush.msra.mxu3 %v5541_v38  ;;  %v2649_v46 = vld [vmem:[%s6021_s5 + $0xe0] sm:$0xff]  ;;  %v1999_v38 = vld [vmem:[%s6021_s5 + $0x18] sm:$0xff]  ;;  %v2646_v57 = vld [vmem:[%s6021_s5 + $0xc8] sm:$0xff] }
 0x249   : > { %1833 = vmatpush.msrb.mxu0 %v6682_v55  ;;  %1853 = vmatpush.msrb.mxu1 %v6683_v59  ;;  %v2671_v55 = vld [vmem:[%s6021_s5 + $0x180] sm:$0xff] }
 0x24a   : > { %1959 = vmatpush.msra.mxu2 %v5550_v63  ;;  %1979 = vmatpush.msra.mxu3 %v5555_v0  ;;  %v2634_v63 = vld [vmem:[%s6021_s5 + $0x70] sm:$0xff]  ;;  %v2645_v59 = vld [vmem:[%s6021_s5 + $0xc0] sm:$0xff] }
 0x24b   : > { %1834 = vmatpush.msrb.mxu0 %v6684_v19  ;;  %1854 = vmatpush.msrb.mxu1 %v6685_v28  ;;  %v1998_v0 = vld [vmem:[%s6021_s5 + $0x10] sm:$0xff]  ;;  %v2670_v28 = vld [vmem:[%s6021_s5 + $0x178] sm:$0xff] }
 0x24c   : > { %1960 = vmatpush.msra.mxu2 %v5566_v26  ;;  %1980 = vmatpush.msra.mxu3 %v5571_v20  ;;  %v2633_v26 = vld [vmem:[%s6021_s5 + $0x68] sm:$0xff]  ;;  %v2660_v19 = vld [vmem:[%s6021_s5 + $0x130] sm:$0xff] }
 0x24d   : > { %1835 = vmatpush.msrb.mxu0 %v6686_v10  ;;  %1855 = vmatpush.msrb.mxu1 %v6687_v40  ;;  %v1997_v20 = vld [vmem:[%s6021_s5 + $0x8] sm:$0xff] }
 0x24e   : > { %1961 = vmatpush.msra.mxu2 %v5580_v15  ;;  %1981 = vmatpush.msra.mxu3 %v5585_v56  ;;  %v2632_v15 = vld [vmem:[%s6021_s5 + $0x60] sm:$0xff] }
 0x24f   : > { %1836 = vmatpush.msrb.mxu0 %v6688_v47  ;;  %1856 = vmatpush.msrb.mxu1 %v6689_v51 }
 0x250   : > { %1962 = vmatpush.msra.mxu2 %v5594_v4  ;;  %1982 = vmatpush.msra.mxu3 %v5599_v48  ;;  %v5782_v48 = vpop.f32.mrf.mxu2 }
 0x251   : > { %1837 = vmatpush.msrb.mxu0 %v6690_v53  ;;  %1857 = vmatpush.msrb.mxu1 %v6691_v11  ;;  %v2644_v53 = vld [vmem:[%s6021_s5 + $0xb8] sm:$0xff]  ;;  %v2659_v11 = vld [vmem:[%s6021_s5 + $0x128] sm:$0xff] }
 0x252   : > { %1963 = vmatpush.msra.mxu2 %v2584_v42  ;;  %1983 = vmatpush.msra.mxu3 %v2597_v60  ;;  %v5784_v42 = vpop.f32.mrf.mxu3  ;;  %v2648_v60 = vld [vmem:[%s6021_s5 + $0xd8] sm:$0xff] }
 0x253   : > { %2614 = vmatmul.msk.f32.vlgmr.msrb.gmra.mxu0 %vm1439_vm1, %v5463_v52  ;;  %2616 = vmatmul.msk.f32.vlgmr.msrb.gmra.mxu1 %vm1439_vm1, %v5463_v52  ;;  %v2004_v52 = vld [vmem:[%s6021_s5 + $0x40] sm:$0xff] }
 0x254   : > { %2621 = vmatpush.msk.msra.mxu0 %vm1443_vm0, %v6692_v14  ;;  %2623 = vmatpush.msk.msra.mxu1 %vm1443_vm0, %v6693_v30  ;;  %v2669_v14 = vld [vmem:[%s6021_s5 + $0x170] sm:$0xff] }
 0x255   : > { %1964 = vmatpush.msra.mxu2 %v5618_v34  ;;  %1984 = vmatpush.msra.mxu3 %v2596_v9  ;;  %v1996_v34 = vld [vmem:[%s6021_s5] sm:$0xff]  ;;  %v2631_v9 = vld [vmem:[%s6021_s5 + $0x58] sm:$0xff]  ;;  %v2643_v30 = vld [vmem:[%s6021_s5 + $0xb0] sm:$0xff] }
 0x256   : > { %1910 = vmatpush.msra.mxu0 %v6694_v18  ;;  %1930 = vmatpush.msra.mxu1 %v6695_v54  ;;  %v2668_v18 = vld [vmem:[%s6021_s5 + $0x168] sm:$0xff] }
 0x257   : > { %2626 = vmatmul.msk.f32.vlgmr.msra.gmra.mxu2 %vm1439_vm1, %v1946_v5  ;;  %2628 = vmatmul.msk.f32.vlgmr.msra.gmra.mxu3 %vm1439_vm1, %v1946_v5  ;;  %v2658_v5 = vld [vmem:[%s6021_s5 + $0x120] sm:$0xff]  ;;  %v2642_v54 = vld [vmem:[%s6021_s5 + $0xa8] sm:$0xff] }
 0x258   : > { %1911 = vmatpush.msra.mxu0 %v6696_v35  ;;  %1931 = vmatpush.msra.mxu1 %v6697_v24  ;;  %v2657_v35 = vld [vmem:[%s6021_s5 + $0x118] sm:$0xff]  ;;  %v2667_v24 = vld [vmem:[%s6021_s5 + $0x160] sm:$0xff] }
 0x259   : > { %2051 = vmatpush.msrb.mxu3 %v2639_v41  ;;  %2086 = vmatpush.msrb.mxu2 %v2650_v36 }
 0x25a   : > { %1912 = vmatpush.msra.mxu0 %v6698_v25  ;;  %1932 = vmatpush.msra.mxu1 %v6699_v58  ;;  %v2641_v25 = vld [vmem:[%s6021_s5 + $0xa0] sm:$0xff]  ;;  %v2656_v58 = vld [vmem:[%s6021_s5 + $0x110] sm:$0xff] }
 0x25b   : > { %2052 = vmatpush.msrb.mxu3 %v2638_v29  ;;  %2087 = vmatpush.msrb.mxu2 %v2649_v46 }
 0x25c   : > { %1913 = vmatpush.msra.mxu0 %v6700_v21  ;;  %1933 = vmatpush.msra.mxu1 %v6701_v17  ;;  %v2666_v21 = vld [vmem:[%s6021_s5 + $0x158] sm:$0xff]  ;;  %v2655_v17 = vld [vmem:[%s6021_s5 + $0x108] sm:$0xff] }
 0x25d   : > { %2053 = vmatpush.msrb.mxu3 %v2637_v37  ;;  %2088 = vmatpush.msrb.mxu2 %v2648_v60  ;;  %v2184_v37 = vld [vmem:[%s6023_s7 + $0x60] sm:$0xff] }
 0x25e   : > { %1914 = vmatpush.msra.mxu0 %v6702_v1  ;;  %1934 = vmatpush.msra.mxu1 %v6703_v22  ;;  %v2665_v1 = vld [vmem:[%s6021_s5 + $0x150] sm:$0xff] }
 0x25f   : > { %2054 = vmatpush.msrb.mxu3 %v2636_v23 }
 0x260   : > { %1915 = vmatpush.msra.mxu0 %v6704_v45  ;;  %1935 = vmatpush.msra.mxu1 %v6705_v50  ;;  %v2654_v50 = vld [vmem:[%s6021_s5 + $0x100] sm:$0xff] }
 0x261   : > { %2055 = vmatpush.msrb.mxu3 %v2635_v39 }
 0x262   : > { %1916 = vmatpush.msra.mxu0 %v6706_v61  ;;  %1936 = vmatpush.msra.mxu1 %v6707_v27  ;;  %v2664_v61 = vld [vmem:[%s6021_s5 + $0x148] sm:$0xff] }
 0x263   : > { %2056 = vmatpush.msrb.mxu3 %v2634_v63 }
 0x264   : > { %1917 = vmatpush.msra.mxu0 %v6708_v3  ;;  %1937 = vmatpush.msra.mxu1 %v6709_v16  ;;  %v2653_v16 = vld [vmem:[%s6021_s5 + $0xf8] sm:$0xff] }
 0x265   : > { %2057 = vmatpush.msrb.mxu3 %v2633_v26 }
 0x266   : > { %1918 = vmatpush.msra.mxu0 %v6710_v62  ;;  %1938 = vmatpush.msra.mxu1 %v6711_v31  ;;  %v2663_v62 = vld [vmem:[%s6021_s5 + $0x140] sm:$0xff]  ;;  %v2652_v31 = vld [vmem:[%s6021_s5 + $0xf0] sm:$0xff] }
 0x267   : > { %2058 = vmatpush.msrb.mxu3 %v2632_v15 }
 0x268   : > { %1919 = vmatpush.msra.mxu0 %v6712_v8  ;;  %1939 = vmatpush.msra.mxu1 %v6713_v7 }
 0x269   : > { %2622 = vmatmul.msk.f32.vlgmr.msra.gmra.mxu0 %vm1439_vm1, %v5627_v44  ;;  %2624 = vmatmul.msk.f32.vlgmr.msra.gmra.mxu1 %vm1439_vm1, %v5627_v44  ;;  %v2647_v44 = vld [vmem:[%s6021_s5 + $0xd0] sm:$0xff] }
 0x26a   : > { %2016 = vmatpush.msrb.mxu0 %v2005_v6  ;;  %2059 = vmatpush.msrb.mxu3 %v2631_v9  ;;  %v2186_v6 = vld [vmem:[%s6023_s7 + $0x70] sm:$0xff] }
 0x26b   : > { %2089 = vmatpush.msrb.mxu2 %v2647_v44  ;;  %2193 = vmatpush.msrb.mxu1 %v2186_v6 }
 0x26c   : > { %2017 = vmatpush.msrb.mxu0 %v2004_v52  ;;  %2060 = vmatpush.msrb.mxu3 %v2630_v12  ;;  %v2185_v52 = vld [vmem:[%s6023_s7 + $0x68] sm:$0xff] }
 0x26d   : > { %2090 = vmatpush.msrb.mxu2 %v2646_v57  ;;  %2194 = vmatpush.msrb.mxu1 %v2185_v52 }
 0x26e   : > { %2018 = vmatpush.msrb.mxu0 %v2003_v32  ;;  %2121 = vmatpush.msra.mxu3 %v2661_v2 }
 0x26f   : > { %2091 = vmatpush.msrb.mxu2 %v2645_v59  ;;  %2195 = vmatpush.msrb.mxu1 %v2184_v37  ;;  %v2213_v37 = vld [vmem:[%s6025_s9] sm:$0xff] }
 0x270   : > { %2019 = vmatpush.msrb.mxu0 %v2002_v33  ;;  %2122 = vmatpush.msra.mxu3 %v2660_v19 }
 0x271   : > { %2092 = vmatpush.msrb.mxu2 %v2644_v53  ;;  %v2180_v53 = vld [vmem:[%s6023_s7 + $0x40] sm:$0xff] }
 0x272   : > { %2020 = vmatpush.msrb.mxu0 %v2001_v49  ;;  %2123 = vmatpush.msra.mxu3 %v2659_v11  ;;  %v2179_v11 = vld [vmem:[%s6023_s7 + $0x38] sm:$0xff] }
 0x273   : > { %2093 = vmatpush.msrb.mxu2 %v2643_v30  ;;  %v2177_v30 = vld [vmem:[%s6023_s7 + $0x28] sm:$0xff] }
 0x274   : > { %2021 = vmatpush.msrb.mxu0 %v2000_v43  ;;  %2124 = vmatpush.msra.mxu3 %v2658_v5  ;;  %v2176_v5 = vld [vmem:[%s6023_s7 + $0x20] sm:$0xff] }
 0x275   : > { %2094 = vmatpush.msrb.mxu2 %v2642_v54  ;;  %v2174_v54 = vld [vmem:[%s6023_s7 + $0x10] sm:$0xff] }
 0x276   : > { %2022 = vmatpush.msrb.mxu0 %v1999_v38  ;;  %2125 = vmatpush.msra.mxu3 %v2657_v35  ;;  %v2173_v35 = vld [vmem:[%s6023_s7 + $0x8] sm:$0xff] }
 0x277   : > { %2095 = vmatpush.msrb.mxu2 %v2641_v25  ;;  %v2223_v25 = vld [vmem:[%s6025_s9 + $0x50] sm:$0xf] }
 0x278   : > { %2023 = vmatpush.msrb.mxu0 %v1998_v0  ;;  %2126 = vmatpush.msra.mxu3 %v2656_v58  ;;  %v2222_v58 = vld [vmem:[%s6025_s9 + $0x48] sm:$0xff] }
 0x279   : > { %2675 = vmatpush.msk.msra.mxu2 %vm1443_vm0, %v2223_v25 }
 0x27a   : > { %2024 = vmatpush.msrb.mxu0 %v1997_v20  ;;  %2127 = vmatpush.msra.mxu3 %v2655_v17  ;;  %v2220_v17 = vld [vmem:[%s6025_s9 + $0x38] sm:$0xff] }
 0x27b   : > { %2237 = vmatpush.msra.mxu2 %v2222_v58 }
 0x27c   : > { %2025 = vmatpush.msrb.mxu0 %v1996_v34  ;;  %2128 = vmatpush.msra.mxu3 %v2654_v50  ;;  %v2720_v34 = vld [vmem:[%s6020_s4] ss:$0 sm:$0xff]  ;;  %v2216_v50 = vld [vmem:[%s6025_s9 + $0x18] sm:$0xff] }
 0x27e   : > { %2156 = vmatpush.msra.mxu0 %v2672_v13  ;;  %2129 = vmatpush.msra.mxu3 %v2653_v16 }
 0x280   : > { %2157 = vmatpush.msra.mxu0 %v2671_v55  ;;  %2130 = vmatpush.msra.mxu3 %v2652_v31 }
 0x282   : > { %2158 = vmatpush.msra.mxu0 %v2670_v28 }
 0x284   : > { %2159 = vmatpush.msra.mxu0 %v2669_v14  ;;  %v2178_v14 = vld [vmem:[%s6023_s7 + $0x30] sm:$0xff] }
 0x286   : > { %2160 = vmatpush.msra.mxu0 %v2668_v18  ;;  %v2175_v18 = vld [vmem:[%s6023_s7 + $0x18] sm:$0xff] }
 0x288   : > { %2161 = vmatpush.msra.mxu0 %v2667_v24  ;;  %v2172_v24 = vld [vmem:[%s6023_s7] sm:$0xff] }
 0x28a   : > { %2162 = vmatpush.msra.mxu0 %v2666_v21  ;;  %v2221_v21 = vld [vmem:[%s6025_s9 + $0x40] sm:$0xff] }
 0x28b   : > { %2238 = vmatpush.msra.mxu2 %v2221_v21 }
 0x28c   : > { %2163 = vmatpush.msra.mxu0 %v2665_v1  ;;  %v2219_v1 = vld [vmem:[%s6025_s9 + $0x30] sm:$0xff] }
 0x28d   : > { %2239 = vmatpush.msra.mxu2 %v2220_v17 }
 0x28e   : > { %2164 = vmatpush.msra.mxu0 %v2664_v61  ;;  %v1995_v61 = vld [vmem:[%s6022_s6] sm:$0x1] }
 0x28f   : > { %2240 = vmatpush.msra.mxu2 %v2219_v1 }
 0x290   : > { %2165 = vmatpush.msra.mxu0 %v2663_v62 }
 0x29f   : > { %v5778_v56 = vpop.f32.mrf.mxu0  ;;  %v5780_v4 = vpop.f32.mrf.mxu1 }
 0x2a0   : > { %v1526_v8 = vadd.f32 %v5782_v48, %v5778_v56  ;;  %v1549_v7 = vadd.f32 %v5784_v42, %v5780_v4 }
 0x2a7   : > { %v5822_v10 = vpop.f32.mrf.mxu2  ;;  %v5824_v40 = vpop.f32.mrf.mxu3 }
 0x2a8   : > { %v1586_v47 = vpop.f32.mrf.mxu0  ;;  %v1621_v51 = vpop.f32.mrf.mxu1 }
 0x2a9   : > { %v1624_v29 = vadd.f32 %v1586_v47, %v1526_v8  ;;  %v1625_v33 = vadd.f32 %v1621_v51, %v1549_v7  ;;  %v2182_v47 = vld [vmem:[%s6023_s7 + $0x50] sm:$0xff]  ;;  %v2181_v51 = vld [vmem:[%s6023_s7 + $0x48] sm:$0xff] }
 0x2ab   : > { %v1699_v39 = vadd.f32 %v5822_v10, %v1624_v29  ;;  %v1700_v46 = vadd.f32 %v5824_v40, %v1625_v33  ;;  %v2183_v40 = vld [vmem:[%s6023_s7 + $0x58] sm:$0xff]  ;;  %v2215_v29 = vld [vmem:[%s6025_s9 + $0x10] sm:$0xff]  ;;  %v2214_v33 = vld [vmem:[%s6025_s9 + $0x8] sm:$0xff] }
 0x2ac   : > { %2196 = vmatpush.msrb.mxu1 %v2183_v40 }
 0x2ae   : > { %2197 = vmatpush.msrb.mxu1 %v2182_v47 }
 0x2b0   : > { %2198 = vmatpush.msrb.mxu1 %v2181_v51 }
 0x2b2   : > { %v1799_v27 = vpop.f32.mrf.mxu2  ;;  %v1819_v3 = vpop.f32.mrf.mxu3  ;;  %2199 = vmatpush.msrb.mxu1 %v2180_v53 }
 0x2b4   : > { %2200 = vmatpush.msrb.mxu1 %v2179_v11 }
 0x2b6   : > { %2201 = vmatpush.msrb.mxu1 %v2178_v14 }
 0x2b8   : > { %v1736_v22 = vpop.f32.mrf.mxu0  ;;  %v1771_v45 = vpop.f32.mrf.mxu1  ;;  %2202 = vmatpush.msrb.mxu1 %v2177_v30 }
 0x2b9   : > { %v1774_v38 = vadd.f32 %v1736_v22, %v1699_v39  ;;  %v1775_v63 = vadd.f32 %v1771_v45, %v1700_v46  ;;  %v2218_v22 = vld [vmem:[%s6025_s9 + $0x28] sm:$0xff]  ;;  %v2217_v45 = vld [vmem:[%s6025_s9 + $0x20] sm:$0xff] }
 0x2ba   : > { %2203 = vmatpush.msrb.mxu1 %v2176_v5  ;;  %2241 = vmatpush.msra.mxu2 %v2218_v22  ;;  %v2224_v39 = vld [vmem:[%s6026_s10] sm:$0x1] }
 0x2bb   : > { %v1776_v60 = vmax.f32 %v1774_v38, %v1775_v63 }
 0x2bc   : > { %2204 = vmatpush.msrb.mxu1 %v2175_v18  ;;  %2242 = vmatpush.msra.mxu2 %v2217_v45 }
 0x2bd   : > { %v1781_v12 = vadd.f32 %v2720_v34, %v1776_v60 }
 0x2be   : > { %2205 = vmatpush.msrb.mxu1 %v2174_v54  ;;  %2243 = vmatpush.msra.mxu2 %v2216_v50 }
 0x2c0   : > { %2206 = vmatpush.msrb.mxu1 %v2173_v35  ;;  %2244 = vmatpush.msra.mxu2 %v2215_v29 }
 0x2c2   : > { %v1879_v49 = vpop.f32.mrf.mxu2  ;;  %v1899_v23 = vpop.f32.mrf.mxu3  ;;  %2207 = vmatpush.msrb.mxu1 %v2172_v24  ;;  %2245 = vmatpush.msra.mxu2 %v2214_v33 }
 0x2c4   : > { %2246 = vmatpush.msra.mxu2 %v2213_v37 }
 0x2d0   : > { %v1839_v41 = vpop.f32.mrf.mxu0  ;;  %v1859_v32 = vpop.f32.mrf.mxu1 }
 0x2d1   : > { %v1840_v36 = vadd.f32 %v1839_v41, %v1799_v27  ;;  %v1860_v43 = vadd.f32 %v1859_v32, %v1819_v3 }
 0x2d3   : > { %v1902_v0 = vadd.f32 %v1879_v49, %v1840_v36  ;;  %v1903_v26 = vadd.f32 %v1899_v23, %v1860_v43  ;;  %v2187_v49 = vld [vmem:[%s6024_s8] sm:$0x1] }
 0x2da   : > { %v1966_v48 = vpop.f32.mrf.mxu2  ;;  %v1986_v42 = vpop.f32.mrf.mxu3 }
 0x2e6   : > { %v1921_v20 = vpop.f32.mrf.mxu0  ;;  %v1941_v15 = vpop.f32.mrf.mxu1 }
 0x2e7   : > { %v1944_v56 = vadd.f32 %v1921_v20, %v1902_v0  ;;  %v1945_v4 = vadd.f32 %v1941_v15, %v1903_v26 }
 0x2e9   : > { %v1989_v9 = vadd.f32 %v1966_v48, %v1944_v56  ;;  %v1990_v44 = vadd.f32 %v1986_v42, %v1945_v4 }
 0x2eb   : > { %v1991_v13 = vmax.f32 %v1989_v9, %v1990_v44 }
 0x2ed   : > { %v1992_v57 = vadd.f32 %v2720_v34, %v1991_v13 }
 0x2ef   : > { %v1993_v2 = vmax.f32 %v1781_v12, %v1992_v57 }
 0x2f1   : > { %v1994_v55 = vmax.f32 %v1993_v2, 0.0 }
 0x2f3   : > { %2629 = vmatmul.msk.f32.vlgmr.msrb.gmra.mxu0 %vm2006_vm2, %v1994_v55  ;;  %v2042_v59 = vrot.slane %v1994_v55, 1  ;;  %v2077_v19 = vrot.slane %v1994_v55, 2  ;;  %v2147_v28 = vrot.slane %v1994_v55, 4  ;;  %v2112_v10 = vrot.slane %v1994_v55, 3 }
 0x2f5   : > { %2640 = vmatmul.msk.f32.vlgmr.msrb.gmra.mxu3 %vm2006_vm2, %v2042_v59  ;;  %2651 = vmatmul.msk.f32.vlgmr.msrb.gmra.mxu2 %vm2006_vm2, %v2077_v19 }
 0x2fb   : > { %2673 = vmatmul.msk.f32.vlgmr.msra.gmra.mxu0 %vm2006_vm2, %v2147_v28 }
 0x2fd   : > { %2662 = vmatmul.msk.f32.vlgmr.msra.gmra.mxu3 %vm2006_vm2, %v2112_v10 }
 0x370   : > { %v2027_v27 = vpop.f32.mrf.mxu0 }
 0x371   : > { %v2030_v16 = vadd.f32 %v2027_v27, %v1995_v61 }
 0x378   : > { %v2062_v3 = vpop.f32.mrf.mxu3  ;;  %v2097_v31 = vpop.f32.mrf.mxu2 }
 0x379   : > { %v2065_v62 = vadd.f32 %v2062_v3, %v2030_v16  ;;  %v2167_v52 = vpop.f32.mrf.mxu0 }
 0x37b   : > { %v2100_v8 = vadd.f32 %v2097_v31, %v2065_v62 }
 0x380   : > { %v2132_v7 = vpop.f32.mrf.mxu3 }
 0x381   : > { %v2135_v6 = vadd.f32 %v2132_v7, %v2100_v8 }
 0x383   : > { %v2170_v41 = vadd.f32 %v2167_v52, %v2135_v6 }
 0x385   : > { %v2171_v32 = vmax.f32 %v2170_v41, 0.0 }
 0x387   : > { %2674 = vmatmul.msk.f32.vlgmr.msrb.gmra.mxu1 %vm2188_vm3, %v2171_v32 }
 0x404   : > { %v2209_v23 = vpop.f32.mrf.mxu1 }
 0x405   : > { %v2210_v36 = vadd.f32 %v2209_v23, %v2187_v49 }
 0x407   : > { %v2212_v43 = vmax.f32 %v2210_v36, 0.0 }
 0x409   : > { %2676 = vmatmul.msk.f32.vlgmr.msra.gmra.mxu2 %vm1439_vm1, %v2212_v43 }
 0x48c   : > { %v2248_v46 = vpop.f32.mrf.mxu2 }
 0x48d   : > { %v2249_v38 = vadd.f32 %v2248_v46, %v2224_v39 }
 0x48f   : > { %v2252_v63 = vsel %vm2251_vm4, %v2249_v38, -inf }
 0x490   : > { %2253 = vmax.xlane.f32.xlu0 %v2252_v63 }
 0x503   : > { %v2254_v0 = vpop.xlane.xlu0 %2253 }
 0x504   : > { %v2255_v26 = vsub.f32 %v2249_v38, %v2254_v0 }
 0x506   : > { %v2256_v20 = vmul.f32 1.442695, %v2255_v26 }
 0x508   : > { %2721 = vpow2.f32 %v2256_v20 }
 0x50e   : > { %v2722_v15 = vpop.eup %2721 }
 0x50f   : > { %v2258_v56 = vsel %vm2251_vm4, %v2722_v15, 0.0 }
 0x510   : > { %2259 = vadd.xlane.f32.xlu0 %v2258_v56 }
 0x583   : > { %v2260_v4 = vpop.xlane.xlu0 %2259 }
 0x584   : > { %2723 = vlog2.f32 %v2260_v4 }
 0x58a   : > { %v2724_v48 = vpop.eup %2723 }
 0x58b   : > { %v2262_v42 = vmul.f32 0.6931472, %v2724_v48 }
 0x58d   : > { %v2263_v60 = vadd.f32 %v2262_v42, %v2254_v0 }
 0x58f   : > { %v2264_v34 = vsub.f32 %v2249_v38, %v2263_v60 }
 0x591   : > { %2265 = vst.msk [vmem:[%s378_s25] sm:$0x1] %vm2251_vm4, %v2264_v34 }
 0x592   : > { %2899 = shalt.err (!%p2896_p3)
}
 0x593   : > { %2680 = dma.vmem_to_hbm [thread:$0]  (%p3034_p5), %s2278_s0, 16, %s2280_s29, %s2267_s16  }
 0x594 PF: > { %p2686_p4 = scmp.ge.s32.totalorder %s2934_s20, 2  ;;  %s2291_s15 = sand.u32 1, %s2922_s17  }
 0x595   : > { %s2292_s25 = scalar_lea.sflag [#allocation3], %s2291_s15 }
 0x596   : > { %p2683_p7 = pnand %p2686_p4, %p3038_p6 }
 0x598   : > { %p2684_p8 = pneg %p2683_p7 }
 0x59a   : > { %2917 = dma.done.wait (%p2684_p8), %s2292_s25, 16  }
 0x59b   : > { %2919 = vsyncadd (%p2684_p8), %s2292_s25, 4294967280  ;;  %p21_p9 = scmp.ge.s32.totalorder %s3021_s23, 4   ;;  %s6714_s17 = smov %s2926_s18 }
 0x59c   : > { %s6715_s18 = smov %s2930_s19  ;;  %s6716_s19 = smov %s3032_s26 }
 0x59d   : > { %s6717_s20 = smov %s3021_s23  ;;  %23 = sbr.rel (!%p21_p9) target bundleno = 5 (0x5), region = 124 }
 0x5a2   :  { %2297 = vsyncpa [#allocation3], 1 }
 0x5a3   :  { %2299 = vsyncpa [#allocation3 + $0x1], 1 }

</bundles_post_ra>
